<compile_context>
chip_gen: v7x
topology: tpu7x:2x2x1
jax: 0.10.0
libtpu: 0.0.40
codegen_flags: <defaults>
</compile_context>

<pallas_src>
import functools

import jax
import jax.numpy as jnp
from jax.experimental import pallas as pl
from jax.experimental.pallas import tpu as pltpu


def _round_up(x, m):
    return (x + m - 1) // m * m


# --------------------------- fused Pallas kernel ----------------------------

def _fused_denoise_kernel(x_ref, w1_ref, w2_ref, w3_ref,
                          b1_ref, b2_ref, b3_ref, o_ref,
                          slab1, slab2, acc,
                          *, H, W, c1tap, c2tap, cout, dup_mid):
    # x_ref  : (1, H, W, c1tap)        bf16  channel-padded input image
    # w1_ref : (3, 3*c1tap, Cop)       bf16  width-folded weights (dh major)
    # w2/w3  : (3, 3*c2tap, Cop)       bf16
    # bX_ref : (1, Cop)                f32
    # o_ref  : (1, H, W, cout)         f32   real output channels only
    # slab1  : (H+2, W, 3*c1tap)       bf16  width-im2col, layer 1
    # slab2  : (H+2, W, 3*c2tap)       bf16  width-im2col, layers 2 & 3 (reused)
    # acc    : (H*W, Cop)              f32   accumulator
    K1, K2 = 3 * c1tap, 3 * c2tap

    def zero_borders(slab, K):
        # Only the padding border cells need zeros; the interior is fully
        # overwritten by fill_slab before every matmul.  Re-zeroed each grid
        # step (cheap) so correctness holds when the batch axis is sharded
        # across TensorCores.
        slab[0:1, :, :] = jnp.zeros((1, W, K), slab.dtype)
        slab[H + 1:H + 2, :, :] = jnp.zeros((1, W, K), slab.dtype)
        slab[:, 0:1, :] = jnp.zeros((H + 2, 1, K), slab.dtype)
        slab[:, W - 1:W, :] = jnp.zeros((H + 2, 1, K), slab.dtype)

    def fill_slab(slab, src_hwc, ctap, dup):
        # Width-im2col: slab[hp, w, dw*ctap + c] = padded_src[hp, w + dw, c].
        # dw == 0 : destination columns 1..W-1  <- src columns 0..W-2
        slab[1:H + 1, 1:W, 0:ctap] = src_hwc[:, 0:W - 1, 0:ctap]
        # dw == 1 : all destination columns    <- src columns 0..W-1
        # (duplicated output lanes [ctap:2*ctap] give matching src/dst lane
        #  offsets -> plain masked store, no lane rotation)
        lo = ctap if dup else 0
        slab[1:H + 1, :, ctap:2 * ctap] = src_hwc[:, :, lo:lo + ctap]
        # dw == 2 : destination columns 0..W-2 <- src columns 1..W-1
        slab[1:H + 1, 0:W - 1, 2 * ctap:3 * ctap] = src_hwc[:, 1:W, 0:ctap]

    def conv_layer(slab, K, w_ref, b_ref, relu):
        # Three MXU matmuls (one per height tap), bias folded into dh == 0.
        for dh in range(3):
            lhs = slab[dh:dh + H, :, :].reshape(H * W, K)
            contrib = jnp.dot(lhs, w_ref[dh],
                              preferred_element_type=jnp.float32)
            if dh == 0:
                acc[...] = contrib + b_ref[...]
            else:
                acc[...] += contrib
        y = acc[...]
        return jnp.maximum(y, 0.0) if relu else y       # (H*W, Cop) float32

    zero_borders(slab1, K1)
    zero_borders(slab2, K2)

    # net1 + relu1 : image -> slab1 -> y1
    fill_slab(slab1, x_ref[0], c1tap, dup=False)
    y1 = conv_layer(slab1, K1, w1_ref, b1_ref, relu=True)

    # net2 + relu2 : y1 -> slab2 -> y2      (intermediates stay in VMEM, bf16)
    fill_slab(slab2, y1.reshape(H, W, -1).astype(slab2.dtype), c2tap, dup_mid)
    y2 = conv_layer(slab2, K2, w2_ref, b2_ref, relu=True)

    # net3 (no relu) : y2 -> slab2 (reused; y2 fully materialized in acc) -> out
    fill_slab(slab2, y2.reshape(H, W, -1).astype(slab2.dtype), c2tap, dup_mid)
    y3 = conv_layer(slab2, K2, w3_ref, b3_ref, relu=False)
    o_ref[...] = y3[:, :cout].reshape(1, H, W, cout).astype(o_ref.dtype)


# ------------------------------ DenoiseM ------------------------------------

def init_denoise_m_params(key, use_sigma=False):
    """Deterministic parameter init mirroring DenoiseM.__init__ shapes."""
    n = 4
    cin = (25 if use_sigma else 24) * n   # 100 or 96
    c = 16 * n                            # 64
    cout = 16 * n                         # 64

    def conv_params(k, ci, co):
        kw, kb = jax.random.split(k)
        fan_in = ci * 3 * 3
        bound = 1.0 / jnp.sqrt(fan_in)
        # PyTorch OIHW -> HWIO.
        w_oihw = jax.random.uniform(
            kw, (co, ci, 3, 3), jnp.float32, -bound, bound)
        w_hwio = jnp.transpose(w_oihw, (2, 3, 1, 0))
        b = jax.random.uniform(kb, (co,), jnp.float32, -bound, bound)
        return w_hwio, b

    k1, k2, k3 = jax.random.split(key, 3)
    return {
        "net1": conv_params(k1, cin, c),
        "net2": conv_params(k2, c, c),
        "net3": conv_params(k3, c, cout),
        "cin": cin,
    }


def denoise_m_forward(params, x_nchw):
    """Forward pass matching DenoiseM.forward (input NCHW, output NCHW)."""
    w1, b1 = params["net1"]
    w2, b2 = params["net2"]
    w3, b3 = params["net3"]
    cin, cmid = w1.shape[2], w1.shape[3]
    cout = w3.shape[3]
    assert cmid % 16 == 0 and cout % 16 == 0      # bf16 sublane packing of K

    Cop = _round_up(max(cmid, cout), 128)   # lane-dense output width (128)
    c1tap = _round_up(cin, 128)             # layer-1 per-tap K (aligned taps)
    c2tap = cmid                            # layers-2/3 per-tap K (de-padded)
    dup_mid = (Cop == 2 * cmid)             # duplicate output cols (64 -> 128)

    x = jnp.transpose(x_nchw, (0, 2, 3, 1))          # NCHW -> NHWC
    N, H, W, _ = x.shape
    xp = x.astype(jnp.bfloat16)
    if c1tap != cin:
        # Fused with the transpose/cast above by XLA; pad lanes are real zeros.
        xp = jnp.pad(xp, ((0, 0), (0, 0), (0, 0), (0, c1tap - cin)))

    def prep_out(a, axis):
        co = a.shape[axis]
        if co == Cop:
            return a
        if dup_mid and Cop % co == 0:
            return jnp.concatenate([a] * (Cop // co), axis=axis)
        pad = [(0, 0)] * a.ndim
        pad[axis] = (0, Cop - co)
        return jnp.pad(a, pad)

    def prep_w(w, ck):
        # (3, 3, ci, co) HWIO -> (3, 3*ck, Cop), K index = dw*ck + c.
        wp = prep_out(w, 3)
        ci = w.shape[2]
        if ck != ci:
            wp = jnp.pad(wp, ((0, 0), (0, 0), (0, ck - ci), (0, 0)))
        return wp.reshape(3, 3 * ck, Cop).astype(jnp.bfloat16)

    def prep_b(b):
        return prep_out(b, 0).reshape(1, Cop).astype(jnp.float32)

    # Explicit scoped-VMEM budget from the actual footprint (with 2x margin),
    # clamped to v7x's 64 MiB physical VMEM per TensorCore.
    BF16, F32 = 2, 4
    w_bytes = (3 * 3 * c1tap * Cop + 2 * (3 * 3 * c2tap * Cop)) * BF16
    est = (2 * H * W * c1tap * BF16            # input block  (double-buffered)
           + 2 * H * W * cout * F32            # output block (double-buffered)
           + 2 * (w_bytes + 3 * Cop * F32)     # weights + biases
           + (H + 2) * W * 3 * c1tap * BF16    # slab1
           + (H + 2) * W * 3 * c2tap * BF16    # slab2
           + H * W * Cop * F32)                # accumulator
    vmem_limit = int(min(64 * 1024 * 1024, max(2 * est, 32 * 1024 * 1024)))

    kernel = functools.partial(_fused_denoise_kernel, H=H, W=W,
                               c1tap=c1tap, c2tap=c2tap, cout=cout,
                               dup_mid=dup_mid)

    out = pl.pallas_call(
        kernel,
        out_shape=jax.ShapeDtypeStruct((N, H, W, cout), jnp.float32),
        grid=(N,),
        in_specs=[
            pl.BlockSpec((1, H, W, c1tap), lambda n: (n, 0, 0, 0)),
            pl.BlockSpec((3, 3 * c1tap, Cop), lambda n: (0, 0, 0)),
            pl.BlockSpec((3, 3 * c2tap, Cop), lambda n: (0, 0, 0)),
            pl.BlockSpec((3, 3 * c2tap, Cop), lambda n: (0, 0, 0)),
            pl.BlockSpec((1, Cop), lambda n: (0, 0)),
            pl.BlockSpec((1, Cop), lambda n: (0, 0)),
            pl.BlockSpec((1, Cop), lambda n: (0, 0)),
        ],
        out_specs=pl.BlockSpec((1, H, W, cout), lambda n: (n, 0, 0, 0)),
        scratch_shapes=[
            pltpu.VMEM((H + 2, W, 3 * c1tap), jnp.bfloat16),   # slab1 (layer 1)
            pltpu.VMEM((H + 2, W, 3 * c2tap), jnp.bfloat16),   # slab2 (layers 2&3)
            pltpu.VMEM((H * W, Cop), jnp.float32),             # f32 accumulator
        ],
        compiler_params=pltpu.CompilerParams(
            dimension_semantics=("parallel",),
            vmem_limit_bytes=vmem_limit),
    )(xp, prep_w(w1, c1tap), prep_w(w2, c2tap), prep_w(w3, c2tap),
      prep_b(b1), prep_b(b2), prep_b(b3))

    # TODO(synk): fuse this NHWC->NCHW transpose into the consumer.
    return jnp.transpose(out, (0, 3, 1, 2))


# --------------------------- reference (checks) -----------------------------

def _conv3x3_ref(x_nhwc, w_hwio, b, relu):
    # Mirrors the kernel's numerics: bf16 operands, f32 accumulation.
    y = jax.lax.conv_general_dilated(
        x_nhwc.astype(jnp.bfloat16), w_hwio.astype(jnp.bfloat16),
        window_strides=(1, 1), padding="SAME",
        dimension_numbers=("NHWC", "HWIO", "NHWC"),
        preferred_element_type=jnp.float32)
    y = y + b
    return jnp.maximum(y, 0.0) if relu else y


def denoise_m_ref(params, x_nchw):
    x = jnp.transpose(x_nchw, (0, 2, 3, 1))
    w1, b1 = params["net1"]
    w2, b2 = params["net2"]
    w3, b3 = params["net3"]
    h1 = _conv3x3_ref(x, w1, b1, True)
    h2 = _conv3x3_ref(h1, w2, b2, True)
    out = _conv3x3_ref(h2, w3, b3, False)
    return jnp.transpose(out, (0, 3, 1, 2))


# ------------------------------- main ---------------------------------------

if __name__ == "__main__":
    key = jax.random.PRNGKey(0)
    pkey, xkey = jax.random.split(key)

    params = init_denoise_m_params(pkey, use_sigma=False)
    N, Cin, H, W = 2, params["cin"], 16, 16      # cin = 24*4 = 96
    x = jax.random.normal(xkey, (N, Cin, H, W), jnp.float32)  # NCHW like PyTorch

    out = jax.block_until_ready(denoise_m_forward(params, x))
    assert out.shape == (N, 64, H, W), out.shape

    ref = jax.block_until_ready(denoise_m_ref(params, x))
    max_err = float(jnp.max(jnp.abs(out - ref)))
    assert jnp.allclose(out, ref, atol=1e-2, rtol=1e-2), max_err

    print("KERNEL_OK")
</pallas_src>

<mosaic_0001>
module attributes {stable_mosaic.version = 11 : i64} {
  func.func @_fused_denoise_kernel(%arg0: i32, %arg1: memref<1x16x16x128xbf16, #tpu.memory_space<vmem>>, %arg2: memref<3x384x128xbf16, #tpu.memory_space<vmem>>, %arg3: memref<3x192x128xbf16, #tpu.memory_space<vmem>>, %arg4: memref<3x192x128xbf16, #tpu.memory_space<vmem>>, %arg5: memref<1x128xf32, #tpu.memory_space<vmem>>, %arg6: memref<1x128xf32, #tpu.memory_space<vmem>>, %arg7: memref<1x128xf32, #tpu.memory_space<vmem>>, %arg8: memref<1x16x16x64xf32, #tpu.memory_space<vmem>>, %arg9: memref<18x16x384xbf16, #tpu.memory_space<vmem>>, %arg10: memref<18x16x192xbf16, #tpu.memory_space<vmem>>, %arg11: memref<256x128xf32, #tpu.memory_space<vmem>>) attributes {dimension_semantics = [#tpu.dimension_semantics<parallel>], iteration_bounds = array<i64: 2>, scalar_prefetch = 0 : i64, scratch_operands = 3 : i64, tpu.core_type = #tpu.core_type<tc>, window_params = [{transform_indices = @transform_0, window_bounds = array<i64: 1, 16, 16, 128>}, {pipeline_mode = #tpu.pipeline_mode<synchronous>, transform_indices = @transform_1, window_bounds = array<i64: 3, 384, 128>}, {pipeline_mode = #tpu.pipeline_mode<synchronous>, transform_indices = @transform_2, window_bounds = array<i64: 3, 192, 128>}, {pipeline_mode = #tpu.pipeline_mode<synchronous>, transform_indices = @transform_3, window_bounds = array<i64: 3, 192, 128>}, {pipeline_mode = #tpu.pipeline_mode<synchronous>, transform_indices = @transform_4, window_bounds = array<i64: 1, 128>}, {pipeline_mode = #tpu.pipeline_mode<synchronous>, transform_indices = @transform_5, window_bounds = array<i64: 1, 128>}, {pipeline_mode = #tpu.pipeline_mode<synchronous>, transform_indices = @transform_6, window_bounds = array<i64: 1, 128>}, {transform_indices = @transform_7, window_bounds = array<i64: 1, 16, 16, 64>}]} {
    %cst = arith.constant 0.000000e+00 : bf16
    %0 = vector.broadcast %cst : bf16 to vector<1x16x384xbf16>
    %c0 = arith.constant 0 : index
    %c0_0 = arith.constant 0 : index
    %c0_1 = arith.constant 0 : index
    %1 = vector.load %arg9[%c0, %c0_0, %c0_1] : memref<18x16x384xbf16, #tpu.memory_space<vmem>>, vector<1x16x384xbf16>
    tpu.vector_store %arg9[%c0, %c0_0, %c0_1], %0 {strides = array<i32>} : memref<18x16x384xbf16, #tpu.memory_space<vmem>>, vector<1x16x384xbf16>,
    %cst_2 = arith.constant 0.000000e+00 : bf16
    %2 = vector.broadcast %cst_2 : bf16 to vector<1x16x384xbf16>
    %c17 = arith.constant 17 : index
    %c0_3 = arith.constant 0 : index
    %c0_4 = arith.constant 0 : index
    %3 = vector.load %arg9[%c17, %c0_3, %c0_4] : memref<18x16x384xbf16, #tpu.memory_space<vmem>>, vector<1x16x384xbf16>
    tpu.vector_store %arg9[%c17, %c0_3, %c0_4], %2 {strides = array<i32>} : memref<18x16x384xbf16, #tpu.memory_space<vmem>>, vector<1x16x384xbf16>,
    %cst_5 = arith.constant 0.000000e+00 : bf16
    %4 = vector.broadcast %cst_5 : bf16 to vector<18x1x384xbf16>
    %c0_6 = arith.constant 0 : index
    %c0_7 = arith.constant 0 : index
    %c0_8 = arith.constant 0 : index
    %5 = vector.load %arg9[%c0_6, %c0_7, %c0_8] : memref<18x16x384xbf16, #tpu.memory_space<vmem>>, vector<18x1x384xbf16>
    tpu.vector_store %arg9[%c0_6, %c0_7, %c0_8], %4 {strides = array<i32>} : memref<18x16x384xbf16, #tpu.memory_space<vmem>>, vector<18x1x384xbf16>,
    %cst_9 = arith.constant 0.000000e+00 : bf16
    %6 = vector.broadcast %cst_9 : bf16 to vector<18x1x384xbf16>
    %c0_10 = arith.constant 0 : index
    %c15 = arith.constant 15 : index
    %c0_11 = arith.constant 0 : index
    %7 = vector.load %arg9[%c0_10, %c15, %c0_11] : memref<18x16x384xbf16, #tpu.memory_space<vmem>>, vector<18x1x384xbf16>
    tpu.vector_store %arg9[%c0_10, %c15, %c0_11], %6 {strides = array<i32>} : memref<18x16x384xbf16, #tpu.memory_space<vmem>>, vector<18x1x384xbf16>,
    %cst_12 = arith.constant 0.000000e+00 : bf16
    %8 = vector.broadcast %cst_12 : bf16 to vector<1x16x192xbf16>
    %c0_13 = arith.constant 0 : index
    %c0_14 = arith.constant 0 : index
    %c0_15 = arith.constant 0 : index
    %9 = vector.load %arg10[%c0_13, %c0_14, %c0_15] : memref<18x16x192xbf16, #tpu.memory_space<vmem>>, vector<1x16x192xbf16>
    tpu.vector_store %arg10[%c0_13, %c0_14, %c0_15], %8 {strides = array<i32>} : memref<18x16x192xbf16, #tpu.memory_space<vmem>>, vector<1x16x192xbf16>,
    %cst_16 = arith.constant 0.000000e+00 : bf16
    %10 = vector.broadcast %cst_16 : bf16 to vector<1x16x192xbf16>
    %c17_17 = arith.constant 17 : index
    %c0_18 = arith.constant 0 : index
    %c0_19 = arith.constant 0 : index
    %11 = vector.load %arg10[%c17_17, %c0_18, %c0_19] : memref<18x16x192xbf16, #tpu.memory_space<vmem>>, vector<1x16x192xbf16>
    tpu.vector_store %arg10[%c17_17, %c0_18, %c0_19], %10 {strides = array<i32>} : memref<18x16x192xbf16, #tpu.memory_space<vmem>>, vector<1x16x192xbf16>,
    %cst_20 = arith.constant 0.000000e+00 : bf16
    %12 = vector.broadcast %cst_20 : bf16 to vector<18x1x192xbf16>
    %c0_21 = arith.constant 0 : index
    %c0_22 = arith.constant 0 : index
    %c0_23 = arith.constant 0 : index
    %13 = vector.load %arg10[%c0_21, %c0_22, %c0_23] : memref<18x16x192xbf16, #tpu.memory_space<vmem>>, vector<18x1x192xbf16>
    tpu.vector_store %arg10[%c0_21, %c0_22, %c0_23], %12 {strides = array<i32>} : memref<18x16x192xbf16, #tpu.memory_space<vmem>>, vector<18x1x192xbf16>,
    %cst_24 = arith.constant 0.000000e+00 : bf16
    %14 = vector.broadcast %cst_24 : bf16 to vector<18x1x192xbf16>
    %c0_25 = arith.constant 0 : index
    %c15_26 = arith.constant 15 : index
    %c0_27 = arith.constant 0 : index
    %15 = vector.load %arg10[%c0_25, %c15_26, %c0_27] : memref<18x16x192xbf16, #tpu.memory_space<vmem>>, vector<18x1x192xbf16>
    tpu.vector_store %arg10[%c0_25, %c15_26, %c0_27], %14 {strides = array<i32>} : memref<18x16x192xbf16, #tpu.memory_space<vmem>>, vector<18x1x192xbf16>,
    %c0_28 = arith.constant 0 : index
    %c0_29 = arith.constant 0 : index
    %c0_30 = arith.constant 0 : index
    %c0_31 = arith.constant 0 : index
    %16 = vector.load %arg1[%c0_28, %c0_29, %c0_30, %c0_31] : memref<1x16x16x128xbf16, #tpu.memory_space<vmem>>, vector<1x16x16x128xbf16>
    %17 = vector.shape_cast %16 : vector<1x16x16x128xbf16> to vector<16x16x128xbf16>
    %18 = vector.extract_strided_slice %17 {offsets = [0, 0, 0], sizes = [16, 15, 128], strides = [1, 1, 1]} : vector<16x16x128xbf16> to vector<16x15x128xbf16>
    %c1 = arith.constant 1 : index
    %c1_32 = arith.constant 1 : index
    %c0_33 = arith.constant 0 : index
    %19 = vector.load %arg9[%c1, %c1_32, %c0_33] : memref<18x16x384xbf16, #tpu.memory_space<vmem>>, vector<16x15x128xbf16>
    tpu.vector_store %arg9[%c1, %c1_32, %c0_33], %18 {strides = array<i32>} : memref<18x16x384xbf16, #tpu.memory_space<vmem>>, vector<16x15x128xbf16>,
    %c1_34 = arith.constant 1 : index
    %c0_35 = arith.constant 0 : index
    %c128 = arith.constant 128 : index
    %20 = vector.load %arg9[%c1_34, %c0_35, %c128] : memref<18x16x384xbf16, #tpu.memory_space<vmem>>, vector<16x16x128xbf16>
    tpu.vector_store %arg9[%c1_34, %c0_35, %c128], %17 {strides = array<i32>} : memref<18x16x384xbf16, #tpu.memory_space<vmem>>, vector<16x16x128xbf16>,
    %21 = vector.extract_strided_slice %17 {offsets = [0, 1, 0], sizes = [16, 15, 128], strides = [1, 1, 1]} : vector<16x16x128xbf16> to vector<16x15x128xbf16>
    %c1_36 = arith.constant 1 : index
    %c0_37 = arith.constant 0 : index
    %c256 = arith.constant 256 : index
    %22 = vector.load %arg9[%c1_36, %c0_37, %c256] : memref<18x16x384xbf16, #tpu.memory_space<vmem>>, vector<16x15x128xbf16>
    tpu.vector_store %arg9[%c1_36, %c0_37, %c256], %21 {strides = array<i32>} : memref<18x16x384xbf16, #tpu.memory_space<vmem>>, vector<16x15x128xbf16>,
    %c0_38 = arith.constant 0 : index
    %c0_39 = arith.constant 0 : index
    %c0_40 = arith.constant 0 : index
    %23 = vector.load %arg9[%c0_38, %c0_39, %c0_40] : memref<18x16x384xbf16, #tpu.memory_space<vmem>>, vector<16x16x384xbf16>
    %24 = vector.shape_cast %23 : vector<16x16x384xbf16> to vector<256x384xbf16>
    %c0_41 = arith.constant 0 : index
    %c0_42 = arith.constant 0 : index
    %c0_43 = arith.constant 0 : index
    %25 = vector.load %arg2[%c0_41, %c0_42, %c0_43] : memref<3x384x128xbf16, #tpu.memory_space<vmem>>, vector<1x384x128xbf16>
    %26 = vector.shape_cast %25 : vector<1x384x128xbf16> to vector<384x128xbf16>
    %cst_44 = arith.constant dense<0.000000e+00> : vector<256x128xf32>
    %27 = tpu.matmul %24, %26, %cst_44 {dimension_numbers = #tpu.dot_dimension_numbers<[1], [0], [0], [1], [0, 0, 1, 1], [], []>} : vector<256x384xbf16>, vector<384x128xbf16>, vector<256x128xf32> -> vector<256x128xf32>
    %c0_45 = arith.constant 0 : index
    %c0_46 = arith.constant 0 : index
    %28 = vector.load %arg5[%c0_45, %c0_46] : memref<1x128xf32, #tpu.memory_space<vmem>>, vector<1x128xf32>
    %29 = vector.broadcast %28 : vector<1x128xf32> to vector<256x128xf32>
    %30 = arith.addf %27, %29 : vector<256x128xf32>
    %c0_47 = arith.constant 0 : index
    %c0_48 = arith.constant 0 : index
    %31 = vector.load %arg11[%c0_47, %c0_48] : memref<256x128xf32, #tpu.memory_space<vmem>>, vector<256x128xf32>
    tpu.vector_store %arg11[%c0_47, %c0_48], %30 {strides = array<i32>} : memref<256x128xf32, #tpu.memory_space<vmem>>, vector<256x128xf32>,
    %c1_49 = arith.constant 1 : index
    %c0_50 = arith.constant 0 : index
    %c0_51 = arith.constant 0 : index
    %32 = vector.load %arg9[%c1_49, %c0_50, %c0_51] : memref<18x16x384xbf16, #tpu.memory_space<vmem>>, vector<16x16x384xbf16>
    %33 = vector.shape_cast %32 : vector<16x16x384xbf16> to vector<256x384xbf16>
    %c1_52 = arith.constant 1 : index
    %c0_53 = arith.constant 0 : index
    %c0_54 = arith.constant 0 : index
    %34 = vector.load %arg2[%c1_52, %c0_53, %c0_54] : memref<3x384x128xbf16, #tpu.memory_space<vmem>>, vector<1x384x128xbf16>
    %35 = vector.shape_cast %34 : vector<1x384x128xbf16> to vector<384x128xbf16>
    %cst_55 = arith.constant dense<0.000000e+00> : vector<256x128xf32>
    %36 = tpu.matmul %33, %35, %cst_55 {dimension_numbers = #tpu.dot_dimension_numbers<[1], [0], [0], [1], [0, 0, 1, 1], [], []>} : vector<256x384xbf16>, vector<384x128xbf16>, vector<256x128xf32> -> vector<256x128xf32>
    %c0_56 = arith.constant 0 : index
    %c0_57 = arith.constant 0 : index
    %37 = vector.load %arg11[%c0_56, %c0_57] : memref<256x128xf32, #tpu.memory_space<vmem>>, vector<256x128xf32>
    %38 = arith.addf %37, %36 : vector<256x128xf32>
    %c0_58 = arith.constant 0 : index
    %c0_59 = arith.constant 0 : index
    %39 = vector.load %arg11[%c0_58, %c0_59] : memref<256x128xf32, #tpu.memory_space<vmem>>, vector<256x128xf32>
    tpu.vector_store %arg11[%c0_58, %c0_59], %38 {strides = array<i32>} : memref<256x128xf32, #tpu.memory_space<vmem>>, vector<256x128xf32>,
    %c2 = arith.constant 2 : index
    %c0_60 = arith.constant 0 : index
    %c0_61 = arith.constant 0 : index
    %40 = vector.load %arg9[%c2, %c0_60, %c0_61] : memref<18x16x384xbf16, #tpu.memory_space<vmem>>, vector<16x16x384xbf16>
    %41 = vector.shape_cast %40 : vector<16x16x384xbf16> to vector<256x384xbf16>
    %c2_62 = arith.constant 2 : index
    %c0_63 = arith.constant 0 : index
    %c0_64 = arith.constant 0 : index
    %42 = vector.load %arg2[%c2_62, %c0_63, %c0_64] : memref<3x384x128xbf16, #tpu.memory_space<vmem>>, vector<1x384x128xbf16>
    %43 = vector.shape_cast %42 : vector<1x384x128xbf16> to vector<384x128xbf16>
    %cst_65 = arith.constant dense<0.000000e+00> : vector<256x128xf32>
    %44 = tpu.matmul %41, %43, %cst_65 {dimension_numbers = #tpu.dot_dimension_numbers<[1], [0], [0], [1], [0, 0, 1, 1], [], []>} : vector<256x384xbf16>, vector<384x128xbf16>, vector<256x128xf32> -> vector<256x128xf32>
    %c0_66 = arith.constant 0 : index
    %c0_67 = arith.constant 0 : index
    %45 = vector.load %arg11[%c0_66, %c0_67] : memref<256x128xf32, #tpu.memory_space<vmem>>, vector<256x128xf32>
    %46 = arith.addf %45, %44 : vector<256x128xf32>
    %c0_68 = arith.constant 0 : index
    %c0_69 = arith.constant 0 : index
    %47 = vector.load %arg11[%c0_68, %c0_69] : memref<256x128xf32, #tpu.memory_space<vmem>>, vector<256x128xf32>
    tpu.vector_store %arg11[%c0_68, %c0_69], %46 {strides = array<i32>} : memref<256x128xf32, #tpu.memory_space<vmem>>, vector<256x128xf32>,
    %c0_70 = arith.constant 0 : index
    %c0_71 = arith.constant 0 : index
    %48 = vector.load %arg11[%c0_70, %c0_71] : memref<256x128xf32, #tpu.memory_space<vmem>>, vector<256x128xf32>
    %cst_72 = arith.constant 0.000000e+00 : f32
    %49 = vector.broadcast %cst_72 : f32 to vector<256x128xf32>
    %50 = arith.maximumf %48, %49 : vector<256x128xf32>
    %51 = vector.shape_cast %50 : vector<256x128xf32> to vector<16x16x128xf32>
    %52 = arith.truncf %51 : vector<16x16x128xf32> to vector<16x16x128xbf16>
    %53 = vector.extract_strided_slice %52 {offsets = [0, 0, 0], sizes = [16, 15, 64], strides = [1, 1, 1]} : vector<16x16x128xbf16> to vector<16x15x64xbf16>
    %c1_73 = arith.constant 1 : index
    %c1_74 = arith.constant 1 : index
    %c0_75 = arith.constant 0 : index
    %54 = vector.load %arg10[%c1_73, %c1_74, %c0_75] : memref<18x16x192xbf16, #tpu.memory_space<vmem>>, vector<16x15x64xbf16>
    tpu.vector_store %arg10[%c1_73, %c1_74, %c0_75], %53 {strides = array<i32>} : memref<18x16x192xbf16, #tpu.memory_space<vmem>>, vector<16x15x64xbf16>,
    %55 = vector.extract_strided_slice %52 {offsets = [0, 0, 64], sizes = [16, 16, 64], strides = [1, 1, 1]} : vector<16x16x128xbf16> to vector<16x16x64xbf16>
    %c1_76 = arith.constant 1 : index
    %c0_77 = arith.constant 0 : index
    %c64 = arith.constant 64 : index
    %56 = vector.load %arg10[%c1_76, %c0_77, %c64] : memref<18x16x192xbf16, #tpu.memory_space<vmem>>, vector<16x16x64xbf16>
    tpu.vector_store %arg10[%c1_76, %c0_77, %c64], %55 {strides = array<i32>} : memref<18x16x192xbf16, #tpu.memory_space<vmem>>, vector<16x16x64xbf16>,
    %57 = vector.extract_strided_slice %52 {offsets = [0, 1, 0], sizes = [16, 15, 64], strides = [1, 1, 1]} : vector<16x16x128xbf16> to vector<16x15x64xbf16>
    %c1_78 = arith.constant 1 : index
    %c0_79 = arith.constant 0 : index
    %c128_80 = arith.constant 128 : index
    %58 = vector.load %arg10[%c1_78, %c0_79, %c128_80] : memref<18x16x192xbf16, #tpu.memory_space<vmem>>, vector<16x15x64xbf16>
    tpu.vector_store %arg10[%c1_78, %c0_79, %c128_80], %57 {strides = array<i32>} : memref<18x16x192xbf16, #tpu.memory_space<vmem>>, vector<16x15x64xbf16>,
    %c0_81 = arith.constant 0 : index
    %c0_82 = arith.constant 0 : index
    %c0_83 = arith.constant 0 : index
    %59 = vector.load %arg10[%c0_81, %c0_82, %c0_83] : memref<18x16x192xbf16, #tpu.memory_space<vmem>>, vector<16x16x192xbf16>
    %60 = vector.shape_cast %59 : vector<16x16x192xbf16> to vector<256x192xbf16>
    %c0_84 = arith.constant 0 : index
    %c0_85 = arith.constant 0 : index
    %c0_86 = arith.constant 0 : index
    %61 = vector.load %arg3[%c0_84, %c0_85, %c0_86] : memref<3x192x128xbf16, #tpu.memory_space<vmem>>, vector<1x192x128xbf16>
    %62 = vector.shape_cast %61 : vector<1x192x128xbf16> to vector<192x128xbf16>
    %cst_87 = arith.constant dense<0.000000e+00> : vector<256x128xf32>
    %63 = tpu.matmul %60, %62, %cst_87 {dimension_numbers = #tpu.dot_dimension_numbers<[1], [0], [0], [1], [0, 0, 1, 1], [], []>} : vector<256x192xbf16>, vector<192x128xbf16>, vector<256x128xf32> -> vector<256x128xf32>
    %c0_88 = arith.constant 0 : index
    %c0_89 = arith.constant 0 : index
    %64 = vector.load %arg6[%c0_88, %c0_89] : memref<1x128xf32, #tpu.memory_space<vmem>>, vector<1x128xf32>
    %65 = vector.broadcast %64 : vector<1x128xf32> to vector<256x128xf32>
    %66 = arith.addf %63, %65 : vector<256x128xf32>
    %c0_90 = arith.constant 0 : index
    %c0_91 = arith.constant 0 : index
    %67 = vector.load %arg11[%c0_90, %c0_91] : memref<256x128xf32, #tpu.memory_space<vmem>>, vector<256x128xf32>
    tpu.vector_store %arg11[%c0_90, %c0_91], %66 {strides = array<i32>} : memref<256x128xf32, #tpu.memory_space<vmem>>, vector<256x128xf32>,
    %c1_92 = arith.constant 1 : index
    %c0_93 = arith.constant 0 : index
    %c0_94 = arith.constant 0 : index
    %68 = vector.load %arg10[%c1_92, %c0_93, %c0_94] : memref<18x16x192xbf16, #tpu.memory_space<vmem>>, vector<16x16x192xbf16>
    %69 = vector.shape_cast %68 : vector<16x16x192xbf16> to vector<256x192xbf16>
    %c1_95 = arith.constant 1 : index
    %c0_96 = arith.constant 0 : index
    %c0_97 = arith.constant 0 : index
    %70 = vector.load %arg3[%c1_95, %c0_96, %c0_97] : memref<3x192x128xbf16, #tpu.memory_space<vmem>>, vector<1x192x128xbf16>
    %71 = vector.shape_cast %70 : vector<1x192x128xbf16> to vector<192x128xbf16>
    %cst_98 = arith.constant dense<0.000000e+00> : vector<256x128xf32>
    %72 = tpu.matmul %69, %71, %cst_98 {dimension_numbers = #tpu.dot_dimension_numbers<[1], [0], [0], [1], [0, 0, 1, 1], [], []>} : vector<256x192xbf16>, vector<192x128xbf16>, vector<256x128xf32> -> vector<256x128xf32>
    %c0_99 = arith.constant 0 : index
    %c0_100 = arith.constant 0 : index
    %73 = vector.load %arg11[%c0_99, %c0_100] : memref<256x128xf32, #tpu.memory_space<vmem>>, vector<256x128xf32>
    %74 = arith.addf %73, %72 : vector<256x128xf32>
    %c0_101 = arith.constant 0 : index
    %c0_102 = arith.constant 0 : index
    %75 = vector.load %arg11[%c0_101, %c0_102] : memref<256x128xf32, #tpu.memory_space<vmem>>, vector<256x128xf32>
    tpu.vector_store %arg11[%c0_101, %c0_102], %74 {strides = array<i32>} : memref<256x128xf32, #tpu.memory_space<vmem>>, vector<256x128xf32>,
    %c2_103 = arith.constant 2 : index
    %c0_104 = arith.constant 0 : index
    %c0_105 = arith.constant 0 : index
    %76 = vector.load %arg10[%c2_103, %c0_104, %c0_105] : memref<18x16x192xbf16, #tpu.memory_space<vmem>>, vector<16x16x192xbf16>
    %77 = vector.shape_cast %76 : vector<16x16x192xbf16> to vector<256x192xbf16>
    %c2_106 = arith.constant 2 : index
    %c0_107 = arith.constant 0 : index
    %c0_108 = arith.constant 0 : index
    %78 = vector.load %arg3[%c2_106, %c0_107, %c0_108] : memref<3x192x128xbf16, #tpu.memory_space<vmem>>, vector<1x192x128xbf16>
    %79 = vector.shape_cast %78 : vector<1x192x128xbf16> to vector<192x128xbf16>
    %cst_109 = arith.constant dense<0.000000e+00> : vector<256x128xf32>
    %80 = tpu.matmul %77, %79, %cst_109 {dimension_numbers = #tpu.dot_dimension_numbers<[1], [0], [0], [1], [0, 0, 1, 1], [], []>} : vector<256x192xbf16>, vector<192x128xbf16>, vector<256x128xf32> -> vector<256x128xf32>
    %c0_110 = arith.constant 0 : index
    %c0_111 = arith.constant 0 : index
    %81 = vector.load %arg11[%c0_110, %c0_111] : memref<256x128xf32, #tpu.memory_space<vmem>>, vector<256x128xf32>
    %82 = arith.addf %81, %80 : vector<256x128xf32>
    %c0_112 = arith.constant 0 : index
    %c0_113 = arith.constant 0 : index
    %83 = vector.load %arg11[%c0_112, %c0_113] : memref<256x128xf32, #tpu.memory_space<vmem>>, vector<256x128xf32>
    tpu.vector_store %arg11[%c0_112, %c0_113], %82 {strides = array<i32>} : memref<256x128xf32, #tpu.memory_space<vmem>>, vector<256x128xf32>,
    %c0_114 = arith.constant 0 : index
    %c0_115 = arith.constant 0 : index
    %84 = vector.load %arg11[%c0_114, %c0_115] : memref<256x128xf32, #tpu.memory_space<vmem>>, vector<256x128xf32>
    %cst_116 = arith.constant 0.000000e+00 : f32
    %85 = vector.broadcast %cst_116 : f32 to vector<256x128xf32>
    %86 = arith.maximumf %84, %85 : vector<256x128xf32>
    %87 = vector.shape_cast %86 : vector<256x128xf32> to vector<16x16x128xf32>
    %88 = arith.truncf %87 : vector<16x16x128xf32> to vector<16x16x128xbf16>
    %89 = vector.extract_strided_slice %88 {offsets = [0, 0, 0], sizes = [16, 15, 64], strides = [1, 1, 1]} : vector<16x16x128xbf16> to vector<16x15x64xbf16>
    %c1_117 = arith.constant 1 : index
    %c1_118 = arith.constant 1 : index
    %c0_119 = arith.constant 0 : index
    %90 = vector.load %arg10[%c1_117, %c1_118, %c0_119] : memref<18x16x192xbf16, #tpu.memory_space<vmem>>, vector<16x15x64xbf16>
    tpu.vector_store %arg10[%c1_117, %c1_118, %c0_119], %89 {strides = array<i32>} : memref<18x16x192xbf16, #tpu.memory_space<vmem>>, vector<16x15x64xbf16>,
    %91 = vector.extract_strided_slice %88 {offsets = [0, 0, 64], sizes = [16, 16, 64], strides = [1, 1, 1]} : vector<16x16x128xbf16> to vector<16x16x64xbf16>
    %c1_120 = arith.constant 1 : index
    %c0_121 = arith.constant 0 : index
    %c64_122 = arith.constant 64 : index
    %92 = vector.load %arg10[%c1_120, %c0_121, %c64_122] : memref<18x16x192xbf16, #tpu.memory_space<vmem>>, vector<16x16x64xbf16>
    tpu.vector_store %arg10[%c1_120, %c0_121, %c64_122], %91 {strides = array<i32>} : memref<18x16x192xbf16, #tpu.memory_space<vmem>>, vector<16x16x64xbf16>,
    %93 = vector.extract_strided_slice %88 {offsets = [0, 1, 0], sizes = [16, 15, 64], strides = [1, 1, 1]} : vector<16x16x128xbf16> to vector<16x15x64xbf16>
    %c1_123 = arith.constant 1 : index
    %c0_124 = arith.constant 0 : index
    %c128_125 = arith.constant 128 : index
    %94 = vector.load %arg10[%c1_123, %c0_124, %c128_125] : memref<18x16x192xbf16, #tpu.memory_space<vmem>>, vector<16x15x64xbf16>
    tpu.vector_store %arg10[%c1_123, %c0_124, %c128_125], %93 {strides = array<i32>} : memref<18x16x192xbf16, #tpu.memory_space<vmem>>, vector<16x15x64xbf16>,
    %c0_126 = arith.constant 0 : index
    %c0_127 = arith.constant 0 : index
    %c0_128 = arith.constant 0 : index
    %95 = vector.load %arg10[%c0_126, %c0_127, %c0_128] : memref<18x16x192xbf16, #tpu.memory_space<vmem>>, vector<16x16x192xbf16>
    %96 = vector.shape_cast %95 : vector<16x16x192xbf16> to vector<256x192xbf16>
    %c0_129 = arith.constant 0 : index
    %c0_130 = arith.constant 0 : index
    %c0_131 = arith.constant 0 : index
    %97 = vector.load %arg4[%c0_129, %c0_130, %c0_131] : memref<3x192x128xbf16, #tpu.memory_space<vmem>>, vector<1x192x128xbf16>
    %98 = vector.shape_cast %97 : vector<1x192x128xbf16> to vector<192x128xbf16>
    %cst_132 = arith.constant dense<0.000000e+00> : vector<256x128xf32>
    %99 = tpu.matmul %96, %98, %cst_132 {dimension_numbers = #tpu.dot_dimension_numbers<[1], [0], [0], [1], [0, 0, 1, 1], [], []>} : vector<256x192xbf16>, vector<192x128xbf16>, vector<256x128xf32> -> vector<256x128xf32>
    %c0_133 = arith.constant 0 : index
    %c0_134 = arith.constant 0 : index
    %100 = vector.load %arg7[%c0_133, %c0_134] : memref<1x128xf32, #tpu.memory_space<vmem>>, vector<1x128xf32>
    %101 = vector.broadcast %100 : vector<1x128xf32> to vector<256x128xf32>
    %102 = arith.addf %99, %101 : vector<256x128xf32>
    %c0_135 = arith.constant 0 : index
    %c0_136 = arith.constant 0 : index
    %103 = vector.load %arg11[%c0_135, %c0_136] : memref<256x128xf32, #tpu.memory_space<vmem>>, vector<256x128xf32>
    tpu.vector_store %arg11[%c0_135, %c0_136], %102 {strides = array<i32>} : memref<256x128xf32, #tpu.memory_space<vmem>>, vector<256x128xf32>,
    %c1_137 = arith.constant 1 : index
    %c0_138 = arith.constant 0 : index
    %c0_139 = arith.constant 0 : index
    %104 = vector.load %arg10[%c1_137, %c0_138, %c0_139] : memref<18x16x192xbf16, #tpu.memory_space<vmem>>, vector<16x16x192xbf16>
    %105 = vector.shape_cast %104 : vector<16x16x192xbf16> to vector<256x192xbf16>
    %c1_140 = arith.constant 1 : index
    %c0_141 = arith.constant 0 : index
    %c0_142 = arith.constant 0 : index
    %106 = vector.load %arg4[%c1_140, %c0_141, %c0_142] : memref<3x192x128xbf16, #tpu.memory_space<vmem>>, vector<1x192x128xbf16>
    %107 = vector.shape_cast %106 : vector<1x192x128xbf16> to vector<192x128xbf16>
    %cst_143 = arith.constant dense<0.000000e+00> : vector<256x128xf32>
    %108 = tpu.matmul %105, %107, %cst_143 {dimension_numbers = #tpu.dot_dimension_numbers<[1], [0], [0], [1], [0, 0, 1, 1], [], []>} : vector<256x192xbf16>, vector<192x128xbf16>, vector<256x128xf32> -> vector<256x128xf32>
    %c0_144 = arith.constant 0 : index
    %c0_145 = arith.constant 0 : index
    %109 = vector.load %arg11[%c0_144, %c0_145] : memref<256x128xf32, #tpu.memory_space<vmem>>, vector<256x128xf32>
    %110 = arith.addf %109, %108 : vector<256x128xf32>
    %c0_146 = arith.constant 0 : index
    %c0_147 = arith.constant 0 : index
    %111 = vector.load %arg11[%c0_146, %c0_147] : memref<256x128xf32, #tpu.memory_space<vmem>>, vector<256x128xf32>
    tpu.vector_store %arg11[%c0_146, %c0_147], %110 {strides = array<i32>} : memref<256x128xf32, #tpu.memory_space<vmem>>, vector<256x128xf32>,
    %c2_148 = arith.constant 2 : index
    %c0_149 = arith.constant 0 : index
    %c0_150 = arith.constant 0 : index
    %112 = vector.load %arg10[%c2_148, %c0_149, %c0_150] : memref<18x16x192xbf16, #tpu.memory_space<vmem>>, vector<16x16x192xbf16>
    %113 = vector.shape_cast %112 : vector<16x16x192xbf16> to vector<256x192xbf16>
    %c2_151 = arith.constant 2 : index
    %c0_152 = arith.constant 0 : index
    %c0_153 = arith.constant 0 : index
    %114 = vector.load %arg4[%c2_151, %c0_152, %c0_153] : memref<3x192x128xbf16, #tpu.memory_space<vmem>>, vector<1x192x128xbf16>
    %115 = vector.shape_cast %114 : vector<1x192x128xbf16> to vector<192x128xbf16>
    %cst_154 = arith.constant dense<0.000000e+00> : vector<256x128xf32>
    %116 = tpu.matmul %113, %115, %cst_154 {dimension_numbers = #tpu.dot_dimension_numbers<[1], [0], [0], [1], [0, 0, 1, 1], [], []>} : vector<256x192xbf16>, vector<192x128xbf16>, vector<256x128xf32> -> vector<256x128xf32>
    %c0_155 = arith.constant 0 : index
    %c0_156 = arith.constant 0 : index
    %117 = vector.load %arg11[%c0_155, %c0_156] : memref<256x128xf32, #tpu.memory_space<vmem>>, vector<256x128xf32>
    %118 = arith.addf %117, %116 : vector<256x128xf32>
    %c0_157 = arith.constant 0 : index
    %c0_158 = arith.constant 0 : index
    %119 = vector.load %arg11[%c0_157, %c0_158] : memref<256x128xf32, #tpu.memory_space<vmem>>, vector<256x128xf32>
    tpu.vector_store %arg11[%c0_157, %c0_158], %118 {strides = array<i32>} : memref<256x128xf32, #tpu.memory_space<vmem>>, vector<256x128xf32>,
    %c0_159 = arith.constant 0 : index
    %c0_160 = arith.constant 0 : index
    %120 = vector.load %arg11[%c0_159, %c0_160] : memref<256x128xf32, #tpu.memory_space<vmem>>, vector<256x128xf32>
    %121 = vector.extract_strided_slice %120 {offsets = [0, 0], sizes = [256, 64], strides = [1, 1]} : vector<256x128xf32> to vector<256x64xf32>
    %122 = vector.shape_cast %121 : vector<256x64xf32> to vector<1x16x16x64xf32>
    %c0_161 = arith.constant 0 : index
    %c0_162 = arith.constant 0 : index
    %c0_163 = arith.constant 0 : index
    %c0_164 = arith.constant 0 : index
    %123 = vector.load %arg8[%c0_161, %c0_162, %c0_163, %c0_164] : memref<1x16x16x64xf32, #tpu.memory_space<vmem>>, vector<1x16x16x64xf32>
    tpu.vector_store %arg8[%c0_161, %c0_162, %c0_163, %c0_164], %122 {strides = array<i32>} : memref<1x16x16x64xf32, #tpu.memory_space<vmem>>, vector<1x16x16x64xf32>,
    return
  }
  func.func @transform_0(%arg0: i32) -> (i32, i32, i32, i32) {
    %c0_i32 = arith.constant 0 : i32
    %c0_i32_0 = arith.constant 0 : i32
    %c0_i32_1 = arith.constant 0 : i32
    %c0_i32_2 = arith.constant 0 : i32
    return %arg0, %c0_i32, %c0_i32_0, %c0_i32_1 : i32, i32, i32, i32
  }
  func.func @transform_1(%arg0: i32) -> (i32, i32, i32) {
    %c0_i32 = arith.constant 0 : i32
    %c0_i32_0 = arith.constant 0 : i32
    %c0_i32_1 = arith.constant 0 : i32
    %c0_i32_2 = arith.constant 0 : i32
    return %c0_i32, %c0_i32_0, %c0_i32_1 : i32, i32, i32
  }
  func.func @transform_2(%arg0: i32) -> (i32, i32, i32) {
    %c0_i32 = arith.constant 0 : i32
    %c0_i32_0 = arith.constant 0 : i32
    %c0_i32_1 = arith.constant 0 : i32
    %c0_i32_2 = arith.constant 0 : i32
    return %c0_i32, %c0_i32_0, %c0_i32_1 : i32, i32, i32
  }
  func.func @transform_3(%arg0: i32) -> (i32, i32, i32) {
    %c0_i32 = arith.constant 0 : i32
    %c0_i32_0 = arith.constant 0 : i32
    %c0_i32_1 = arith.constant 0 : i32
    %c0_i32_2 = arith.constant 0 : i32
    return %c0_i32, %c0_i32_0, %c0_i32_1 : i32, i32, i32
  }
  func.func @transform_4(%arg0: i32) -> (i32, i32) {
    %c0_i32 = arith.constant 0 : i32
    %c0_i32_0 = arith.constant 0 : i32
    %c0_i32_1 = arith.constant 0 : i32
    return %c0_i32, %c0_i32_0 : i32, i32
  }
  func.func @transform_5(%arg0: i32) -> (i32, i32) {
    %c0_i32 = arith.constant 0 : i32
    %c0_i32_0 = arith.constant 0 : i32
    %c0_i32_1 = arith.constant 0 : i32
    return %c0_i32, %c0_i32_0 : i32, i32
  }
  func.func @transform_6(%arg0: i32) -> (i32, i32) {
    %c0_i32 = arith.constant 0 : i32
    %c0_i32_0 = arith.constant 0 : i32
    %c0_i32_1 = arith.constant 0 : i32
    return %c0_i32, %c0_i32_0 : i32, i32
  }
  func.func @transform_7(%arg0: i32) -> (i32, i32, i32, i32) {
    %c0_i32 = arith.constant 0 : i32
    %c0_i32_0 = arith.constant 0 : i32
    %c0_i32_1 = arith.constant 0 : i32
    %c0_i32_2 = arith.constant 0 : i32
    return %arg0, %c0_i32, %c0_i32_0, %c0_i32_1 : i32, i32, i32, i32
  }
}

</mosaic_0001>

<bundles_post_ra>
// kernel: tpu_custom_call.1
= control target key start
LH: loop header
LB: loop body
LE: loop exit
PB: predicated region body
PF: predicated region fallthrough
CT: control target
= control target key end

     0   :  { %12 = vsyncpa [#allocation6], 0  ;;  %s10915_s0 = inlined_call_operand.hbm [shape: bf16[2,16,16,128], index: 0, kind: input, shape index: {}]   ;;  %s10916_s1 = inlined_call_operand.hbm [shape: bf16[3,384,128], index: 1, kind: input, shape index: {}]   ;;  %s10917_s2 = inlined_call_operand.hbm [shape: bf16[3,192,128], index: 2, kind: input, shape index: {}]   ;;  %s10918_s3 = inlined_call_operand.hbm [shape: bf16[3,192,128], index: 3, kind: input, shape index: {}]   ;;  %s10919_s4 = inlined_call_operand.vmem [shape: f32[1,128], index: 4, kind: input, shape index: {}]   ;;  %s10920_s5 = inlined_call_operand.vmem [shape: f32[1,128], index: 5, kind: input, shape index: {}]   ;;  %s10921_s6 = inlined_call_operand.vmem [shape: f32[1,128], index: 6, kind: input, shape index: {}]   ;;  %s10922_s7 = inlined_call_operand.hbm [shape: f32[2,16,16,64], index: 7, kind: output, shape index: {}]  }
   0x1   :  { %14 = vsyncpa [#allocation6 + $0x1], 0 }
   0x2   :  { %15 = vsyncpa [#allocation9], 0 }
   0x3   :  { %16 = vsyncpa [#allocation12], 0 }
   0x4   :  { %17 = vsyncpa [#allocation7], 0 }
   0x5   :  { %19 = vsyncpa [#allocation7 + $0x1], 0  ;;  %s8485_s24 = smov 0   ;;  %s8487_s25 = smov 0  }
   0x6   :  { %s8489_s26 = smov 0   ;;  %s8491_s27 = smov 0  }
   0x7 LB: > { %s8506_s28 = sadd.s32 4294967295, %s8433_s27   ;;  %s6657_s29 = sadd.s32 4294967294, %s8433_s27   ;;  %s8433_s27 = sphi %s8491_s27, %s10982_s27   ;;  %s8429_s26 = sphi %s8489_s26, %s10981_s26   ;;  %s8425_s25 = sphi %s8487_s25, %s10980_s25   ;;  %s8421_s24 = sphi %s8485_s24, %s10979_s24  }
   0x8   : > { %p45_p0 = scmp.ne.s32.totalorder %s8425_s25, %s8421_s24  ;;  %p10923_p1 = scmp.eq.s32.totalorder %s8506_s28, 0 }
   0x9   : > { %p201_p3 = scmp.eq.s32.totalorder %s6657_s29, 1  ;;  %p6658_p5 = scmp.ge.s32.totalorder %s8433_s27, 1 }
   0xa   : > { %p8515_p4 = por %p10923_p1, %p45_p0  ;;  %p208_p7 = scmp.lt.s32.totalorder %s8433_s27, 3 }
   0xb   : > { %p8520_p6 = por %p201_p3, %p45_p0  ;;  %s8435_s10 = smov [#allocation8]  }
   0xc   : > { %s10929_s30 = scalar_select %p8515_p4, 1, 0 }
   0xd   : > { %s10930_s8 = scalar_select %p8520_p6, 1, 0 }
   0xe   : > { %p8525_p8 = pnand %p6658_p5, %p208_p7  ;;  %s220_s11 = sshll.u32 %s8435_s10, 4  ;;  %s8529_s11 = int_to_ptr.vmem [resolvable:$true] %s220_s11 }
   0xf   : > { %10931 = sst [smem:[#allocation18_spill]] %s10930_s8  ;;  %s8436_s13 = smov [#allocation10]  }
  0x10   : > { %s10932_s9 = scalar_select %p8525_p8, 1, 0 }
  0x11   : > { %p8002_p9 = pneg %p8525_p8  ;;  %s233_s14 = sshll.u32 %s8436_s13, 4  ;;  %s8540_s14 = int_to_ptr.vmem [resolvable:$true] %s233_s14 }
  0x12   : > { %s8437_s15 = smov [#allocation11]   ;;  %s8245_s19 = scalar_lea.hbm %s10916_s1, 9216 }
  0x13   : > { %p8536_p11 = pnand %p8002_p9, %p10923_p1  ;;  %s8542_s16 = sshll.u32 %s8437_s15, 4  ;;  %s247_s16 = int_to_ptr.vmem [resolvable:$true] %s8542_s16 }
  0x14   : > { %p8246_p12 = scmp.ne.s32.totalorder %s10916_s1, %s8245_s19  ;;  %p8252_p5 = scmp.lt.u32.totalorder %s8245_s19, %s10916_s1 }
  0x15   : > { %p8552_p13 = pneg %p8536_p11 }
  0x17   : > { %p8248_p0 = pnand %p8552_p13, %p8246_p12 }
  0x19   : > { %p8249_p3 = pneg %p8248_p0 }
  0x1b   : > { %p8254_p7 = pnand %p8252_p5, %p8249_p3 }
  0x1d   : > { %8257 = shalt.err (!%p8254_p7)
}
  0x1e   : > { %s8258_s10 = scalar_lea.vmem %s8529_s11, 9216  ;;  %p8266_p2 = scmp.lt.s32.totalorder %s8529_s11, %s8529_s11 }
  0x1f   : > { %p8259_p9 = scmp.ne.s32.totalorder %s8529_s11, %s8258_s10  ;;  %p8267_p6 = scmp.lt.s32.totalorder %s8258_s10, %s8258_s10 }
  0x21   : > { %p8261_p10 = pnand %p8259_p9, %p8552_p13  ;;  %p8268_p12 = por %p8267_p6, %p8266_p2 }
  0x23   : > { %p8262_p1 = pneg %p8261_p10 }
  0x25   : > { %p8269_p0 = pnand %p8268_p12, %p8262_p1 }
  0x27   : > { %8272 = shalt.err (!%p8269_p0)
}
  0x28   : > { %s8438_s13 = smov 64   ;;  %s8439_s15 = smov 4  }
  0x29   : > { %8005 = dma.hbm_to_vmem [thread:$0]  (!%p8536_p11), %s10916_s1, 9216, %s8529_s11, [#allocation9], %s8438_s13, %s8438_s13, %s8439_s15  }
  0x2a   : > { %s8273_s21 = scalar_lea.hbm %s10917_s2, 4608 }
  0x2b   : > { %p8274_p1 = scmp.ne.s32.totalorder %s10917_s2, %s8273_s21  ;;  %p8280_p10 = scmp.lt.u32.totalorder %s8273_s21, %s10917_s2 }
  0x2d   : > { %p8276_p2 = pnand %p8274_p1, %p8552_p13 }
  0x2f   : > { %p8277_p6 = pneg %p8276_p2 }
  0x31   : > { %p8282_p3 = pnand %p8280_p10, %p8277_p6 }
  0x33   : > { %8285 = shalt.err (!%p8282_p3)
}
  0x34   : > { %s8286_s11 = scalar_lea.vmem %s8540_s14, 4608  ;;  %p8294_p12 = scmp.lt.s32.totalorder %s8540_s14, %s8540_s14 }
  0x35   : > { %p8287_p5 = scmp.ne.s32.totalorder %s8540_s14, %s8286_s11  ;;  %p8295_p0 = scmp.lt.s32.totalorder %s8286_s11, %s8286_s11 }
  0x37   : > { %p8289_p7 = pnand %p8287_p5, %p8552_p13  ;;  %p8296_p1 = por %p8295_p0, %p8294_p12 }
  0x39   : > { %p8290_p9 = pneg %p8289_p7 }
  0x3b   : > { %p8297_p2 = pnand %p8296_p1, %p8290_p9 }
  0x3d   : > { %8300 = shalt.err (!%p8297_p2)
}
  0x3e   : > { %8008 = dma.hbm_to_vmem [thread:$0]  (!%p8536_p11), %s10917_s2, 4608, %s8540_s14, [#allocation9], %s8438_s13, %s8438_s13, %s8439_s15  }
  0x3f   : > { %s8301_s20 = scalar_lea.hbm %s10918_s3, 4608 }
  0x40   : > { %p8302_p6 = scmp.ne.s32.totalorder %s10918_s3, %s8301_s20  ;;  %p8308_p5 = scmp.lt.u32.totalorder %s8301_s20, %s10918_s3 }
  0x42   : > { %p8304_p10 = pnand %p8302_p6, %p8552_p13 }
  0x44   : > { %p8305_p3 = pneg %p8304_p10 }
  0x46   : > { %p8310_p7 = pnand %p8308_p5, %p8305_p3 }
  0x48   : > { %8313 = shalt.err (!%p8310_p7)
}
  0x49   : > { %s8314_s11 = scalar_lea.vmem %s247_s16, 4608  ;;  %p8322_p1 = scmp.lt.s32.totalorder %s247_s16, %s247_s16 }
  0x4a   : > { %p8315_p9 = scmp.ne.s32.totalorder %s247_s16, %s8314_s11  ;;  %p8323_p2 = scmp.lt.s32.totalorder %s8314_s11, %s8314_s11 }
  0x4c   : > { %p8317_p12 = pnand %p8315_p9, %p8552_p13  ;;  %p8324_p4 = por %p8323_p2, %p8322_p1 }
  0x4e   : > { %p8318_p0 = pneg %p8317_p12 }
  0x50   : > { %p8325_p8 = pnand %p8324_p4, %p8318_p0 }
  0x52   : > { %8328 = shalt.err (!%p8325_p8)
}
  0x53   : > { %8011 = dma.hbm_to_vmem [thread:$0]  (!%p8536_p11), %s10918_s3, 4608, %s247_s16, [#allocation12], %s8438_s13, %s8438_s13, %s8439_s15  }
  0x54   : > { %s8625_s22 = sadd.s32 1, %s8433_s27   ;;  %s32_s17 = sadd.s32 1, %s8429_s26 }
  0x55   : > { %s29_s12 = ssub.s32 %s8433_s27, %s8625_s22  ;;  %p39_p8 = scmp.ne.s32.totalorder %s8429_s26, %s8425_s25 }
  0x56   : > { %p30_p4 = scmp.eq.s32.totalorder %s29_s12, 0  ;;  %p40_p13 = scmp.eq.s32.totalorder %s8433_s27, 0 }
  0x57   : > { %p8023_p6 = scmp.lt.s32.totalorder %s8433_s27, 2  ;;  %p10935_p3 = scmp.eq.s32.totalorder %s8506_s28, 1 }
  0x58   : > { %s8635_s18 = scalar_select %p30_p4, %s8429_s26, %s32_s17  }
  0x59   : > { %p41_p10 = por %p40_p13, %p39_p8  ;;  %p8639_p5 = por %p10935_p3, %p39_p8 }
  0x5a   : > { %s269_s20 = sand.u32 1, %s8429_s26   ;;  %s6936_s21 = sshll.u32 %s8433_s27, 11 }
  0x5b   : > { %s6663_s16 = sshll.u32 %s269_s20, 7  ;;  %s8648_s10 = scalar_lea.hbm %s10915_s0, %s6936_s21 }
  0x5c   : > { %s273_s11 = scalar_lea.vmem [#allocation5], %s6663_s16  ;;  %p8650_p11 = pnand %p8023_p6, %p41_p10 }
  0x5d   : > { %s280_s14 = sshll.u32 %s273_s11, 4  ;;  %s8656_s12 = scalar_lea.sflag [#allocation6], %s269_s20  ;;  %s8654_s14 = int_to_ptr.vmem [resolvable:$true] %s280_s14 }
  0x5e   : > { %s8329_s17 = scalar_lea.hbm %s8648_s10, 2048  ;;  %p8331_p9 = pneg %p8650_p11 }
  0x5f   : > { %p8330_p7 = scmp.ne.s32.totalorder %s8648_s10, %s8329_s17  ;;  %s8334_s23 = scalar_lea.hbm %s10915_s0, 4096 }
  0x60   : > { %p8335_p1 = scmp.lt.u32.totalorder %s8648_s10, %s10915_s0  ;;  %p8336_p2 = scmp.lt.u32.totalorder %s8334_s23, %s8329_s17 }
  0x61   : > { %p8332_p12 = pnand %p8331_p9, %p8330_p7  ;;  %p8338_p8 = scmp.lt.u32.totalorder %s8329_s17, %s8648_s10 }
  0x62   : > { %p8337_p4 = por %p8336_p2, %p8335_p1 }
  0x63   : > { %p8333_p0 = pneg %p8332_p12 }
  0x64   : > { %p8339_p13 = por %p8338_p8, %p8337_p4 }
  0x66   : > { %p8340_p6 = pnand %p8339_p13, %p8333_p0 }
  0x68   : > { %8343 = shalt.err (!%p8340_p6)
}
  0x69   : > { %s8344_s20 = scalar_lea.vmem %s8654_s14, 2048  ;;  %s8440_s21 = smov [#allocation5]  }
  0x6a   : > { %p8345_p10 = scmp.ne.s32.totalorder %s8654_s14, %s8344_s20  ;;  %s8349_s16 = sshll.u32 %s8440_s21, 4  ;;  %s8350_s16 = int_to_ptr.vmem [resolvable:$false] %s8349_s16 }
  0x6b   : > { %s8351_s29 = scalar_lea.vmem %s8350_s16, 4096  ;;  %p8352_p12 = scmp.lt.s32.totalorder %s8654_s14, %s8350_s16 }
  0x6c   : > { %p8347_p3 = pnand %p8345_p10, %p8331_p9  ;;  %p8353_p1 = scmp.lt.s32.totalorder %s8351_s29, %s8344_s20 }
  0x6e   : > { %p8348_p7 = pneg %p8347_p3  ;;  %p8354_p2 = por %p8353_p1, %p8352_p12 }
  0x70   : > { %p8355_p4 = pnand %p8354_p2, %p8348_p7 }
  0x72   : > { %8358 = shalt.err (!%p8355_p4)
}
  0x73   : > { %8015 = dma.hbm_to_vmem [thread:$0]  (!%p8650_p11), %s8648_s10, 2048, %s8654_s14, %s8656_s12, %s8438_s13, %s8438_s13, %s8439_s15  }
  0x74   : > { %p10938_p9 = scmp.ne.s32.totalorder %s10932_s9, 0 }
  0x76   : > { %292 = sbr.rel (%p10938_p9) target bundleno = 1719 (0x6b7), region = 48 }
  0x7d   : > { %s8690_s17 = sand.u32 1, %s8425_s25   ;;  %p10939_p0 = scmp.ne.s32.totalorder %s10929_s30, 0 }
  0x7e   : > { %s6667_s23 = sshll.u32 %s8690_s17, 7  ;;  %s295_s11 = scalar_lea.sflag [#allocation6], %s8690_s17 }
  0x7f   : > { %s8694_s20 = scalar_lea.vmem [#allocation5], %s6667_s23 }
  0x80   : > { %8404 = dma.done.wait (%p10939_p0), %s295_s11, 2048  }
  0x81   : > { %8406 = vsyncadd (%p10939_p0), %s295_s11, 4294965248  ;;  %p10940_p11 = scmp.eq.s32.totalorder %s8506_s28, 0 }
  0x83   : > { %8408 = dma.done.wait (%p10940_p11), [#allocation9], 13824   ;;  %p10941_p8 = pmov %p10940_p11 }
  0x85   : > { %8410 = vsyncadd (%p10941_p8), [#allocation9], 4294953472  ;;  %p10942_p13 = pmov %p10941_p8 }
  0x86   : > { %p10943_p6 = pmov %p10941_p8 }
  0x87   : > { %8412 = dma.done.wait (%p10942_p13), [#allocation12], 4608  }
  0x88   : > { %8414 = vsyncadd (%p10943_p6), [#allocation12], 4294962688  ;;  %v8441_v0 = vmov 0   ;;  %vm680_vm0 = vcmask 523264   ;;  %v8068_v1 = vld [vmem:[#allocation8 + $0x40] sm:$0xff]   ;;  %v8071_v4 = vld [vmem:[#allocation8 + $0x48] sm:$0xff]  }
  0x89   : > { %343 = vst [vmem:[#allocation2 + $0x8] sm:$0xff] %v8441_v0  ;;  %342 = vst [vmem:[#allocation2] sm:$0xff] %v8441_v0  ;;  %v8710_v2 = vld [vmem:[#allocation8 + $0x80] sm:$0xff]   ;;  %6938 = vmatprep.subr.bf16.mxu0 %v8068_v1  ;;  %vm350_vm1 = vsmask.f32 256  ;;  %v8714_v5 = vld [vmem:[#allocation8 + $0x88] sm:$0xff]  }
  0x8a   : > { %344 = vst [vmem:[#allocation2 + $0x10] sm:$0xff] %v8441_v0  ;;  %346 = vst [vmem:[#allocation2 + $0x198] sm:$0xff] %v8441_v0  ;;  %v8070_v3 = vld [vmem:[#allocation8] sm:$0xff]   ;;  %7490 = vmatprep.subr.bf16.mxu1 %v8710_v2  ;;  %v8073_v6 = vld [vmem:[#allocation8 + $0x8] sm:$0xff]   ;;  %vm349_vm2 = vcmask 1040384   ;;  %vm514_vm5 = vcmask 1047559  }
  0x8b   : > { %347 = vst [vmem:[#allocation2 + $0x1a0] sm:$0xff] %v8441_v0  ;;  %348 = vst [vmem:[#allocation2 + $0x1a8] sm:$0xff] %v8441_v0  ;;  %6939 = vmatpush3.bf16.msra.mxu0 %v8070_v3  ;;  %7498 = vmatpush3.bf16.msra.mxu1 %v8710_v2  ;;  %v8074_v7 = vld [vmem:[#allocation8 + $0x50] sm:$0xff]   ;;  %v8077_v10 = vld [vmem:[#allocation8 + $0x58] sm:$0xff]   ;;  %vm515_vm4 = vsmask.f32 7966 }
  0x8c   : > { %679 = vst [vmem:[#allocation3] sm:$0xff] %v8441_v0  ;;  %683 = vst [vmem:[#allocation3 + $0x110] sm:$0xff] %v8441_v0  ;;  %6940 = vmatprep.subr.bf16.mxu0 %v8071_v4  ;;  %7491 = vmatprep.subr.bf16.mxu1 %v8714_v5  ;;  %v8717_v8 = vld [vmem:[#allocation8 + $0x90] sm:$0xff]   ;;  %v8721_v11 = vld [vmem:[#allocation8 + $0x98] sm:$0xff]   ;;  %vm1277_vm7 = vsmask.f32 7424 }
  0x8d   : > { %681 = vst.msk [vmem:[#allocation3 + $0x8] sm:$0xff] %vm680_vm0, %v8441_v0  ;;  %684 = vst.msk [vmem:[#allocation3 + $0x118] sm:$0xff] %vm680_vm0, %v8441_v0  ;;  %v8076_v9 = vld [vmem:[#allocation8 + $0x10] sm:$0xff]   ;;  %v8079_v12 = vld [vmem:[#allocation8 + $0x18] sm:$0xff]   ;;  %vm1146_vm8 = vcmask 1047552   ;;  %vm688_vm12 = vcmask 516096  }
  0x8e   : > { %v8080_v13 = vld [vmem:[#allocation8 + $0x60] sm:$0xff]   ;;  %vm8728_vm3 = vmand %vm349_vm2, %vm350_vm1  ;;  %v8083_v17 = vld [vmem:[#allocation8 + $0x68] sm:$0xff]   ;;  %vm1147_vm10 = vsmask.f32 7938  ;;  %vm798_vm13 = vcmask 523271   ;;  %s6671_s10 = sshll.u32 %s8690_s17, 8 }
  0x8f   : > { %6941 = vmatpush3.bf16.msra.mxu0 %v8073_v6  ;;  %7499 = vmatpush3.bf16.msra.mxu1 %v8714_v5  ;;  %v8725_v14 = vld [vmem:[#allocation8 + $0xa0] sm:$0xff]   ;;  %v8734_v18 = vld [vmem:[#allocation8 + $0xa8] sm:$0xff]   ;;  %vm8737_vm6 = vmand %vm514_vm5, %vm515_vm4  ;;  %s10767_s12 = scalar_lea.vmem [#allocation13], %s6671_s10  ;;  %s6937_s21 = sshll.u32 %s8506_s28, 12 }
  0x90   : > { %6942 = vmatprep.subr.bf16.mxu0 %v8074_v7  ;;  %7492 = vmatprep.subr.bf16.mxu1 %v8717_v8  ;;  %v8082_v16 = vld [vmem:[#allocation8 + $0x20] sm:$0xff]   ;;  %v8085_v20 = vld [vmem:[#allocation8 + $0x28] sm:$0xff]   ;;  %v8086_v21 = vld [vmem:[#allocation8 + $0x70] sm:$0xff]   ;;  %s6555_s16 = sshll.u32 %s10767_s12, 4  ;;  %s10864_s11 = scalar_lea.hbm %s10922_s7, %s6937_s21  ;;  %s10866_s16 = int_to_ptr.vmem [resolvable:$true] %s6555_s16 }
  0x91   : > { %v8743_v22 = vld [vmem:[#allocation8 + $0xb0] sm:$0xff]   ;;  %v8089_v24 = vld [vmem:[#allocation8 + $0x78] sm:$0xff]   ;;  %v430_v28 = vld [vmem:[#allocation2 + $0xd0] sm:$0x1]  ;;  %s6542_s28 = scalar_lea.sflag [#allocation7], %s8690_s17  ;;  %s8442_s30 = smov [#allocation13]  }
  0x92   : > { %v8088_v23 = vld [vmem:[#allocation8 + $0x30] sm:$0xff]   ;;  %v8745_v25 = vld [vmem:[#allocation8 + $0xb8] sm:$0xff]   ;;  %v431_v31 = vsel %vm8728_vm3, 0, %v430_v28  ;;  %v595_v32 = vld [vmem:[#allocation2 + $0xd0] sm:$0x80]  ;;  %s8363_s9 = sshll.u32 %s8442_s30, 4  ;;  %s8364_s9 = int_to_ptr.vmem [resolvable:$false] %s8363_s9 }
  0x93   : > { %6943 = vmatpush3.bf16.msra.mxu0 %v8076_v9  ;;  %7500 = vmatpush3.bf16.msra.mxu1 %v8717_v8  ;;  %v355_v26 = vld [vmem:[#allocation2 + $0x8] sm:$0x1]  ;;  %v520_v27 = vld [vmem:[#allocation2 + $0x8] sm:$0x80]  ;;  %432 = vst [vmem:[#allocation2 + $0xd0] sm:$0x1] %v431_v31  ;;  %vm8784_vm9 = vmand %vm1146_vm8, %vm1277_vm7  ;;  %p8366_p12 = scmp.lt.s32.totalorder %s10866_s16, %s8364_s9 }
  0x94   : > { %6944 = vmatprep.subr.bf16.mxu0 %v8077_v10  ;;  %7493 = vmatprep.subr.bf16.mxu1 %v8721_v11  ;;  %v356_v29 = vsel %vm8728_vm3, 0, %v355_v26  ;;  %v521_v30 = vsel %vm8737_vm6, 0, %v520_v27  ;;  %v8756_v33 = vld [vmem:[%s8694_s20 + $0x38] sm:$0xff]   ;;  %v596_v35 = vsel %vm8737_vm6, 0, %v595_v32  ;;  %v8761_v36 = vld [vmem:[%s8694_s20 + $0x40] sm:$0xff]   ;;  %v8096_v59 = vld [vmem:[#allocation8 + $0x108] sm:$0xff]  }
  0x95   : > { %v8091_v34 = vld [vmem:[#allocation8 + $0x38] sm:$0xff]   ;;  %357 = vst [vmem:[#allocation2 + $0x8] sm:$0x1] %v356_v29  ;;  %522 = vst [vmem:[#allocation2 + $0x8] sm:$0x80] %v521_v30  ;;  %v1067_v37 = vshrl.u32 %v8756_v33, 16 }
  0x96   : > { %597 = vst [vmem:[#allocation2 + $0xd0] sm:$0x80] %v596_v35  ;;  %v1070_v38 = vshll.u32 %v8756_v33, 16  ;;  %v352_v39 = vld [vmem:[#allocation2] sm:$0x1]  ;;  %v1074_v48 = vshrl.u32 %v8761_v36, 16  ;;  %vm8835_vm11 = vmand %vm1146_vm8, %vm1147_vm10 }
  0x97   : > { %6945 = vmatpush3.bf16.msra.mxu0 %v8079_v12  ;;  %7501 = vmatpush3.bf16.msra.mxu1 %v8721_v11  ;;  %v517_v40 = vld [vmem:[#allocation2] sm:$0x80]  ;;  %v353_v41 = vsel %vm8728_vm3, 0, %v352_v39  ;;  %v439_v43 = vld [vmem:[#allocation2 + $0xe8] sm:$0x1]  ;;  %v1077_v49 = vshll.u32 %v8761_v36, 16  ;;  %vm9592_vm14 = vmand %vm688_vm12, %vm350_vm1 }
  0x98   : > { %6946 = vmatprep.subr.bf16.mxu0 %v8080_v13  ;;  %7494 = vmatprep.subr.bf16.mxu1 %v8725_v14  ;;  %v518_v42 = vsel %vm8737_vm6, 0, %v517_v40  ;;  %v604_v44 = vld [vmem:[#allocation2 + $0xe8] sm:$0x80]  ;;  %v1243_v45 = vrot.slane %v1070_v38, 1  ;;  %354 = vst [vmem:[#allocation2] sm:$0x1] %v353_v41  ;;  %vm9599_vm15 = vmand %vm798_vm13, %vm515_vm4 }
  0x99   : > { %519 = vst [vmem:[#allocation2] sm:$0x80] %v518_v42  ;;  %v440_v46 = vsel %vm8728_vm3, 0, %v439_v43  ;;  %v605_v47 = vsel %vm8737_vm6, 0, %v604_v44  ;;  %v8094_v50 = vld [vmem:[#allocation8 + $0x100] sm:$0xff]   ;;  %v1245_v53 = vrot.slane %v1077_v49, 1  ;;  %vm9959_vm2 = vmand %vm680_vm0, %vm1277_vm7 }
  0x9a   : > { %441 = vst [vmem:[#allocation2 + $0xe8] sm:$0x1] %v440_v46  ;;  %606 = vst [vmem:[#allocation2 + $0xe8] sm:$0x80] %v605_v47  ;;  %v1244_v51 = vor.u32 %v1243_v45, %v1067_v37  ;;  %v8095_v57 = vld [vmem:[#allocation8 + $0xc0] sm:$0xff]   ;;  %v8097_v9 = vld [vmem:[#allocation8 + $0xc8] sm:$0xff]  }
  0x9b   : > { %6947 = vmatpush3.bf16.msra.mxu0 %v8082_v16  ;;  %7502 = vmatpush3.bf16.msra.mxu1 %v8725_v14  ;;  %v1246_v56 = vor.u32 %v1245_v53, %v1074_v48  ;;  %v364_v60 = vld [vmem:[#allocation2 + $0x20] sm:$0x1]  ;;  %v529_v61 = vld [vmem:[#allocation2 + $0x20] sm:$0x80]  ;;  %v8800_v1 = vld [vmem:[%s8694_s20] sm:$0xff]   ;;  %vm3506_vm1 = vcmask 1048064  }
  0x9c   : > { %6948 = vmatprep.subr.bf16.mxu0 %v8083_v17  ;;  %7495 = vmatprep.subr.bf16.mxu1 %v8734_v18  ;;  %v1328_v54 = vld [vmem:[#allocation2 + $0x8] sm:$0xff]  ;;  %v365_v63 = vsel %vm8728_vm3, 0, %v364_v60  ;;  %v530_v0 = vsel %vm8737_vm6, 0, %v529_v61  ;;  %v448_v4 = vld [vmem:[#allocation2 + $0x100] sm:$0x1]  ;;  %v8812_v13 = vld [vmem:[%s8694_s20 + $0x48] sm:$0xff]  }
  0x9d   : > { %1606 = vmatprep.mubr.bf16.mxu0 %v1328_v54  ;;  %v1300_v55 = vld [vmem:[#allocation2 + $0xd0] sm:$0xff]  ;;  %366 = vst [vmem:[#allocation2 + $0x20] sm:$0x1] %v365_v63  ;;  %531 = vst [vmem:[#allocation2 + $0x20] sm:$0x80] %v530_v0  ;;  %v449_v10 = vsel %vm8728_vm3, 0, %v448_v4 }
  0x9e   : > { %v1301_v58 = vsel %vm8784_vm9, %v1244_v51, %v1300_v55  ;;  %v613_v6 = vld [vmem:[#allocation2 + $0x100] sm:$0x80]  ;;  %1213 = vst [vmem:[#allocation2 + $0x20] sm:$0xff] %v8800_v1  ;;  %450 = vst [vmem:[#allocation2 + $0x100] sm:$0x1] %v449_v10  ;;  %v1081_v27 = vshrl.u32 %v8812_v13, 16 }
  0x9f   : > { %6949 = vmatpush3.bf16.msra.mxu0 %v8085_v20  ;;  %7503 = vmatpush3.bf16.msra.mxu1 %v8734_v18  ;;  %1302 = vst [vmem:[#allocation2 + $0xd0] sm:$0xff] %v1301_v58  ;;  %v614_v12 = vsel %vm8737_vm6, 0, %v613_v6  ;;  %v361_v16 = vld [vmem:[#allocation2 + $0x18] sm:$0x1]  ;;  %v526_v17 = vld [vmem:[#allocation2 + $0x18] sm:$0x80]  ;;  %vm9966_vm4 = vmand %vm680_vm0, %vm1147_vm10 }
  0xa0   : > { %6950 = vmatprep.subr.bf16.mxu0 %v8086_v21  ;;  %7496 = vmatprep.subr.bf16.mxu1 %v8743_v22  ;;  %v1327_v62 = vld [vmem:[#allocation2] sm:$0xff]  ;;  %615 = vst [vmem:[#allocation2 + $0x100] sm:$0x80] %v614_v12  ;;  %v1018_v20 = vshrl.u32 %v8800_v1, 16  ;;  %v362_v21 = vsel %vm8728_vm3, 0, %v361_v16  ;;  %v1084_v28 = vshll.u32 %v8812_v13, 16 }
  0xa1   : > { %7378 = vmatprep.mubr.bf16.mxu1 %v1301_v58  ;;  %v1303_v3 = vld [vmem:[#allocation2 + $0xe8] sm:$0xff]  ;;  %v8822_v26 = vld [vmem:[%s8694_s20 + $0x50] sm:$0xff]   ;;  %363 = vst [vmem:[#allocation2 + $0x18] sm:$0x1] %v362_v21  ;;  %v622_v31 = vld [vmem:[#allocation2 + $0x118] sm:$0x80] }
  0xa2   : > { %v1304_v7 = vsel %vm8784_vm9, %v1246_v56, %v1303_v3  ;;  %v1020_v29 = vrot.slane %v1018_v20, 7  ;;  %v1247_v35 = vrot.slane %v1084_v28, 1  ;;  %v1088_v40 = vshrl.u32 %v8822_v26, 16  ;;  %v8101_v42 = vld [vmem:[#allocation8 + $0x110] sm:$0xff]   ;;  %v8103_v47 = vld [vmem:[#allocation8 + $0x118] sm:$0xff]   ;;  %v8863_v60 = vld [vmem:[%s8694_s20 + $0x8] sm:$0xff]  }
  0xa3   : > { %6951 = vmatpush3.bf16.msra.mxu0 %v8088_v23  ;;  %7504 = vmatpush3.bf16.msra.mxu1 %v8743_v22  ;;  %1305 = vst [vmem:[#allocation2 + $0xe8] sm:$0xff] %v1304_v7  ;;  %v527_v23 = vsel %vm8737_vm6, 0, %v526_v17  ;;  %v1091_v41 = vshll.u32 %v8822_v26, 16  ;;  %v8102_v45 = vld [vmem:[#allocation8 + $0xd0] sm:$0xff]   ;;  %v8104_v54 = vld [vmem:[#allocation8 + $0xd8] sm:$0xff]   ;;  %v1025_v12 = vshrl.u32 %v8863_v60, 16 }
  0xa4   : > { %6952 = vmatprep.subr.bf16.mxu0 %v8089_v24  ;;  %7497 = vmatprep.subr.bf16.mxu1 %v8745_v25  ;;  %v457_v24 = vld [vmem:[#allocation2 + $0x118] sm:$0x1]  ;;  %528 = vst [vmem:[#allocation2 + $0x18] sm:$0x80] %v527_v23  ;;  %v466_v61 = vld [vmem:[#allocation2 + $0x130] sm:$0x1] }
  0xa5   : > { %v458_v30 = vsel %vm8728_vm3, 0, %v457_v24  ;;  %v1249_v44 = vrot.slane %v1091_v41, 1  ;;  %v373_v55 = vld [vmem:[#allocation2 + $0x38] sm:$0x1]  ;;  %v467_v63 = vsel %vm8728_vm3, 0, %v466_v61  ;;  %v8876_v6 = vld [vmem:[%s8694_s20 + $0x58] sm:$0xff]  }
  0xa6   : > { %459 = vst [vmem:[#allocation2 + $0x118] sm:$0x1] %v458_v30  ;;  %v631_v0 = vld [vmem:[#allocation2 + $0x130] sm:$0x80]  ;;  %468 = vst [vmem:[#allocation2 + $0x130] sm:$0x1] %v467_v63 }
  0xa7   : > { %6953 = vmatpush3.bf16.msra.mxu0 %v8091_v34  ;;  %7505 = vmatpush3.bf16.msra.mxu1 %v8745_v25  ;;  %v623_v34 = vsel %vm8737_vm6, 0, %v622_v31  ;;  %v1306_v46 = vld [vmem:[#allocation2 + $0x100] sm:$0xff]  ;;  %v1250_v53 = vor.u32 %v1249_v44, %v1088_v40  ;;  %v632_v4 = vsel %vm8737_vm6, 0, %v631_v0  ;;  %v535_v10 = vld [vmem:[#allocation2 + $0x30] sm:$0x80]  ;;  %v1028_v16 = vshll.u32 %v8863_v60, 16 }
  0xa8   : > { %7074 = vmatprep.subr.bf16.mxu1 %v8094_v50  ;;  %7346 = vmatprep.subr.bf16.mxu0 %v8710_v2  ;;  %624 = vst [vmem:[#allocation2 + $0x118] sm:$0x80] %v623_v34  ;;  %633 = vst [vmem:[#allocation2 + $0x130] sm:$0x80] %v632_v4  ;;  %v8884_v17 = vld [vmem:[%s8694_s20 + $0x60] sm:$0xff]   ;;  %v536_v21 = vsel %vm8737_vm6, 0, %v535_v10 }
  0xa9   : > { %v475_v23 = vld [vmem:[#allocation2 + $0x148] sm:$0x1]  ;;  %537 = vst [vmem:[#allocation2 + $0x30] sm:$0x80] %v536_v21  ;;  %v1027_v24 = vrot.slane %v1025_v12, 7  ;;  %v1102_v34 = vshrl.u32 %v8884_v17, 16 }
  0xaa   : > { %1607 = vmatmul.mubr.bf16.vlgmr.msra.gmra.mrb[0].mxu0 %v1327_v62  ;;  %7379 = vmatmul.mubr.bf16.vlgmr.msra.gmra.mrb[0].mxu1 %v1304_v7  ;;  %v370_v7 = vld [vmem:[#allocation2 + $0x30] sm:$0x1]  ;;  %v640_v30 = vld [vmem:[#allocation2 + $0x148] sm:$0x80]  ;;  %v649_v61 = vld [vmem:[#allocation2 + $0x160] sm:$0x80] }
  0xab   : > { %1614 = vmatprep.mubr.bf16.mxu0 %v8800_v1  ;;  %7347 = vmatpush3.bf16.msra.mxu0 %v8710_v2  ;;  %v1021_v2 = vshll.u32 %v8800_v1, 16  ;;  %v1149_v56 = vld [vmem:[#allocation2 + $0x18] sm:$0xff]  ;;  %v1030_v44 = vor.u32 %v1028_v16, %v1027_v24  ;;  %v650_v0 = vsel %vm8737_vm6, 0, %v649_v61  ;;  %v556_v61 = vld [vmem:[#allocation2 + $0x68] sm:$0x80]  ;;  %v8131_v52 = vld [vmem:[#allocation8 + $0x180] sm:$0xff]  }
  0xac   : > { %7348 = vmatprep.subr.bf16.mxu0 %v8714_v5  ;;  %7075 = vmatpush3.bf16.msra.mxu1 %v8095_v57  ;;  %v538_v57 = vld [vmem:[#allocation2 + $0x38] sm:$0x80]  ;;  %651 = vst [vmem:[#allocation2 + $0x160] sm:$0x80] %v650_v0  ;;  %v8194_v15 = vld [vmem:[#allocation11 + $0x10] sm:$0xff]   ;;  %v8195_v19 = vld [vmem:[#allocation11 + $0x18] sm:$0xff]  }
  0xad   : > { %7076 = vmatprep.subr.bf16.mxu1 %v8096_v59  ;;  %v1229_v32 = vrot.slane %v1021_v2, 1  ;;  %v1023_v43 = vor.u32 %v1021_v2, %v1020_v29  ;;  %v539_v59 = vsel %vm8737_vm6, 0, %v538_v57  ;;  %v8108_v2 = vld [vmem:[#allocation8 + $0x120] sm:$0xff]   ;;  %v476_v29 = vsel %vm8728_vm3, 0, %v475_v23  ;;  %s8365_s13 = scalar_lea.vmem %s8364_s9, 8192 }
  0xae   : > { %540 = vst [vmem:[#allocation2 + $0x38] sm:$0x80] %v539_v59  ;;  %477 = vst [vmem:[#allocation2 + $0x148] sm:$0x1] %v476_v29  ;;  %v484_v59 = vld [vmem:[#allocation2 + $0x160] sm:$0x1] }
  0xaf   : > { %7349 = vmatpush3.bf16.msra.mxu0 %v8714_v5  ;;  %v1248_v5 = vor.u32 %v1247_v35, %v1081_v27  ;;  %v8847_v50 = vor.u32 %v1229_v32, %v1018_v20  ;;  %v8858_v58 = vsel %vm8835_vm11, %v1023_v43, %v1149_v56  ;;  %v1309_v62 = vld [vmem:[#allocation2 + $0x118] sm:$0xff]  ;;  %v1095_v20 = vshrl.u32 %v8876_v6, 16  ;;  %v8109_v43 = vld [vmem:[#allocation8 + $0xe0] sm:$0xff]  }
  0xb0   : > { %7350 = vmatprep.subr.bf16.mxu0 %v8717_v8  ;;  %7077 = vmatpush3.bf16.msra.mxu1 %v8097_v9  ;;  %1151 = vst [vmem:[#allocation2 + $0x18] sm:$0xff] %v8858_v58  ;;  %v1310_v3 = vsel %vm8784_vm9, %v1250_v53, %v1309_v62  ;;  %v371_v9 = vsel %vm8728_vm3, 0, %v370_v7  ;;  %v641_v32 = vsel %vm8737_vm6, 0, %v640_v30  ;;  %v1105_v35 = vshll.u32 %v8884_v17, 16  ;;  %v547_v56 = vld [vmem:[#allocation2 + $0x50] sm:$0x80] }
  0xb1   : > { %7078 = vmatprep.subr.bf16.mxu1 %v8101_v42  ;;  %v1307_v51 = vsel %vm8784_vm9, %v1248_v5, %v1306_v46  ;;  %1311 = vst [vmem:[#allocation2 + $0x118] sm:$0xff] %v1310_v3  ;;  %372 = vst [vmem:[#allocation2 + $0x30] sm:$0x1] %v371_v9  ;;  %v8911_v46 = vrot.slane %v1067_v37, 7  ;;  %v8919_v53 = vrot.slane %v1081_v27, 7  ;;  %v485_v63 = vsel %vm8728_vm3, 0, %v484_v59 }
  0xb2   : > { %1308 = vst [vmem:[#allocation2 + $0x100] sm:$0xff] %v1307_v51  ;;  %7382 = vmatprep.mubr.bf16.mxu1 %v1307_v51  ;;  %1615 = vmatmul.mubr.bf16.gmra.mrb[4].mxu0 %v8858_v58  ;;  %642 = vst [vmem:[#allocation2 + $0x148] sm:$0x80] %v641_v32  ;;  %v1253_v5 = vrot.slane %v1105_v35, 1  ;;  %v8915_v51 = vrot.slane %v1074_v48, 7 }
  0xb3   : > { %7351 = vmatpush3.bf16.msra.mxu0 %v8717_v8  ;;  %v374_v8 = vsel %vm8728_vm3, 0, %v373_v55  ;;  %1622 = vmatprep.mubr.bf16.mxu0 %v8863_v60  ;;  %v382_v55 = vld [vmem:[#allocation2 + $0x50] sm:$0x1]  ;;  %486 = vst [vmem:[#allocation2 + $0x160] sm:$0x1] %v485_v63 }
  0xb4   : > { %7352 = vmatprep.subr.bf16.mxu0 %v8721_v11  ;;  %7079 = vmatpush3.bf16.msra.mxu1 %v8102_v45  ;;  %375 = vst [vmem:[#allocation2 + $0x38] sm:$0x1] %v374_v8  ;;  %v8110_v45 = vld [vmem:[#allocation8 + $0x128] sm:$0xff]   ;;  %v1254_v37 = vor.u32 %v1253_v5, %v1102_v34  ;;  %v383_v27 = vsel %vm8728_vm3, 0, %v382_v55  ;;  %v8932_v8 = vld [vmem:[%s8694_s20 + $0x10] sm:$0xff]  }
  0xb5   : > { %7080 = vmatprep.subr.bf16.mxu1 %v8103_v47  ;;  %1214 = vst [vmem:[#allocation2 + $0x38] sm:$0xff] %v8863_v60  ;;  %7383 = vmatmul.mubr.bf16.gmra.mrb[4].mxu1 %v1310_v3  ;;  %v1312_v47 = vld [vmem:[#allocation2 + $0x130] sm:$0xff]  ;;  %384 = vst [vmem:[#allocation2 + $0x50] sm:$0x1] %v383_v27  ;;  %v8946_v3 = vld [vmem:[%s8694_s20 + $0x68] sm:$0xff]   ;;  %v1032_v10 = vshrl.u32 %v8932_v8, 16 }
  0xb6   : > { %v379_v7 = vld [vmem:[#allocation2 + $0x48] sm:$0x1]  ;;  %v544_v9 = vld [vmem:[#allocation2 + $0x48] sm:$0x80]  ;;  %v1035_v21 = vshll.u32 %v8932_v8, 16  ;;  %v1109_v23 = vshrl.u32 %v8946_v3, 16 }
  0xb7   : > { %7353 = vmatpush3.bf16.msra.mxu0 %v8721_v11  ;;  %v1098_v11 = vshll.u32 %v8876_v6, 16  ;;  %v380_v24 = vsel %vm8728_vm3, 0, %v379_v7  ;;  %v545_v29 = vsel %vm8737_vm6, 0, %v544_v9  ;;  %v493_v30 = vld [vmem:[#allocation2 + $0x178] sm:$0x1]  ;;  %v8983_v27 = vrot.slane %v1088_v40, 7 }
  0xb8   : > { %7354 = vmatprep.subr.bf16.mxu0 %v8725_v14  ;;  %7081 = vmatpush3.bf16.msra.mxu1 %v8104_v54  ;;  %v1152_v48 = vld [vmem:[#allocation2 + $0x30] sm:$0xff]  ;;  %381 = vst [vmem:[#allocation2 + $0x48] sm:$0x1] %v380_v24  ;;  %546 = vst [vmem:[#allocation2 + $0x48] sm:$0x80] %v545_v29  ;;  %v8994_v40 = vld [vmem:[%s8694_s20 + $0x18] sm:$0xff]  }
  0xb9   : > { %v1251_v31 = vrot.slane %v1098_v11, 1  ;;  %7082 = vmatprep.subr.bf16.mxu1 %v8108_v2  ;;  %v8936_v57 = vsel %vm8835_vm11, %v1030_v44, %v1152_v48  ;;  %v1315_v62 = vld [vmem:[#allocation2 + $0x148] sm:$0xff]  ;;  %v1112_v2 = vshll.u32 %v8946_v3, 16  ;;  %v658_v32 = vld [vmem:[#allocation2 + $0x178] sm:$0x80]  ;;  %v8115_v44 = vld [vmem:[#allocation8 + $0x130] sm:$0xff]  }
  0xba   : > { %1154 = vst [vmem:[#allocation2 + $0x30] sm:$0xff] %v8936_v57  ;;  %1623 = vmatmul.mubr.bf16.gmra.mrb[8].mxu0 %v8936_v57  ;;  %v1316_v4 = vsel %vm8784_vm9, %v1254_v37, %v1315_v62  ;;  %v659_v5 = vsel %vm8737_vm6, 0, %v658_v32  ;;  %v8117_v37 = vld [vmem:[#allocation8 + $0x138] sm:$0xff]   ;;  %v388_v9 = vld [vmem:[#allocation2 + $0x60] sm:$0x1]  ;;  %v1042_v32 = vshll.u32 %v8994_v40, 16 }
  0xbb   : > { %7355 = vmatpush3.bf16.msra.mxu0 %v8725_v14  ;;  %v1252_v42 = vor.u32 %v1251_v31, %v1095_v20  ;;  %v8111_v14 = vld [vmem:[#allocation8 + $0xe8] sm:$0xff]   ;;  %1630 = vmatprep.mubr.bf16.mxu0 %v8932_v8  ;;  %1317 = vst [vmem:[#allocation2 + $0x148] sm:$0xff] %v1316_v4  ;;  %v494_v31 = vsel %vm8728_vm3, 0, %v493_v30  ;;  %660 = vst [vmem:[#allocation2 + $0x178] sm:$0x80] %v659_v5  ;;  %v389_v30 = vsel %vm8728_vm3, 0, %v388_v9 }
  0xbc   : > { %7356 = vmatprep.subr.bf16.mxu0 %v8734_v18  ;;  %7083 = vmatpush3.bf16.msra.mxu1 %v8109_v43  ;;  %495 = vst [vmem:[#allocation2 + $0x178] sm:$0x1] %v494_v31  ;;  %v8970_v43 = vld [vmem:[%s8694_s20 + $0x70] sm:$0xff]   ;;  %v391_v59 = vld [vmem:[#allocation2 + $0x68] sm:$0x1]  ;;  %v1039_v31 = vshrl.u32 %v8994_v40, 16 }
  0xbd   : > { %v1313_v54 = vsel %vm8784_vm9, %v1252_v42, %v1312_v47  ;;  %7084 = vmatprep.subr.bf16.mxu1 %v8110_v45  ;;  %v1255_v42 = vrot.slane %v1112_v2, 1  ;;  %v1116_v47 = vshrl.u32 %v8970_v43, 16  ;;  %v392_v0 = vsel %vm8728_vm3, 0, %v391_v59  ;;  %v553_v24 = vld [vmem:[#allocation2 + $0x60] sm:$0x80] }
  0xbe   : > { %1314 = vst [vmem:[#allocation2 + $0x130] sm:$0xff] %v1313_v54  ;;  %7386 = vmatprep.mubr.bf16.mxu1 %v1313_v54  ;;  %v8116_v54 = vld [vmem:[#allocation8 + $0xf0] sm:$0xff]   ;;  %393 = vst [vmem:[#allocation2 + $0x68] sm:$0x1] %v392_v0  ;;  %v574_v9 = vld [vmem:[#allocation2 + $0x98] sm:$0x80] }
  0xbf   : > { %7357 = vmatpush3.bf16.msra.mxu0 %v8734_v18  ;;  %v548_v18 = vsel %vm8737_vm6, 0, %v547_v56  ;;  %7387 = vmatmul.mubr.bf16.gmra.mrb[8].mxu1 %v1316_v4  ;;  %v1256_v45 = vor.u32 %v1255_v42, %v1109_v23  ;;  %v1318_v56 = vld [vmem:[#allocation2 + $0x160] sm:$0xff]  ;;  %v1155_v62 = vld [vmem:[#allocation2 + $0x48] sm:$0xff]  ;;  %v557_v4 = vsel %vm8737_vm6, 0, %v556_v61  ;;  %v8120_v42 = vld [vmem:[#allocation8 + $0x140] sm:$0xff]  }
  0xc0   : > { %7358 = vmatprep.subr.bf16.mxu0 %v8743_v22  ;;  %549 = vst [vmem:[#allocation2 + $0x50] sm:$0x80] %v548_v18  ;;  %7085 = vmatpush3.bf16.msra.mxu1 %v8111_v14  ;;  %v1119_v14 = vshll.u32 %v8970_v43, 16  ;;  %558 = vst [vmem:[#allocation2 + $0x68] sm:$0x80] %v557_v4 }
  0xc1   : > { %1215 = vst [vmem:[#allocation2 + $0x50] sm:$0xff] %v8932_v8  ;;  %7086 = vmatprep.subr.bf16.mxu1 %v8115_v44  ;;  %v1319_v18 = vsel %vm8784_vm9, %v1256_v45, %v1318_v56  ;;  %1216 = vst [vmem:[#allocation2 + $0x68] sm:$0xff] %v8994_v40  ;;  %v400_v44 = vld [vmem:[#allocation2 + $0x80] sm:$0x1]  ;;  %v565_v45 = vld [vmem:[#allocation2 + $0x80] sm:$0x80] }
  0xc2   : > { %v1257_v48 = vrot.slane %v1119_v14, 1  ;;  %1320 = vst [vmem:[#allocation2 + $0x160] sm:$0xff] %v1319_v18  ;;  %7390 = vmatprep.mubr.bf16.mxu1 %v1319_v18  ;;  %390 = vst [vmem:[#allocation2 + $0x60] sm:$0x1] %v389_v30  ;;  %v9019_v56 = vld [vmem:[%s8694_s20 + $0x20] sm:$0xff]  }
  0xc3   : > { %7359 = vmatpush3.bf16.msra.mxu0 %v8743_v22  ;;  %v1034_v22 = vrot.slane %v1032_v10, 7  ;;  %v1321_v29 = vld [vmem:[#allocation2 + $0x178] sm:$0xff]  ;;  %v1046_v61 = vshrl.u32 %v9019_v56, 16  ;;  %v1049_v0 = vshll.u32 %v9019_v56, 16  ;;  %v406_v30 = vld [vmem:[#allocation2 + $0x90] sm:$0x1] }
  0xc4   : > { %7360 = vmatprep.subr.bf16.mxu0 %v8745_v25  ;;  %7087 = vmatpush3.bf16.msra.mxu1 %v8116_v54  ;;  %v1258_v63 = vor.u32 %v1257_v48, %v1116_v47  ;;  %v1041_v54 = vrot.slane %v1039_v31, 7  ;;  %v397_v48 = vld [vmem:[#allocation2 + $0x78] sm:$0x1] }
  0xc5   : > { %v1037_v55 = vor.u32 %v1035_v21, %v1034_v22  ;;  %7088 = vmatprep.subr.bf16.mxu1 %v8117_v37  ;;  %v554_v22 = vsel %vm8737_vm6, 0, %v553_v24  ;;  %v401_v37 = vsel %vm8728_vm3, 0, %v400_v44  ;;  %v398_v18 = vsel %vm8728_vm3, 0, %v397_v48 }
  0xc6   : > { %v1322_v5 = vsel %vm8784_vm9, %v1258_v63, %v1321_v29  ;;  %555 = vst [vmem:[#allocation2 + $0x60] sm:$0x80] %v554_v22  ;;  %402 = vst [vmem:[#allocation2 + $0x80] sm:$0x1] %v401_v37  ;;  %v9029_v63 = vld [vmem:[%s8694_s20 + $0x28] sm:$0xff]   ;;  %v1048_v24 = vrot.slane %v1046_v61, 7 }
  0xc7   : > { %7361 = vmatpush3.bf16.msra.mxu0 %v8745_v25  ;;  %v8118_v25 = vld [vmem:[#allocation8 + $0xf8] sm:$0xff]   ;;  %v8998_v7 = vsel %vm8835_vm11, %v1037_v55, %v1155_v62  ;;  %1323 = vst [vmem:[#allocation2 + $0x178] sm:$0xff] %v1322_v5  ;;  %7391 = vmatmul.mubr.bf16.gmra.mrb[12].mxu1 %v1322_v5  ;;  %v566_v55 = vsel %vm8737_vm6, 0, %v565_v45  ;;  %v409_v62 = vld [vmem:[#allocation2 + $0x98] sm:$0x1]  ;;  %v575_v29 = vsel %vm8737_vm6, 0, %v574_v9 }
  0xc8   : > { %1157 = vst [vmem:[#allocation2 + $0x48] sm:$0xff] %v8998_v7  ;;  %1631 = vmatmul.mubr.bf16.gmra.mrb[12].mxu0 %v8998_v7  ;;  %7089 = vmatpush3.bf16.msra.mxu1 %v8118_v25  ;;  %567 = vst [vmem:[#allocation2 + $0x80] sm:$0x80] %v566_v55  ;;  %v562_v25 = vld [vmem:[#allocation2 + $0x78] sm:$0x80]  ;;  %v410_v4 = vsel %vm8728_vm3, 0, %v409_v62 }
  0xc9   : > { %1638 = vmatprep.mubr.bf16.mxu0 %v8994_v40  ;;  %7394 = vmatprep.subr.bf16.mxu1 %v8120_v42  ;;  %1217 = vst [vmem:[#allocation2 + $0x80] sm:$0xff] %v9019_v56  ;;  %v563_v59 = vsel %vm8737_vm6, 0, %v562_v25  ;;  %399 = vst [vmem:[#allocation2 + $0x78] sm:$0x1] %v398_v18  ;;  %v407_v22 = vsel %vm8728_vm3, 0, %v406_v30  ;;  %v10927_v44 = vshrl.u32 %v9029_v63, 16  ;;  %v1051_v25 = vor.u32 %v1049_v0, %v1048_v24 }
  0xca   : > { %2201 = vmatprep.mubr.bf16.mxu1 %v8800_v1  ;;  %v1044_v1 = vor.u32 %v1042_v32, %v1041_v54  ;;  %564 = vst [vmem:[#allocation2 + $0x78] sm:$0x80] %v563_v59  ;;  %411 = vst [vmem:[#allocation2 + $0x98] sm:$0x1] %v410_v4  ;;  %v571_v5 = vld [vmem:[#allocation2 + $0x90] sm:$0x80] }
  0xcb   : > { %576 = vst [vmem:[#allocation2 + $0x98] sm:$0x80] %v575_v29  ;;  %v1056_v45 = vshll.u32 %v9029_v63, 16  ;;  %v8123_v54 = vld [vmem:[#allocation8 + $0x148] sm:$0xff]   ;;  %408 = vst [vmem:[#allocation2 + $0x90] sm:$0x1] %v407_v22 }
  0xcc   : > { %1218 = vst [vmem:[#allocation2 + $0x98] sm:$0xff] %v9029_v63  ;;  %v572_v55 = vsel %vm8737_vm6, 0, %v571_v5  ;;  %v1055_v18 = vrot.slane %v10927_v44, 7  ;;  %v418_v59 = vld [vmem:[#allocation2 + $0xb0] sm:$0x1]  ;;  %v9056_v4 = vld [vmem:[%s8694_s20 + $0x30] sm:$0xff]  }
  0xcd   : > { %v1158_v37 = vld [vmem:[#allocation2 + $0x60] sm:$0xff]  ;;  %573 = vst [vmem:[#allocation2 + $0x90] sm:$0x80] %v572_v55  ;;  %v583_v62 = vld [vmem:[#allocation2 + $0xb0] sm:$0x80]  ;;  %v10928_v30 = vshrl.u32 %v9056_v4, 16 }
  0xce   : > { %v9049_v48 = vsel %vm8835_vm11, %v1044_v1, %v1158_v37  ;;  %v419_v1 = vsel %vm8728_vm3, 0, %v418_v59  ;;  %v584_v9 = vsel %vm8737_vm6, 0, %v583_v62  ;;  %v415_v24 = vld [vmem:[#allocation2 + $0xa8] sm:$0x1]  ;;  %v580_v29 = vld [vmem:[#allocation2 + $0xa8] sm:$0x80]  ;;  %v1058_v62 = vor.u32 %v1056_v45, %v1055_v18 }
  0xcf   : > { %1160 = vst [vmem:[#allocation2 + $0x60] sm:$0xff] %v9049_v48  ;;  %2202 = vmatmul.mubr.bf16.vlgmr.msra.gmra.mrb[16].mxu1 %v8858_v58  ;;  %420 = vst [vmem:[#allocation2 + $0xb0] sm:$0x1] %v419_v1  ;;  %v1063_v22 = vshll.u32 %v9056_v4, 16  ;;  %v416_v5 = vsel %vm8728_vm3, 0, %v415_v24  ;;  %v8125_v55 = vld [vmem:[#allocation8 + $0x150] sm:$0xff]  }
  0xd0   : > { %1639 = vmatmul.mubr.bf16.gmra.mrb[16].mxu0 %v9049_v48  ;;  %7395 = vmatpush3.bf16.msra.mxu1 %v8120_v42  ;;  %585 = vst [vmem:[#allocation2 + $0xb0] sm:$0x80] %v584_v9  ;;  %v581_v42 = vsel %vm8737_vm6, 0, %v580_v29  ;;  %v427_v37 = vld [vmem:[#allocation2 + $0xc8] sm:$0x1]  ;;  %v1062_v1 = vrot.slane %v10928_v30, 7 }
  0xd1   : > { %1646 = vmatprep.mubr.bf16.mxu0 %v9019_v56  ;;  %2209 = vmatprep.mubr.bf16.mxu1 %v8863_v60  ;;  %v1161_v58 = vld [vmem:[#allocation2 + $0x78] sm:$0xff]  ;;  %1219 = vst [vmem:[#allocation2 + $0xb0] sm:$0xff] %v9056_v4  ;;  %417 = vst [vmem:[#allocation2 + $0xa8] sm:$0x1] %v416_v5  ;;  %v428_v9 = vsel %vm8728_vm3, 0, %v427_v37 }
  0xd2   : > { %7396 = vmatprep.subr.bf16.mxu1 %v8123_v54  ;;  %v9076_v59 = vsel %vm8835_vm11, %v1051_v25, %v1161_v58  ;;  %582 = vst [vmem:[#allocation2 + $0xa8] sm:$0x80] %v581_v42  ;;  %v592_v24 = vld [vmem:[#allocation2 + $0xc8] sm:$0x80]  ;;  %v424_v44 = vld [vmem:[#allocation2 + $0xc0] sm:$0x1] }
  0xd3   : > { %1163 = vst [vmem:[#allocation2 + $0x78] sm:$0xff] %v9076_v59  ;;  %429 = vst [vmem:[#allocation2 + $0xc8] sm:$0x1] %v428_v9  ;;  %v593_v25 = vsel %vm8737_vm6, 0, %v592_v24  ;;  %v425_v29 = vsel %vm8728_vm3, 0, %v424_v44  ;;  %v9091_v42 = vld [vmem:[#allocation8 + $0x158] sm:$0xff]  }
  0xd4   : > { %v589_v18 = vld [vmem:[#allocation2 + $0xc0] sm:$0x80]  ;;  %7397 = vmatpush3.bf16.msra.mxu1 %v8123_v54  ;;  %594 = vst [vmem:[#allocation2 + $0xc8] sm:$0x80] %v593_v25  ;;  %426 = vst [vmem:[#allocation2 + $0xc0] sm:$0x1] %v425_v29  ;;  %v1065_v25 = vor.u32 %v1063_v22, %v1062_v1 }
  0xd5   : > { %v590_v58 = vsel %vm8737_vm6, 0, %v589_v18  ;;  %v436_v5 = vld [vmem:[#allocation2 + $0xe0] sm:$0x1]  ;;  %v1164_v37 = vld [vmem:[#allocation2 + $0x90] sm:$0xff]  ;;  %1220 = vst [vmem:[#allocation2 + $0xc8] sm:$0xff] %v8756_v33  ;;  %7398 = vmatprep.subr.bf16.mxu1 %v8125_v55 }
  0xd6   : > { %591 = vst [vmem:[#allocation2 + $0xc0] sm:$0x80] %v590_v58  ;;  %v437_v9 = vsel %vm8728_vm3, 0, %v436_v5  ;;  %v601_v24 = vld [vmem:[#allocation2 + $0xe0] sm:$0x80]  ;;  %v9098_v54 = vsel %vm8835_vm11, %v1058_v62, %v1164_v37 }
  0xd7   : > { %v433_v44 = vld [vmem:[#allocation2 + $0xd8] sm:$0x1]  ;;  %438 = vst [vmem:[#allocation2 + $0xe0] sm:$0x1] %v437_v9  ;;  %v602_v29 = vsel %vm8737_vm6, 0, %v601_v24  ;;  %2210 = vmatmul.mubr.bf16.gmra.mrb[20].mxu1 %v8936_v57  ;;  %1166 = vst [vmem:[#allocation2 + $0x90] sm:$0xff] %v9098_v54 }
  0xd8   : > { %v434_v18 = vsel %vm8728_vm3, 0, %v433_v44  ;;  %v598_v58 = vld [vmem:[#allocation2 + $0xd8] sm:$0x80]  ;;  %v445_v30 = vld [vmem:[#allocation2 + $0xf8] sm:$0x1]  ;;  %1647 = vmatmul.mubr.bf16.gmra.mrb[20].mxu0 %v9076_v59  ;;  %2217 = vmatprep.mubr.bf16.mxu1 %v8932_v8 }
  0xd9   : > { %603 = vst [vmem:[#allocation2 + $0xe0] sm:$0x80] %v602_v29  ;;  %435 = vst [vmem:[#allocation2 + $0xd8] sm:$0x1] %v434_v18  ;;  %v599_v62 = vsel %vm8737_vm6, 0, %v598_v58  ;;  %v446_v1 = vsel %vm8728_vm3, 0, %v445_v30  ;;  %1654 = vmatprep.mubr.bf16.mxu0 %v9029_v63  ;;  %v1072_v30 = vor.u32 %v1070_v38, %v8911_v46  ;;  %7399 = vmatpush3.bf16.msra.mxu1 %v8125_v55 }
  0xda   : > { %v610_v5 = vld [vmem:[#allocation2 + $0xf8] sm:$0x80]  ;;  %v442_v37 = vld [vmem:[#allocation2 + $0xf0] sm:$0x1]  ;;  %1221 = vst [vmem:[#allocation2 + $0xe0] sm:$0xff] %v8761_v36  ;;  %v1167_v44 = vld [vmem:[#allocation2 + $0xa8] sm:$0xff]  ;;  %7400 = vmatprep.subr.bf16.mxu1 %v9091_v42 }
  0xdb   : > { %600 = vst [vmem:[#allocation2 + $0xd8] sm:$0x80] %v599_v62  ;;  %447 = vst [vmem:[#allocation2 + $0xf8] sm:$0x1] %v446_v1  ;;  %v611_v57 = vsel %vm8737_vm6, 0, %v610_v5  ;;  %v443_v9 = vsel %vm8728_vm3, 0, %v442_v37  ;;  %v9127_v58 = vsel %vm8835_vm11, %v1065_v25, %v1167_v44 }
  0xdc   : > { %v607_v24 = vld [vmem:[#allocation2 + $0xf0] sm:$0x80]  ;;  %612 = vst [vmem:[#allocation2 + $0xf8] sm:$0x80] %v611_v57  ;;  %444 = vst [vmem:[#allocation2 + $0xf0] sm:$0x1] %v443_v9  ;;  %v1079_v9 = vor.u32 %v1077_v49, %v8915_v51 }
  0xdd   : > { %v608_v29 = vsel %vm8737_vm6, 0, %v607_v24  ;;  %v454_v18 = vld [vmem:[#allocation2 + $0x110] sm:$0x1]  ;;  %1222 = vst [vmem:[#allocation2 + $0xf8] sm:$0xff] %v8812_v13  ;;  %v619_v38 = vld [vmem:[#allocation2 + $0x110] sm:$0x80]  ;;  %7401 = vmatpush3.bf16.msra.mxu1 %v9091_v42 }
  0xde   : > { %609 = vst [vmem:[#allocation2 + $0xf0] sm:$0x80] %v608_v29  ;;  %v455_v62 = vsel %vm8728_vm3, 0, %v454_v18  ;;  %v451_v46 = vld [vmem:[#allocation2 + $0x108] sm:$0x1]  ;;  %v8127_v55 = vld [vmem:[#allocation8 + $0x160] sm:$0xff]  }
  0xdf   : > { %1169 = vst [vmem:[#allocation2 + $0xa8] sm:$0xff] %v9127_v58  ;;  %456 = vst [vmem:[#allocation2 + $0x110] sm:$0x1] %v455_v62  ;;  %v620_v1 = vsel %vm8737_vm6, 0, %v619_v38  ;;  %v452_v25 = vsel %vm8728_vm3, 0, %v451_v46  ;;  %v1170_v57 = vld [vmem:[#allocation2 + $0xc0] sm:$0xff]  ;;  %7402 = vmatprep.subr.bf16.mxu1 %v8127_v55  ;;  %2218 = vmatmul.mubr.bf16.gmra.mrb[24].mxu1 %v8998_v7 }
  0xe0   : > { %v616_v5 = vld [vmem:[#allocation2 + $0x108] sm:$0x80]  ;;  %v463_v37 = vld [vmem:[#allocation2 + $0x128] sm:$0x1]  ;;  %621 = vst [vmem:[#allocation2 + $0x110] sm:$0x80] %v620_v1  ;;  %v9149_v62 = vsel %vm8835_vm11, %v1072_v30, %v1170_v57  ;;  %1655 = vmatmul.mubr.bf16.gmra.mrb[24].mxu0 %v9098_v54  ;;  %2225 = vmatprep.mubr.bf16.mxu1 %v8994_v40 }
  0xe1   : > { %453 = vst [vmem:[#allocation2 + $0x108] sm:$0x1] %v452_v25  ;;  %v617_v24 = vsel %vm8737_vm6, 0, %v616_v5  ;;  %v464_v44 = vsel %vm8728_vm3, 0, %v463_v37  ;;  %v628_v29 = vld [vmem:[#allocation2 + $0x128] sm:$0x80]  ;;  %1662 = vmatprep.mubr.bf16.mxu0 %v9056_v4  ;;  %7403 = vmatpush3.bf16.msra.mxu1 %v8127_v55 }
  0xe2   : > { %v1097_v18 = vrot.slane %v1095_v20, 7  ;;  %1223 = vst [vmem:[#allocation2 + $0x110] sm:$0xff] %v8822_v26  ;;  %618 = vst [vmem:[#allocation2 + $0x108] sm:$0x80] %v617_v24  ;;  %v629_v49 = vsel %vm8737_vm6, 0, %v628_v29  ;;  %v8128_v46 = vld [vmem:[#allocation8 + $0x168] sm:$0xff]   ;;  %v1086_v20 = vor.u32 %v1084_v28, %v8919_v53 }
  0xe3   : > { %465 = vst [vmem:[#allocation2 + $0x128] sm:$0x1] %v464_v44  ;;  %v460_v51 = vld [vmem:[#allocation2 + $0x120] sm:$0x1]  ;;  %v625_v38 = vld [vmem:[#allocation2 + $0x120] sm:$0x80]  ;;  %7404 = vmatprep.subr.bf16.mxu1 %v8128_v46 }
  0xe4   : > { %1172 = vst [vmem:[#allocation2 + $0xc0] sm:$0xff] %v9149_v62  ;;  %630 = vst [vmem:[#allocation2 + $0x128] sm:$0x80] %v629_v49  ;;  %v461_v42 = vsel %vm8728_vm3, 0, %v460_v51  ;;  %v626_v30 = vsel %vm8737_vm6, 0, %v625_v38  ;;  %v1173_v1 = vld [vmem:[#allocation2 + $0xd8] sm:$0xff] }
  0xe5   : > { %1224 = vst [vmem:[#allocation2 + $0x128] sm:$0xff] %v8876_v6  ;;  %462 = vst [vmem:[#allocation2 + $0x120] sm:$0x1] %v461_v42  ;;  %v472_v25 = vld [vmem:[#allocation2 + $0x140] sm:$0x1]  ;;  %v1104_v28 = vrot.slane %v1102_v34, 7  ;;  %v9172_v53 = vsel %vm8835_vm11, %v1079_v9, %v1173_v1  ;;  %v1093_v34 = vor.u32 %v1091_v41, %v8983_v27  ;;  %7405 = vmatpush3.bf16.msra.mxu1 %v8128_v46 }
  0xe6   : > { %627 = vst [vmem:[#allocation2 + $0x120] sm:$0x80] %v626_v30  ;;  %v637_v5 = vld [vmem:[#allocation2 + $0x140] sm:$0x80]  ;;  %v473_v7 = vsel %vm8728_vm3, 0, %v472_v25  ;;  %1175 = vst [vmem:[#allocation2 + $0xd8] sm:$0xff] %v9172_v53  ;;  %v1100_v30 = vor.u32 %v1098_v11, %v1097_v18 }
  0xe7   : > { %v638_v37 = vsel %vm8737_vm6, 0, %v637_v5  ;;  %v469_v57 = vld [vmem:[#allocation2 + $0x138] sm:$0x1]  ;;  %v634_v24 = vld [vmem:[#allocation2 + $0x138] sm:$0x80]  ;;  %v1176_v44 = vld [vmem:[#allocation2 + $0xf0] sm:$0xff]  ;;  %2226 = vmatmul.mubr.bf16.gmra.mrb[28].mxu1 %v9049_v48 }
  0xe8   : > { %474 = vst [vmem:[#allocation2 + $0x140] sm:$0x1] %v473_v7  ;;  %639 = vst [vmem:[#allocation2 + $0x140] sm:$0x80] %v638_v37  ;;  %v470_v9 = vsel %vm8728_vm3, 0, %v469_v57  ;;  %v635_v29 = vsel %vm8737_vm6, 0, %v634_v24  ;;  %v9188_v38 = vsel %vm8835_vm11, %v1086_v20, %v1176_v44  ;;  %1663 = vmatmul.mubr.bf16.gmra.mrb[28].mxu0 %v9127_v58  ;;  %2233 = vmatprep.mubr.bf16.mxu1 %v9019_v56 }
  0xe9   : > { %v481_v49 = vld [vmem:[#allocation2 + $0x158] sm:$0x1]  ;;  %v8129_v51 = vld [vmem:[#allocation8 + $0x170] sm:$0xff]   ;;  %1225 = vst [vmem:[#allocation2 + $0x140] sm:$0xff] %v8884_v17  ;;  %471 = vst [vmem:[#allocation2 + $0x138] sm:$0x1] %v470_v9  ;;  %1670 = vmatprep.mubr.bf16.mxu0 %v8756_v33 }
  0xea   : > { %636 = vst [vmem:[#allocation2 + $0x138] sm:$0x80] %v635_v29  ;;  %v482_v41 = vsel %vm8728_vm3, 0, %v481_v49  ;;  %v646_v27 = vld [vmem:[#allocation2 + $0x158] sm:$0x80]  ;;  %v8130_v42 = vld [vmem:[#allocation8 + $0x1c0] sm:$0xff]   ;;  %v1107_v29 = vor.u32 %v1105_v35, %v1104_v28  ;;  %7406 = vmatprep.subr.bf16.mxu1 %v8129_v51 }
  0xeb   : > { %v478_v55 = vld [vmem:[#allocation2 + $0x150] sm:$0x1]  ;;  %1178 = vst [vmem:[#allocation2 + $0xf0] sm:$0xff] %v9188_v38  ;;  %483 = vst [vmem:[#allocation2 + $0x158] sm:$0x1] %v482_v41  ;;  %v647_v20 = vsel %vm8737_vm6, 0, %v646_v27  ;;  %7210 = vmatprep.subr.bf16.mxu0 %v8130_v42  ;;  %7407 = vmatpush3.bf16.msra.mxu1 %v8129_v51 }
  0xec   : > { %v479_v1 = vsel %vm8728_vm3, 0, %v478_v55  ;;  %v643_v25 = vld [vmem:[#allocation2 + $0x150] sm:$0x80]  ;;  %v1179_v5 = vld [vmem:[#allocation2 + $0x108] sm:$0xff]  ;;  %648 = vst [vmem:[#allocation2 + $0x158] sm:$0x80] %v647_v20 }
  0xed   : > { %480 = vst [vmem:[#allocation2 + $0x150] sm:$0x1] %v479_v1  ;;  %v644_v7 = vsel %vm8737_vm6, 0, %v643_v25  ;;  %v490_v37 = vld [vmem:[#allocation2 + $0x170] sm:$0x1]  ;;  %v9204_v57 = vsel %vm8835_vm11, %v1093_v34, %v1179_v5  ;;  %1226 = vst [vmem:[#allocation2 + $0x158] sm:$0xff] %v8946_v3 }
  0xee   : > { %645 = vst [vmem:[#allocation2 + $0x150] sm:$0x80] %v644_v7  ;;  %v1111_v11 = vrot.slane %v1109_v23, 7  ;;  %v491_v18 = vsel %vm8728_vm3, 0, %v490_v37  ;;  %v655_v24 = vld [vmem:[#allocation2 + $0x170] sm:$0x80] }
  0xef   : > { %v487_v44 = vld [vmem:[#allocation2 + $0x168] sm:$0x1]  ;;  %1181 = vst [vmem:[#allocation2 + $0x108] sm:$0xff] %v9204_v57  ;;  %v1182_v9 = vld [vmem:[#allocation2 + $0x120] sm:$0xff]  ;;  %492 = vst [vmem:[#allocation2 + $0x170] sm:$0x1] %v491_v18  ;;  %2234 = vmatmul.mubr.bf16.gmra.mrb[32].mxu1 %v9076_v59 }
  0xf0   : > { %v656_v34 = vsel %vm8737_vm6, 0, %v655_v24  ;;  %v488_v49 = vsel %vm8728_vm3, 0, %v487_v44  ;;  %v652_v23 = vld [vmem:[#allocation2 + $0x168] sm:$0x80]  ;;  %v9222_v46 = vsel %vm8835_vm11, %v1100_v30, %v1182_v9  ;;  %v1118_v28 = vrot.slane %v1116_v47, 7  ;;  %1671 = vmatmul.mubr.bf16.gmra.mrb[32].mxu0 %v9149_v62  ;;  %2241 = vmatprep.mubr.bf16.mxu1 %v9029_v63 }
  0xf1   : > { %657 = vst [vmem:[#allocation2 + $0x170] sm:$0x80] %v656_v34  ;;  %489 = vst [vmem:[#allocation2 + $0x168] sm:$0x1] %v488_v49  ;;  %v653_v35 = vsel %vm8737_vm6, 0, %v652_v23  ;;  %v1185_v47 = vld [vmem:[#allocation2 + $0x138] sm:$0xff]  ;;  %v1114_v20 = vor.u32 %v1112_v2, %v1111_v11  ;;  %1678 = vmatprep.mubr.bf16.mxu0 %v8761_v36 }
  0xf2   : > { %v358_v41 = vld [vmem:[#allocation2 + $0x10] sm:$0x1]  ;;  %v523_v27 = vld [vmem:[#allocation2 + $0x10] sm:$0x80]  ;;  %1184 = vst [vmem:[#allocation2 + $0x120] sm:$0xff] %v9222_v46  ;;  %1227 = vst [vmem:[#allocation2 + $0x170] sm:$0xff] %v8970_v43  ;;  %v9244_v5 = vsel %vm8835_vm11, %v1107_v29, %v1185_v47  ;;  %v1121_v2 = vor.u32 %v1119_v14, %v1118_v28 }
  0xf3   : > { %654 = vst [vmem:[#allocation2 + $0x168] sm:$0x80] %v653_v35  ;;  %v359_v48 = vsel %vm8728_vm3, 0, %v358_v41  ;;  %v524_v55 = vsel %vm8737_vm6, 0, %v523_v27  ;;  %v367_v42 = vld [vmem:[#allocation2 + $0x28] sm:$0x1] }
  0xf4   : > { %v532_v30 = vld [vmem:[#allocation2 + $0x28] sm:$0x80]  ;;  %360 = vst [vmem:[#allocation2 + $0x10] sm:$0x1] %v359_v48  ;;  %525 = vst [vmem:[#allocation2 + $0x10] sm:$0x80] %v524_v55 }
  0xf5   : > { %v368_v1 = vsel %vm8728_vm3, 0, %v367_v42  ;;  %v533_v25 = vsel %vm8737_vm6, 0, %v532_v30  ;;  %1187 = vst [vmem:[#allocation2 + $0x138] sm:$0xff] %v9244_v5  ;;  %v1188_v7 = vld [vmem:[#allocation2 + $0x150] sm:$0xff]  ;;  %v376_v11 = vld [vmem:[#allocation2 + $0x40] sm:$0x1] }
  0xf6   : > { %369 = vst [vmem:[#allocation2 + $0x28] sm:$0x1] %v368_v1  ;;  %534 = vst [vmem:[#allocation2 + $0x28] sm:$0x80] %v533_v25  ;;  %v9251_v37 = vsel %vm8835_vm11, %v1114_v20, %v1188_v7  ;;  %v541_v18 = vld [vmem:[#allocation2 + $0x40] sm:$0x80] }
  0xf7   : > { %1190 = vst [vmem:[#allocation2 + $0x150] sm:$0xff] %v9251_v37  ;;  %v377_v51 = vsel %vm8728_vm3, 0, %v376_v11  ;;  %v542_v24 = vsel %vm8737_vm6, 0, %v541_v18  ;;  %v385_v44 = vld [vmem:[#allocation2 + $0x58] sm:$0x1]  ;;  %v1231_v29 = vrot.slane %v1028_v16, 1  ;;  %2242 = vmatmul.mubr.bf16.gmra.mrb[36].mxu1 %v9098_v54 }
  0xf8   : > { %v550_v9 = vld [vmem:[#allocation2 + $0x58] sm:$0x80]  ;;  %378 = vst [vmem:[#allocation2 + $0x40] sm:$0x1] %v377_v51  ;;  %543 = vst [vmem:[#allocation2 + $0x40] sm:$0x80] %v542_v24  ;;  %1679 = vmatmul.mubr.bf16.gmra.mrb[36].mxu0 %v9172_v53  ;;  %2249 = vmatprep.mubr.bf16.mxu1 %v9056_v4 }
  0xf9   : > { %v386_v34 = vsel %vm8728_vm3, 0, %v385_v44  ;;  %v551_v49 = vsel %vm8737_vm6, 0, %v550_v9  ;;  %v1233_v59 = vrot.slane %v1035_v21, 1  ;;  %v1232_v28 = vor.u32 %v1231_v29, %v1025_v12  ;;  %v394_v41 = vld [vmem:[#allocation2 + $0x70] sm:$0x1]  ;;  %v8138_v30 = vld [vmem:[#allocation8 + $0x178] sm:$0xff]   ;;  %1686 = vmatprep.mubr.bf16.mxu0 %v8812_v13 }
  0xfa   : > { %v1191_v14 = vld [vmem:[#allocation2 + $0x168] sm:$0xff]  ;;  %387 = vst [vmem:[#allocation2 + $0x58] sm:$0x1] %v386_v34  ;;  %552 = vst [vmem:[#allocation2 + $0x58] sm:$0x80] %v551_v49  ;;  %v1235_v27 = vrot.slane %v1042_v32, 1  ;;  %7408 = vmatprep.subr.bf16.mxu1 %v8138_v30 }
  0xfb   : > { %v9270_v23 = vsel %vm8835_vm11, %v1121_v2, %v1191_v14  ;;  %v1234_v21 = vor.u32 %v1233_v59, %v1032_v10  ;;  %v395_v48 = vsel %vm8728_vm3, 0, %v394_v41  ;;  %v559_v55 = vld [vmem:[#allocation2 + $0x70] sm:$0x80]  ;;  %v403_v42 = vld [vmem:[#allocation2 + $0x88] sm:$0x1]  ;;  %v1237_v20 = vrot.slane %v1049_v0, 1  ;;  %7409 = vmatpush3.bf16.msra.mxu1 %v8138_v30 }
  0xfc   : > { %1193 = vst [vmem:[#allocation2 + $0x168] sm:$0xff] %v9270_v23  ;;  %396 = vst [vmem:[#allocation2 + $0x70] sm:$0x1] %v395_v48  ;;  %v404_v60 = vsel %vm8728_vm3, 0, %v403_v42  ;;  %v568_v12 = vld [vmem:[#allocation2 + $0x88] sm:$0x80]  ;;  %v1236_v54 = vor.u32 %v1235_v27, %v1039_v31 }
  0xfd   : > { %v1279_v16 = vld [vmem:[#allocation2 + $0x28] sm:$0xff]  ;;  %405 = vst [vmem:[#allocation2 + $0x88] sm:$0x1] %v404_v60  ;;  %v569_v8 = vsel %vm8737_vm6, 0, %v568_v12  ;;  %v1239_v0 = vrot.slane %v1056_v45, 1  ;;  %v1238_v25 = vor.u32 %v1237_v20, %v1046_v61  ;;  %v10953_v30 = vshrl.u32 %v9056_v4, 16 }
  0xfe   : > { %v9278_v35 = vsel %vm8784_vm9, %v8847_v50, %v1279_v16  ;;  %v560_v50 = vsel %vm8737_vm6, 0, %v559_v55  ;;  %570 = vst [vmem:[#allocation2 + $0x88] sm:$0x80] %v569_v8  ;;  %v412_v7 = vld [vmem:[#allocation2 + $0xa0] sm:$0x1]  ;;  %v9324_v31 = vld [vmem:[%s8694_s20 + $0x78] sm:$0xff]  }
  0xff   : > { %1281 = vst [vmem:[#allocation2 + $0x28] sm:$0xff] %v9278_v35  ;;  %v1282_v47 = vld [vmem:[#allocation2 + $0x40] sm:$0xff]  ;;  %561 = vst [vmem:[#allocation2 + $0x70] sm:$0x80] %v560_v50  ;;  %v499_v11 = vld [vmem:[#allocation2 + $0x188] sm:$0x1]  ;;  %2250 = vmatmul.mubr.bf16.gmra.mrb[40].mxu1 %v9127_v58 }
 0x100   : > { %v9299_v10 = vsel %vm8784_vm9, %v1232_v28, %v1282_v47  ;;  %v577_v2 = vld [vmem:[#allocation2 + $0xa0] sm:$0x80]  ;;  %v413_v18 = vsel %vm8728_vm3, 0, %v412_v7  ;;  %v500_v24 = vsel %vm8728_vm3, 0, %v499_v11  ;;  %v664_v40 = vld [vmem:[#allocation2 + $0x188] sm:$0x80]  ;;  %1687 = vmatmul.mubr.bf16.gmra.mrb[40].mxu0 %v9188_v38  ;;  %2257 = vmatprep.mubr.bf16.mxu1 %v8756_v33 }
 0x101   : > { %v1285_v32 = vld [vmem:[#allocation2 + $0x58] sm:$0xff]  ;;  %1284 = vst [vmem:[#allocation2 + $0x40] sm:$0xff] %v9299_v10  ;;  %v578_v51 = vsel %vm8737_vm6, 0, %v577_v2  ;;  %414 = vst [vmem:[#allocation2 + $0xa0] sm:$0x1] %v413_v18  ;;  %v665_v56 = vsel %vm8737_vm6, 0, %v664_v40  ;;  %1694 = vmatprep.mubr.bf16.mxu0 %v8822_v26 }
 0x102   : > { %v9308_v1 = vsel %vm8784_vm9, %v1234_v21, %v1285_v32  ;;  %579 = vst [vmem:[#allocation2 + $0xa0] sm:$0x80] %v578_v51  ;;  %501 = vst [vmem:[#allocation2 + $0x188] sm:$0x1] %v500_v24  ;;  %v421_v9 = vld [vmem:[#allocation2 + $0xb8] sm:$0x1] }
 0x103   : > { %1287 = vst [vmem:[#allocation2 + $0x58] sm:$0xff] %v9308_v1  ;;  %666 = vst [vmem:[#allocation2 + $0x188] sm:$0x80] %v665_v56  ;;  %v586_v14 = vld [vmem:[#allocation2 + $0xb8] sm:$0x80]  ;;  %v1123_v29 = vshrl.u32 %v9324_v31, 16 }
 0x104   : > { %1228 = vst [vmem:[#allocation2 + $0x188] sm:$0xff] %v9324_v31  ;;  %v422_v49 = vsel %vm8728_vm3, 0, %v421_v9  ;;  %v587_v59 = vsel %vm8737_vm6, 0, %v586_v14  ;;  %v496_v16 = vld [vmem:[#allocation2 + $0x180] sm:$0x1]  ;;  %v1241_v58 = vrot.slane %v1063_v22, 1 }
 0x105   : > { %v1291_v45 = vld [vmem:[#allocation2 + $0x88] sm:$0xff]  ;;  %v661_v28 = vld [vmem:[#allocation2 + $0x180] sm:$0x80]  ;;  %423 = vst [vmem:[#allocation2 + $0xb8] sm:$0x1] %v422_v49  ;;  %v497_v41 = vsel %vm8728_vm3, 0, %v496_v16 }
 0x106   : > { %v1288_v44 = vld [vmem:[#allocation2 + $0x70] sm:$0xff]  ;;  %v9338_v34 = vsel %vm8784_vm9, %v1238_v25, %v1291_v45  ;;  %588 = vst [vmem:[#allocation2 + $0xb8] sm:$0x80] %v587_v59  ;;  %v662_v27 = vsel %vm8737_vm6, 0, %v661_v28  ;;  %v10952_v21 = vshrl.u32 %v9029_v63, 16  ;;  %v1125_v55 = vrot.slane %v1123_v29, 7 }
 0x107   : > { %v9330_v61 = vsel %vm8784_vm9, %v1236_v54, %v1288_v44  ;;  %1293 = vst [vmem:[#allocation2 + $0x88] sm:$0xff] %v9338_v34  ;;  %498 = vst [vmem:[#allocation2 + $0x180] sm:$0x1] %v497_v41  ;;  %v1126_v33 = vshll.u32 %v9324_v31, 16  ;;  %v1242_v50 = vor.u32 %v1241_v58, %v10953_v30  ;;  %v9364_v12 = vld [vmem:[#allocation8 + $0x200] sm:$0xff]   ;;  %2258 = vmatmul.mubr.bf16.gmra.mrb[44].mxu1 %v9149_v62  ;;  %v8136_v25 = vld [vmem:[#allocation8 + $0x1d8] sm:$0xff]  }
 0x108   : > { %1290 = vst [vmem:[#allocation2 + $0x70] sm:$0xff] %v9330_v61  ;;  %v1240_v48 = vor.u32 %v1239_v0, %v10952_v21  ;;  %663 = vst [vmem:[#allocation2 + $0x180] sm:$0x80] %v662_v27  ;;  %1695 = vmatmul.mubr.bf16.gmra.mrb[44].mxu0 %v9204_v57  ;;  %2265 = vmatprep.mubr.bf16.mxu1 %v8761_v36  ;;  %v502_v36 = vld [vmem:[#allocation2 + $0x190] sm:$0x1]  ;;  %v8133_v0 = vld [vmem:[#allocation8 + $0x188] sm:$0xff]  }
 0x109   : > { %v1294_v42 = vld [vmem:[#allocation2 + $0xa0] sm:$0xff]  ;;  %v1128_v60 = vor.u32 %v1126_v33, %v1125_v55  ;;  %1702 = vmatprep.mubr.bf16.mxu0 %v8876_v6  ;;  %7442 = vmatprep.subr.bf16.mxu1 %v9364_v12  ;;  %v667_v62 = vld [vmem:[#allocation2 + $0x190] sm:$0x80]  ;;  %v503_v32 = vsel %vm8728_vm3, 0, %v502_v36  ;;  %v1259_v20 = vrot.slane %v1126_v33, 1  ;;  %v8141_v7 = vld [vmem:[#allocation8 + $0x1e8] sm:$0xff]  }
 0x10a   : > { %v9361_v22 = vsel %vm8784_vm9, %v1240_v48, %v1294_v42  ;;  %v668_v39 = vsel %vm8737_vm6, 0, %v667_v62  ;;  %504 = vst [vmem:[#allocation2 + $0x190] sm:$0x1] %v503_v32  ;;  %v673_v2 = vld [vmem:[#allocation2 + $0x1a0] sm:$0x80]  ;;  %v8142_v24 = vld [vmem:[#allocation8 + $0x1a8] sm:$0xff]  }
 0x10b   : > { %1296 = vst [vmem:[#allocation2 + $0xa0] sm:$0xff] %v9361_v22  ;;  %669 = vst [vmem:[#allocation2 + $0x190] sm:$0x80] %v668_v39  ;;  %v674_v18 = vsel %vm8737_vm6, 0, %v673_v2  ;;  %v670_v51 = vld [vmem:[#allocation2 + $0x198] sm:$0x80] }
 0x10c   : > { %675 = vst [vmem:[#allocation2 + $0x1a0] sm:$0x80] %v674_v18  ;;  %v671_v40 = vsel %vm8737_vm6, 0, %v670_v51  ;;  %v511_v44 = vld [vmem:[#allocation2 + $0x1a8] sm:$0x1]  ;;  %v8144_v14 = vld [vmem:[#allocation8 + $0x1f0] sm:$0xff]  }
 0x10d   : > { %v1297_v63 = vld [vmem:[#allocation2 + $0xb8] sm:$0xff]  ;;  %v676_v56 = vld [vmem:[#allocation2 + $0x1a8] sm:$0x80]  ;;  %672 = vst [vmem:[#allocation2 + $0x198] sm:$0x80] %v671_v40  ;;  %v512_v45 = vsel %vm8728_vm3, 0, %v511_v44 }
 0x10e   : > { %v9372_v4 = vsel %vm8784_vm9, %v1242_v50, %v1297_v63  ;;  %v677_v9 = vsel %vm8737_vm6, 0, %v676_v56  ;;  %513 = vst [vmem:[#allocation2 + $0x1a8] sm:$0x1] %v512_v45  ;;  %v2589_v49 = vld [vmem:[#allocation2 + $0x38] sm:$0xff]  ;;  %v8147_v59 = vld [vmem:[#allocation8 + $0x1b8] sm:$0xff]   ;;  %v2588_v16 = vld [vmem:[#allocation2 + $0x30] sm:$0xff] }
 0x10f   : > { %v1194_v47 = vld [vmem:[#allocation2 + $0x180] sm:$0xff]  ;;  %1299 = vst [vmem:[#allocation2 + $0xb8] sm:$0xff] %v9372_v4  ;;  %2266 = vmatmul.mubr.bf16.gmra.mrb[48].mxu1 %v9172_v53  ;;  %678 = vst [vmem:[#allocation2 + $0x1a8] sm:$0x80] %v677_v9  ;;  %v8149_v28 = vld [vmem:[#allocation8 + $0x208] sm:$0xff]   ;;  %s8359_s20 = scalar_lea.vmem %s10866_s16, 4096 }
 0x110   : > { %v9377_v8 = vsel %vm8835_vm11, %v1128_v60, %v1194_v47  ;;  %1703 = vmatmul.mubr.bf16.gmra.mrb[48].mxu0 %v9222_v46  ;;  %2273 = vmatprep.mubr.bf16.mxu1 %v8812_v13  ;;  %v1260_v13 = vor.u32 %v1259_v20, %v1123_v29  ;;  %v8145_v29 = vld [vmem:[#allocation8 + $0x1b0] sm:$0xff]   ;;  %v9432_v58 = vld [vmem:[#allocation3] sm:$0xff]  ;;  %v2591_v27 = vld [vmem:[#allocation2 + $0x48] sm:$0xff]  ;;  %p8360_p10 = scmp.ne.s32.totalorder %s10866_s16, %s8359_s20  ;;  %p8367_p1 = scmp.lt.s32.totalorder %s8365_s13, %s8359_s20 }
 0x111   : > { %1196 = vst [vmem:[#allocation2 + $0x180] sm:$0xff] %v9377_v8  ;;  %1710 = vmatprep.mubr.bf16.mxu0 %v8884_v17  ;;  %v2592_v41 = vld [vmem:[#allocation2 + $0x50] sm:$0xff]  ;;  %v2595_v21 = vld [vmem:[#allocation2 + $0x68] sm:$0xff]  ;;  %v2594_v33 = vld [vmem:[#allocation2 + $0x60] sm:$0xff] }
 0x112   : > { %v1324_v53 = vld [vmem:[#allocation2 + $0x190] sm:$0xff]  ;;  %v8151_v48 = vld [vmem:[#allocation8 + $0x218] sm:$0xff]   ;;  %v2598_v42 = vld [vmem:[#allocation2 + $0x80] sm:$0xff]  ;;  %p8361_p3 = pnand %p8360_p10, %p8639_p5  ;;  %p8368_p2 = por %p8367_p1, %p8366_p12 }
 0x113   : > { %v9395_v54 = vsel %vm8784_vm9, %v1260_v13, %v1324_v53  ;;  %v8152_v55 = vld [vmem:[#allocation8 + $0x220] sm:$0xff]   ;;  %v8153_v30 = vld [vmem:[#allocation8 + $0x228] sm:$0xff]   ;;  %v8154_v50 = vld [vmem:[#allocation8 + $0x230] sm:$0xff]  }
 0x114   : > { %1326 = vst [vmem:[#allocation2 + $0x190] sm:$0xff] %v9395_v54  ;;  %v9442_v60 = vld [vmem:[#allocation2 + $0xd0] sm:$0xff]  ;;  %v9444_v63 = vld [vmem:[#allocation2 + $0xe8] sm:$0xff]  ;;  %v2601_v47 = vld [vmem:[#allocation2 + $0x98] sm:$0xff]  ;;  %p8362_p7 = pneg %p8361_p3 }
 0x115   : > { %v8155_v36 = vld [vmem:[#allocation8 + $0x238] sm:$0xff]   ;;  %v9448_v62 = vld [vmem:[#allocation2 + $0x100] sm:$0xff]  ;;  %v2600_v32 = vld [vmem:[#allocation2 + $0x90] sm:$0xff] }
 0x116   : > { %v9450_v39 = vld [vmem:[#allocation2 + $0x118] sm:$0xff]  ;;  %v2604_v20 = vld [vmem:[#allocation2 + $0xb0] sm:$0xff]  ;;  %p8369_p4 = pnand %p8368_p2, %p8362_p7 }
 0x117   : > { %2274 = vmatmul.mubr.bf16.gmra.mrb[52].mxu1 %v9188_v38  ;;  %v1329_v38 = vld [vmem:[#allocation2 + $0x10] sm:$0xff]  ;;  %v8230_v44 = vld [vmem:[#allocation2 + $0xd8] sm:$0xff] }
 0x118   : > { %1711 = vmatmul.mubr.bf16.gmra.mrb[52].mxu0 %v9244_v5  ;;  %2281 = vmatprep.mubr.bf16.mxu1 %v8822_v26  ;;  %v8132_v26 = vld [vmem:[#allocation8 + $0x1c8] sm:$0xff]  }
 0x119   : > { %1718 = vmatprep.mubr.bf16.mxu0 %v8946_v3  ;;  %v8231_v56 = vld [vmem:[#allocation2 + $0xf8] sm:$0xff] }
 0x11f   : > { %2282 = vmatmul.mubr.bf16.gmra.mrb[56].mxu1 %v9204_v57  ;;  %v8134_v57 = vld [vmem:[#allocation8 + $0x1d0] sm:$0xff]  }
 0x120   : > { %1719 = vmatmul.mubr.bf16.gmra.mrb[56].mxu0 %v9251_v37  ;;  %2289 = vmatprep.mubr.bf16.mxu1 %v8876_v6  ;;  %v8135_v6 = vld [vmem:[#allocation8 + $0x190] sm:$0xff]  }
 0x121   : > { %1726 = vmatprep.mubr.bf16.mxu0 %v8970_v43 }
 0x127   : > { %2290 = vmatmul.mubr.bf16.gmra.mrb[60].mxu1 %v9222_v46  ;;  %v8137_v46 = vld [vmem:[#allocation8 + $0x198] sm:$0xff]  }
 0x128   : > { %1727 = vmatmul.mubr.bf16.gmra.mrb[60].mxu0 %v9270_v23  ;;  %2297 = vmatprep.mubr.bf16.mxu1 %v8884_v17  ;;  %v8139_v17 = vld [vmem:[#allocation8 + $0x1e0] sm:$0xff]  }
 0x129   : > { %7362 = vmatprep.mubr.bf16.mxu0 %v1329_v38  ;;  %v9455_v38 = vld [vmem:[#allocation2 + $0x130] sm:$0xff] }
 0x12f   : > { %2298 = vmatmul.mubr.bf16.gmra.mrb[64].mxu1 %v9244_v5  ;;  %v8140_v5 = vld [vmem:[#allocation8 + $0x1a0] sm:$0xff]  }
 0x130   : > { %7363 = vmatmul.mubr.bf16.vlgmr.msra.gmra.mrb[64].mxu0 %v9278_v35  ;;  %2305 = vmatprep.mubr.bf16.mxu1 %v8946_v3  ;;  %v508_v3 = vld [vmem:[#allocation2 + $0x1a0] sm:$0x1] }
 0x131   : > { %7211 = vmatpush3.bf16.msra.mxu0 %v8131_v52  ;;  %7366 = vmatprep.mubr.bf16.mxu0 %v9299_v10  ;;  %v509_v11 = vsel %vm8728_vm3, 0, %v508_v3  ;;  %v2603_v52 = vld [vmem:[#allocation2 + $0xa8] sm:$0xff]  ;;  %v9468_v3 = vld [vmem:[#allocation2 + $0x178] sm:$0xff] }
 0x132   : > { %7212 = vmatprep.subr.bf16.mxu0 %v8132_v26  ;;  %510 = vst [vmem:[#allocation2 + $0x1a0] sm:$0x1] %v509_v11  ;;  %v8229_v11 = vld [vmem:[#allocation2 + $0xe0] sm:$0xff] }
 0x135   : > { %7213 = vmatpush3.bf16.msra.mxu0 %v8133_v0 }
 0x136   : > { %7214 = vmatprep.subr.bf16.mxu0 %v8134_v57  ;;  %v9459_v57 = vld [vmem:[#allocation2 + $0x148] sm:$0xff] }
 0x137   : > { %2306 = vmatmul.mubr.bf16.gmra.mrb[68].mxu1 %v9251_v37  ;;  %v505_v37 = vld [vmem:[#allocation2 + $0x198] sm:$0x1] }
 0x138   : > { %7367 = vmatmul.mubr.bf16.gmra.mrb[68].mxu0 %v9308_v1  ;;  %2313 = vmatprep.mubr.bf16.mxu1 %v8970_v43  ;;  %v506_v43 = vsel %vm8728_vm3, 0, %v505_v37  ;;  %v8157_v37 = vld [vmem:[#allocation10 + $0x8] sm:$0xff]  }
 0x139   : > { %7215 = vmatpush3.bf16.msra.mxu0 %v8135_v6  ;;  %7370 = vmatprep.mubr.bf16.mxu0 %v9330_v61  ;;  %507 = vst [vmem:[#allocation2 + $0x198] sm:$0x1] %v506_v43  ;;  %v2607_v6 = vld [vmem:[#allocation2 + $0xc8] sm:$0xff] }
 0x13a   : > { %7216 = vmatprep.subr.bf16.mxu0 %v8136_v25 }
 0x13d   : > { %7217 = vmatpush3.bf16.msra.mxu0 %v8137_v46 }
 0x13e   : > { %7218 = vmatprep.subr.bf16.mxu0 %v8139_v17  ;;  %v8156_v17 = vld [vmem:[#allocation10] sm:$0xff]  }
 0x13f   : > { %2314 = vmatmul.mubr.bf16.gmra.mrb[72].mxu1 %v9270_v23  ;;  %v8146_v23 = vld [vmem:[#allocation8 + $0x1f8] sm:$0xff]  }
 0x140   : > { %7371 = vmatmul.mubr.bf16.gmra.mrb[72].mxu0 %v9338_v34  ;;  %2321 = vmatprep.mubr.bf16.mxu1 %v9324_v31 }
 0x141   : > { %7219 = vmatpush3.bf16.msra.mxu0 %v8140_v5  ;;  %7374 = vmatprep.mubr.bf16.mxu0 %v9361_v22  ;;  %v9466_v5 = vld [vmem:[#allocation2 + $0x160] sm:$0xff] }
 0x142   : > { %7220 = vmatprep.subr.bf16.mxu0 %v8141_v7  ;;  %v2606_v7 = vld [vmem:[#allocation2 + $0xc0] sm:$0xff] }
 0x145   : > { %7221 = vmatpush3.bf16.msra.mxu0 %v8142_v24 }
 0x146   : > { %7222 = vmatprep.subr.bf16.mxu0 %v8144_v14 }
 0x147   : > { %2322 = vmatmul.mubr.bf16.gmra.mrb[76].mxu1 %v9377_v8 }
 0x148   : > { %7375 = vmatmul.mubr.bf16.gmra.mrb[76].mxu0 %v9372_v4  ;;  %7410 = vmatprep.mubr.bf16.mxu1 %v9278_v35  ;;  %v8150_v35 = vld [vmem:[#allocation8 + $0x210] sm:$0xff]  }
 0x149   : > { %7223 = vmatpush3.bf16.msra.mxu0 %v8145_v29  ;;  %2861 = vmatprep.mubr.bf16.mxu0 %v2589_v49  ;;  %v8232_v49 = vld [vmem:[#allocation2 + $0xf0] sm:$0xff] }
 0x14a   : > { %7224 = vmatprep.subr.bf16.mxu0 %v8146_v23  ;;  %v8158_v23 = vld [vmem:[#allocation10 + $0x10] sm:$0xff]  }
 0x14d   : > { %7225 = vmatpush3.bf16.msra.mxu0 %v8147_v59 }
 0x14e   : > { %3803 = vmatprep.subr.bf16.mxu0 %v9432_v58 }
 0x14f   : > { %7411 = vmatmul.mubr.bf16.vlgmr.msra.gmra.mrb[80].mxu1 %v9299_v10 }
 0x150   : > { %2862 = vmatmul.mubr.bf16.vlgmr.msra.gmra.mrb[80].mxu0 %v2588_v16  ;;  %7443 = vmatpush3.bf16.msra.mxu1 %v9364_v12  ;;  %v2597_v12 = vld [vmem:[#allocation2 + $0x78] sm:$0xff]  ;;  %v8233_v16 = vld [vmem:[#allocation2 + $0x110] sm:$0xff] }
 0x151   : > { %7414 = vmatprep.mubr.bf16.mxu1 %v9308_v1  ;;  %2869 = vmatprep.mubr.bf16.mxu0 %v2592_v41  ;;  %v8235_v41 = vld [vmem:[#allocation2 + $0x128] sm:$0xff] }
 0x152   : > { %7444 = vmatprep.subr.bf16.mxu1 %v8149_v28  ;;  %3804 = vmatpush1.bf16.msra.mxu0 %v8156_v17 }
 0x153   : > { %3805 = vmatprep.subr.bf16.mxu0 %v9432_v58 }
 0x154   : > { %7445 = vmatpush3.bf16.msra.mxu1 %v8149_v28 }
 0x155   : > { %7446 = vmatprep.subr.bf16.mxu1 %v8150_v35 }
 0x156   : > { %3806 = vmatpush1.bf16.msra.mxu0 %v8157_v37 }
 0x157   : > { %7415 = vmatmul.mubr.bf16.gmra.mrb[84].mxu1 %v9330_v61  ;;  %3807 = vmatprep.subr.bf16.mxu0 %v9432_v58 }
 0x158   : > { %2870 = vmatmul.mubr.bf16.gmra.mrb[84].mxu0 %v2591_v27  ;;  %7418 = vmatprep.mubr.bf16.mxu1 %v9338_v34 }
 0x159   : > { %2877 = vmatprep.mubr.bf16.mxu0 %v2595_v21  ;;  %7447 = vmatpush3.bf16.msra.mxu1 %v8150_v35 }
 0x15a   : > { %7448 = vmatprep.subr.bf16.mxu1 %v8151_v48  ;;  %3808 = vmatpush1.bf16.msra.mxu0 %v8158_v23 }
 0x15b   : > { %3809 = vmatprep.subr.bf16.mxu0 %v9432_v58 }
 0x15d   : > { %7449 = vmatpush3.bf16.msra.mxu1 %v8151_v48 }
 0x15e   : > { %7450 = vmatprep.subr.bf16.mxu1 %v8152_v55 }
 0x15f   : > { %7419 = vmatmul.mubr.bf16.gmra.mrb[88].mxu1 %v9361_v22 }
 0x160   : > { %2878 = vmatmul.mubr.bf16.gmra.mrb[88].mxu0 %v2594_v33  ;;  %7422 = vmatprep.mubr.bf16.mxu1 %v9372_v4  ;;  %v8236_v33 = vld [vmem:[#allocation2 + $0x120] sm:$0xff] }
 0x161   : > { %2885 = vmatprep.mubr.bf16.mxu0 %v2598_v42  ;;  %7451 = vmatpush3.bf16.msra.mxu1 %v8152_v55 }
 0x162   : > { %7452 = vmatprep.subr.bf16.mxu1 %v8153_v30 }
 0x165   : > { %7453 = vmatpush3.bf16.msra.mxu1 %v8153_v30 }
 0x166   : > { %7454 = vmatprep.subr.bf16.mxu1 %v8154_v50 }
 0x167   : > { %7423 = vmatmul.mubr.bf16.gmra.mrb[92].mxu1 %v9442_v60 }
 0x168   : > { %2886 = vmatmul.mubr.bf16.gmra.mrb[92].mxu0 %v2597_v12  ;;  %7426 = vmatprep.mubr.bf16.mxu1 %v9444_v63 }
 0x169   : > { %2893 = vmatprep.mubr.bf16.mxu0 %v2601_v47  ;;  %7455 = vmatpush3.bf16.msra.mxu1 %v8154_v50 }
 0x16a   : > { %7456 = vmatprep.subr.bf16.mxu1 %v8155_v36 }
 0x16d   : > { %7457 = vmatpush3.bf16.msra.mxu1 %v8155_v36 }
 0x16e   : > { %5416 = vmatprep.subr.bf16.mxu1 %v9432_v58 }
 0x16f   : > { %7427 = vmatmul.mubr.bf16.gmra.mrb[0].mxu1 %v9448_v62 }
 0x170   : > { %2894 = vmatmul.mubr.bf16.gmra.mrb[96].mxu0 %v2600_v32  ;;  %7430 = vmatprep.mubr.bf16.mxu1 %v9450_v39 }
 0x171   : > { %2901 = vmatprep.mubr.bf16.mxu0 %v2604_v20 }
 0x177   : > { %7431 = vmatmul.mubr.bf16.gmra.mrb[4].mxu1 %v9455_v38 }
 0x178   : > { %2902 = vmatmul.mubr.bf16.gmra.mrb[100].mxu0 %v2603_v52  ;;  %7434 = vmatprep.mubr.bf16.mxu1 %v9459_v57 }
 0x179   : > { %2909 = vmatprep.mubr.bf16.mxu0 %v2607_v6 }
 0x17d   : > { %v6954_v13 = vpop.f32.mrb[0].mxu0 }
 0x17e   : > { %v6955_v53 = vpop.f32.mrb[1].mxu0 }
 0x17f   : > { %v9457_v26 = vadd.f32 %v6955_v53, %v6954_v13  ;;  %v6957_v0 = vpop.f32.mrb[2].mxu0  ;;  %7435 = vmatmul.mubr.bf16.gmra.mrb[8].mxu1 %v9466_v5 }
 0x180   : > { %v6958_v25 = vpop.f32.mrb[3].mxu0  ;;  %2910 = vmatmul.mubr.bf16.gmra.mrb[104].mxu0 %v2606_v7  ;;  %7438 = vmatprep.mubr.bf16.mxu1 %v9468_v3 }
 0x181   : > { %v9461_v46 = vadd.f32 %v6958_v25, %v6957_v0  ;;  %2917 = vmatprep.mubr.bf16.mxu0 %v8229_v11  ;;  %v8239_v0 = vld [vmem:[#allocation2 + $0x158] sm:$0xff] }
 0x185   : > { %v6960_v2 = vpop.f32.mrb[4].mxu0 }
 0x186   : > { %v6961_v18 = vpop.f32.mrb[5].mxu0 }
 0x187   : > { %v9472_v51 = vadd.f32 %v6961_v18, %v6960_v2  ;;  %v6963_v24 = vpop.f32.mrb[6].mxu0  ;;  %7439 = vmatmul.mubr.bf16.gmra.mrb[12].mxu1 %v9395_v54 }
 0x188   : > { %v6964_v43 = vpop.f32.mrb[7].mxu0  ;;  %2918 = vmatmul.mubr.bf16.gmra.mrb[108].mxu0 %v8230_v44  ;;  %7458 = vmatprep.mubr.bf16.mxu1 %v9299_v10  ;;  %v8234_v10 = vld [vmem:[#allocation2 + $0x108] sm:$0xff] }
 0x189   : > { %v9474_v40 = vadd.f32 %v6964_v43, %v6963_v24  ;;  %2925 = vmatprep.mubr.bf16.mxu0 %v8231_v56  ;;  %v8161_v24 = vld [vmem:[#allocation10 + $0x28] sm:$0xff]  }
 0x18d   : > { %v6966_v45 = vpop.f32.mrb[8].mxu0 }
 0x18e   : > { %v6967_v9 = vpop.f32.mrb[9].mxu0 }
 0x18f   : > { %v9479_v14 = vadd.f32 %v6967_v9, %v6966_v45  ;;  %v6969_v29 = vpop.f32.mrb[10].mxu0  ;;  %7459 = vmatmul.mubr.bf16.vlgmr.msra.gmra.mrb[80].mxu1 %v9308_v1  ;;  %v8159_v1 = vld [vmem:[#allocation10 + $0x18] sm:$0xff]   ;;  %v8240_v45 = vld [vmem:[#allocation2 + $0x150] sm:$0xff] }
 0x190   : > { %2926 = vmatmul.mubr.bf16.gmra.mrb[112].mxu0 %v8232_v49  ;;  %v6970_v59 = vpop.f32.mrb[11].mxu0  ;;  %7462 = vmatprep.mubr.bf16.mxu1 %v9330_v61 }
 0x191   : > { %2933 = vmatprep.mubr.bf16.mxu0 %v8233_v16  ;;  %v9483_v28 = vadd.f32 %v6970_v59, %v6969_v29  ;;  %3810 = vmatpush1.bf16.msra.mxu0 %v8159_v1 }
 0x192   : > { %3811 = vmatprep.subr.bf16.mxu0 %v9432_v58 }
 0x197   : > { %7463 = vmatmul.mubr.bf16.gmra.mrb[84].mxu1 %v9338_v34  ;;  %v8237_v34 = vld [vmem:[#allocation2 + $0x140] sm:$0xff] }
 0x198   : > { %2934 = vmatmul.mubr.bf16.gmra.mrb[116].mxu0 %v8234_v10  ;;  %7466 = vmatprep.mubr.bf16.mxu1 %v9361_v22  ;;  %v8160_v22 = vld [vmem:[#allocation10 + $0x20] sm:$0xff]  }
 0x199   : > { %2941 = vmatprep.mubr.bf16.mxu0 %v8235_v41  ;;  %3812 = vmatpush1.bf16.msra.mxu0 %v8160_v22 }
 0x19a   : > { %3813 = vmatprep.subr.bf16.mxu0 %v9432_v58 }
 0x19b   : > { %v6972_v35 = vpop.f32.mrb[12].mxu0 }
 0x19c   : > { %v6973_v27 = vpop.f32.mrb[13].mxu0 }
 0x19d   : > { %v9488_v21 = vadd.f32 %v6973_v27, %v6972_v35  ;;  %v6975_v48 = vpop.f32.mrb[14].mxu0  ;;  %3814 = vmatpush1.bf16.msra.mxu0 %v8161_v24 }
 0x19e   : > { %v6976_v61 = vpop.f32.mrb[15].mxu0  ;;  %3815 = vmatprep.subr.bf16.mxu0 %v9432_v58 }
 0x19f   : > { %v9491_v55 = vadd.f32 %v6976_v61, %v6975_v48  ;;  %7467 = vmatmul.mubr.bf16.gmra.mrb[88].mxu1 %v9372_v4  ;;  %v8162_v48 = vld [vmem:[#allocation10 + $0x30] sm:$0xff]  }
 0x1a0   : > { %2942 = vmatmul.mubr.bf16.gmra.mrb[120].mxu0 %v8236_v33  ;;  %7470 = vmatprep.mubr.bf16.mxu1 %v9442_v60  ;;  %v8238_v60 = vld [vmem:[#allocation2 + $0x138] sm:$0xff] }
 0x1a1   : > { %2949 = vmatprep.mubr.bf16.mxu0 %v8237_v34  ;;  %3816 = vmatpush1.bf16.msra.mxu0 %v8162_v48 }
 0x1a2   : > { %v7090_v42 = vpop.f32.mrb[16].mxu1  ;;  %3817 = vmatprep.subr.bf16.mxu0 %v9432_v58 }
 0x1a3   : > { %v6978_v30 = vpop.f32.mrb[16].mxu0  ;;  %v7091_v50 = vpop.f32.mrb[17].mxu1 }
 0x1a4   : > { %v6979_v12 = vpop.f32.mrb[17].mxu0  ;;  %v9496_v47 = vadd.f32 %v7091_v50, %v7090_v42  ;;  %v7093_v36 = vpop.f32.mrb[18].mxu1 }
 0x1a5   : > { %v9498_v32 = vadd.f32 %v6979_v12, %v6978_v30  ;;  %v6981_v20 = vpop.f32.mrb[18].mxu0  ;;  %v7094_v13 = vpop.f32.mrb[19].mxu1 }
 0x1a6   : > { %v6982_v4 = vpop.f32.mrb[19].mxu0  ;;  %v9500_v53 = vadd.f32 %v7094_v13, %v7093_v36 }
 0x1a7   : > { %v9502_v52 = vadd.f32 %v6982_v4, %v6981_v20  ;;  %7471 = vmatmul.mubr.bf16.gmra.mrb[92].mxu1 %v9444_v63  ;;  %v2634_v20 = vld [vmem:[#allocation2 + $0x1a0] sm:$0xff] }
 0x1a8   : > { %2950 = vmatmul.mubr.bf16.gmra.mrb[124].mxu0 %v8238_v60  ;;  %7474 = vmatprep.mubr.bf16.mxu1 %v9448_v62  ;;  %v8241_v62 = vld [vmem:[#allocation2 + $0x170] sm:$0xff] }
 0x1a9   : > { %2957 = vmatprep.mubr.bf16.mxu0 %v8239_v0 }
 0x1aa   : > { %v7096_v6 = vpop.f32.mrb[20].mxu1 }
 0x1ab   : > { %v6984_v25 = vpop.f32.mrb[20].mxu0  ;;  %v7097_v17 = vpop.f32.mrb[21].mxu1 }
 0x1ac   : > { %v6985_v7 = vpop.f32.mrb[21].mxu0  ;;  %v9506_v2 = vadd.f32 %v7097_v17, %v7096_v6  ;;  %v7099_v11 = vpop.f32.mrb[22].mxu1 }
 0x1ad   : > { %v9508_v18 = vadd.f32 %v6985_v7, %v6984_v25  ;;  %v6987_v37 = vpop.f32.mrb[22].mxu0  ;;  %v7100_v43 = vpop.f32.mrb[23].mxu1  ;;  %v2633_v7 = vld [vmem:[#allocation2 + $0x198] sm:$0xff] }
 0x1ae   : > { %v6988_v44 = vpop.f32.mrb[23].mxu0  ;;  %v9510_v56 = vadd.f32 %v7100_v43, %v7099_v11  ;;  %v2635_v11 = vld [vmem:[#allocation2 + $0x1a8] sm:$0xff] }
 0x1af   : > { %v9512_v63 = vadd.f32 %v6988_v44, %v6987_v37  ;;  %7475 = vmatmul.mubr.bf16.gmra.mrb[0].mxu1 %v9450_v39 }
 0x1b0   : > { %2958 = vmatmul.mubr.bf16.gmra.mrb[128].mxu0 %v8240_v45  ;;  %7478 = vmatprep.mubr.bf16.mxu1 %v9455_v38  ;;  %v8242_v38 = vld [vmem:[#allocation2 + $0x168] sm:$0xff] }
 0x1b1   : > { %2965 = vmatprep.mubr.bf16.mxu0 %v8241_v62 }
 0x1b2   : > { %v7102_v9 = vpop.f32.mrb[24].mxu1 }
 0x1b3   : > { %v6990_v29 = vpop.f32.mrb[24].mxu0  ;;  %v7103_v23 = vpop.f32.mrb[25].mxu1 }
 0x1b4   : > { %v6991_v49 = vpop.f32.mrb[25].mxu0  ;;  %v9517_v59 = vadd.f32 %v7103_v23, %v7102_v9  ;;  %v7105_v16 = vpop.f32.mrb[26].mxu1 }
 0x1b5   : > { %v9519_v10 = vadd.f32 %v6991_v49, %v6990_v29  ;;  %v6993_v41 = vpop.f32.mrb[26].mxu0  ;;  %v7106_v35 = vpop.f32.mrb[27].mxu1 }
 0x1b6   : > { %v6994_v1 = vpop.f32.mrb[27].mxu0  ;;  %v9521_v27 = vadd.f32 %v7106_v35, %v7105_v16 }
 0x1b7   : > { %v9523_v39 = vadd.f32 %v6994_v1, %v6993_v41  ;;  %7479 = vmatmul.mubr.bf16.gmra.mrb[4].mxu1 %v9459_v57  ;;  %v8164_v41 = vld [vmem:[#allocation10 + $0x40] sm:$0xff]  }
 0x1b8   : > { %2966 = vmatmul.mubr.bf16.gmra.mrb[132].mxu0 %v8242_v38  ;;  %7482 = vmatprep.mubr.bf16.mxu1 %v9466_v5  ;;  %v8163_v5 = vld [vmem:[#allocation10 + $0x38] sm:$0xff]  }
 0x1b9   : > { %2973 = vmatprep.mubr.bf16.mxu0 %v9324_v31  ;;  %3818 = vmatpush1.bf16.msra.mxu0 %v8163_v5 }
 0x1ba   : > { %v7108_v61 = vpop.f32.mrb[28].mxu1  ;;  %3819 = vmatprep.subr.bf16.mxu0 %v9432_v58 }
 0x1bb   : > { %v6996_v33 = vpop.f32.mrb[28].mxu0  ;;  %v7109_v34 = vpop.f32.mrb[29].mxu1 }
 0x1bc   : > { %v6997_v22 = vpop.f32.mrb[29].mxu0  ;;  %v9529_v42 = vadd.f32 %v7109_v34, %v7108_v61  ;;  %v7111_v30 = vpop.f32.mrb[30].mxu1 }
 0x1bd   : > { %v9531_v50 = vadd.f32 %v6997_v22, %v6996_v33  ;;  %v6999_v12 = vpop.f32.mrb[30].mxu0  ;;  %v7112_v36 = vpop.f32.mrb[31].mxu1  ;;  %3820 = vmatpush1.bf16.msra.mxu0 %v8164_v41  ;;  %v9574_v41 = vld [vmem:[%s10919_s4] ss:$0 sm:$0xff] }
 0x1be   : > { %v7000_v57 = vpop.f32.mrb[31].mxu0  ;;  %v9533_v13 = vadd.f32 %v7112_v36, %v7111_v30  ;;  %3821 = vmatprep.subr.bf16.mxu0 %v9432_v58 }
 0x1bf   : > { %v9535_v31 = vadd.f32 %v7000_v57, %v6999_v12  ;;  %7483 = vmatmul.mubr.bf16.gmra.mrb[8].mxu1 %v9468_v3 }
 0x1c0   : > { %2974 = vmatmul.mubr.bf16.gmra.mrb[136].mxu0 %v9377_v8  ;;  %7486 = vmatprep.mubr.bf16.mxu1 %v9395_v54 }
 0x1c1   : > { %2981 = vmatprep.mubr.bf16.mxu0 %v2634_v20 }
 0x1c2   : > { %v7114_v4 = vpop.f32.mrb[32].mxu1 }
 0x1c3   : > { %v7002_v60 = vpop.f32.mrb[32].mxu0  ;;  %v7115_v0 = vpop.f32.mrb[33].mxu1 }
 0x1c4   : > { %v7003_v6 = vpop.f32.mrb[33].mxu0  ;;  %v9541_v25 = vadd.f32 %v7115_v0, %v7114_v4  ;;  %v7117_v17 = vpop.f32.mrb[34].mxu1  ;;  %v8165_v0 = vld [vmem:[#allocation10 + $0x48] sm:$0xff]  }
 0x1c5   : > { %v7004_v37 = vadd.f32 %v7003_v6, %v7002_v60  ;;  %v7005_v24 = vpop.f32.mrb[34].mxu0  ;;  %v7118_v8 = vpop.f32.mrb[35].mxu1  ;;  %3822 = vmatpush1.bf16.msra.mxu0 %v8165_v0 }
 0x1c6   : > { %v7006_v43 = vpop.f32.mrb[35].mxu0  ;;  %v9543_v3 = vadd.f32 %v7118_v8, %v7117_v17  ;;  %3823 = vmatprep.subr.bf16.mxu0 %v9432_v58 }
 0x1c7   : > { %v7007_v44 = vadd.f32 %v7006_v43, %v7005_v24  ;;  %7487 = vmatmul.mubr.bf16.gmra.mrb[12].mxu1 %v2635_v11 }
 0x1c8   : > { %2982 = vmatmul.mubr.bf16.gmra.mrb[140].mxu0 %v2633_v7 }
 0x1ca   : > { %v7120_v54 = vpop.f32.mrb[36].mxu1 }
 0x1cb   : > { %v7008_v45 = vpop.f32.mrb[36].mxu0  ;;  %v7121_v62 = vpop.f32.mrb[37].mxu1 }
 0x1cc   : > { %v7009_v9 = vpop.f32.mrb[37].mxu0  ;;  %v9545_v29 = vadd.f32 %v7121_v62, %v7120_v54  ;;  %v7123_v23 = vpop.f32.mrb[38].mxu1 }
 0x1cd   : > { %v9547_v49 = vadd.f32 %v7009_v9, %v7008_v45  ;;  %v7011_v16 = vpop.f32.mrb[38].mxu0  ;;  %v7124_v35 = vpop.f32.mrb[39].mxu1 }
 0x1ce   : > { %v7012_v1 = vpop.f32.mrb[39].mxu0  ;;  %v9549_v48 = vadd.f32 %v7124_v35, %v7123_v23  ;;  %v1673_v35 = vadd.f32 %v7004_v37, %v9574_v41  ;;  %v702_v37 = vld [vmem:[#allocation3 + $0x28] sm:$0x1] }
 0x1cf   : > { %v9551_v38 = vadd.f32 %v7012_v1, %v7011_v16  ;;  %v8166_v16 = vld [vmem:[#allocation10 + $0x50] sm:$0xff]  }
 0x1d0   : > { %3824 = vmatpush1.bf16.msra.mxu0 %v8166_v16 }
 0x1d1   : > { %3825 = vmatprep.subr.bf16.mxu0 %v9432_v58 }
 0x1d2   : > { %v7126_v61 = vpop.f32.mrb[40].mxu1 }
 0x1d3   : > { %v7014_v33 = vpop.f32.mrb[40].mxu0  ;;  %v7127_v34 = vpop.f32.mrb[41].mxu1 }
 0x1d4   : > { %v7015_v22 = vpop.f32.mrb[41].mxu0  ;;  %v9554_v30 = vadd.f32 %v7127_v34, %v7126_v61  ;;  %v7129_v12 = vpop.f32.mrb[42].mxu1 }
 0x1d5   : > { %v9556_v36 = vadd.f32 %v7015_v22, %v7014_v33  ;;  %v7017_v20 = vpop.f32.mrb[42].mxu0  ;;  %v7130_v57 = vpop.f32.mrb[43].mxu1  ;;  %v1676_v22 = vadd.f32 %v7007_v44, %v9574_v41 }
 0x1d6   : > { %v7018_v5 = vpop.f32.mrb[43].mxu0  ;;  %v9558_v4 = vadd.f32 %v7130_v57, %v7129_v12 }
 0x1d7   : > { %v9560_v60 = vadd.f32 %v7018_v5, %v7017_v20 }
 0x1d8   : > { %10954 = vst [vmem:[#allocation19_spill] sm:$0xff] %v9558_v4 }
 0x1da   : > { %v7132_v6 = vpop.f32.mrb[44].mxu1 }
 0x1db   : > { %v7020_v17 = vpop.f32.mrb[44].mxu0  ;;  %v7133_v7 = vpop.f32.mrb[45].mxu1 }
 0x1dc   : > { %v7021_v11 = vpop.f32.mrb[45].mxu0  ;;  %v9563_v24 = vadd.f32 %v7133_v7, %v7132_v6  ;;  %v7135_v8 = vpop.f32.mrb[46].mxu1 }
 0x1dd   : > { %v9565_v43 = vadd.f32 %v7021_v11, %v7020_v17  ;;  %v7023_v54 = vpop.f32.mrb[46].mxu0  ;;  %v7136_v45 = vpop.f32.mrb[47].mxu1 }
 0x1de   : > { %v7024_v62 = vpop.f32.mrb[47].mxu0  ;;  %v9567_v9 = vadd.f32 %v7136_v45, %v7135_v8  ;;  %v699_v8 = vld [vmem:[#allocation3 + $0x20] sm:$0x1] }
 0x1df   : > { %v9569_v23 = vadd.f32 %v7024_v62, %v7023_v54  ;;  %v809_v54 = vld [vmem:[#allocation3 + $0x20] sm:$0x80]  ;;  %v700_v45 = vsel %vm8728_vm3, 0, %v699_v8  ;;  %v812_v62 = vld [vmem:[#allocation3 + $0x28] sm:$0x80] }
 0x1e0   : > { %v810_v44 = vsel %vm8737_vm6, 0, %v809_v54  ;;  %701 = vst [vmem:[#allocation3 + $0x20] sm:$0x1] %v700_v45 }
 0x1e1   : > { %811 = vst [vmem:[#allocation3 + $0x20] sm:$0x80] %v810_v44 }
 0x1e2   : > { %v7138_v1 = vpop.f32.mrb[48].mxu1 }
 0x1e3   : > { %v7026_v61 = vpop.f32.mrb[48].mxu0  ;;  %v7139_v33 = vpop.f32.mrb[49].mxu1 }
 0x1e4   : > { %v7027_v34 = vpop.f32.mrb[49].mxu0  ;;  %v7140_v12 = vadd.f32 %v7139_v33, %v7138_v1  ;;  %v7141_v20 = vpop.f32.mrb[50].mxu1  ;;  %v693_v1 = vld [vmem:[#allocation3 + $0x10] sm:$0x1]  ;;  %v703_v33 = vsel %vm9592_vm14, 0, %v702_v37 }
 0x1e5   : > { %v9579_v57 = vadd.f32 %v7027_v34, %v7026_v61  ;;  %v7029_v5 = vpop.f32.mrb[50].mxu0  ;;  %v7142_v0 = vpop.f32.mrb[51].mxu1  ;;  %v696_v61 = vld [vmem:[#allocation3 + $0x18] sm:$0x1]  ;;  %704 = vst [vmem:[#allocation3 + $0x28] sm:$0x1] %v703_v33 }
 0x1e6   : > { %v7030_v6 = vpop.f32.mrb[51].mxu0  ;;  %v9581_v17 = vadd.f32 %v7140_v12, %v1673_v35  ;;  %v7143_v7 = vadd.f32 %v7142_v0, %v7141_v20  ;;  %v697_v12 = vsel %vm9592_vm14, 0, %v696_v61  ;;  %v803_v20 = vld [vmem:[#allocation3 + $0x10] sm:$0x80]  ;;  %v806_v37 = vld [vmem:[#allocation3 + $0x18] sm:$0x80] }
 0x1e7   : > { %v9583_v11 = vadd.f32 %v7030_v6, %v7029_v5  ;;  %v1681_v5 = vadd.f32 %v9547_v49, %v9574_v41  ;;  %698 = vst [vmem:[#allocation3 + $0x18] sm:$0x1] %v697_v12  ;;  %v804_v8 = vsel %vm8737_vm6, 0, %v803_v20  ;;  %v807_v44 = vsel %vm9599_vm15, 0, %v806_v37  ;;  %v690_v49 = vld [vmem:[#allocation3 + $0x8] sm:$0x1] }
 0x1e8   : > { %10955 = vst [vmem:[#allocation20_spill] sm:$0xff] %v9581_v17  ;;  %v9589_v16 = vadd.f32 %v7143_v7, %v1676_v22  ;;  %v694_v22 = vsel %vm8728_vm3, 0, %v693_v1  ;;  %v813_v7 = vsel %vm9599_vm15, 0, %v812_v62  ;;  %805 = vst [vmem:[#allocation3 + $0x10] sm:$0x80] %v804_v8  ;;  %v1684_v1 = vadd.f32 %v9551_v38, %v9574_v41  ;;  %v8167_v8 = vld [vmem:[#allocation10 + $0x58] sm:$0xff]  }
 0x1e9   : > { %695 = vst [vmem:[#allocation3 + $0x10] sm:$0x1] %v694_v22  ;;  %814 = vst [vmem:[#allocation3 + $0x28] sm:$0x80] %v813_v7  ;;  %v691_v12 = vsel %vm9592_vm14, 0, %v690_v49  ;;  %3826 = vmatpush1.bf16.msra.mxu0 %v8167_v8  ;;  %v8192_v35 = vld [vmem:[#allocation11] sm:$0xff]  }
 0x1ea   : > { %10956 = vst [vmem:[#allocation21_spill] sm:$0xff] %v9589_v16  ;;  %v7144_v0 = vpop.f32.mrb[52].mxu1  ;;  %808 = vst [vmem:[#allocation3 + $0x18] sm:$0x80] %v807_v44  ;;  %v800_v20 = vld [vmem:[#allocation3 + $0x8] sm:$0x80]  ;;  %4173 = vmatprep.subr.bf16.mxu0 %v9432_v58  ;;  %5417 = vmatpush1.bf16.msra.mxu1 %v8192_v35 }
 0x1eb   : > { %v7032_v6 = vpop.f32.mrb[52].mxu0  ;;  %v7145_v54 = vpop.f32.mrb[53].mxu1  ;;  %692 = vst [vmem:[#allocation3 + $0x8] sm:$0x1] %v691_v12  ;;  %v801_v37 = vsel %vm9599_vm15, 0, %v800_v20  ;;  %v1689_v20 = vadd.f32 %v9556_v36, %v9574_v41  ;;  %v8193_v34 = vld [vmem:[#allocation11 + $0x8] sm:$0xff]  }
 0x1ec   : > { %v7033_v45 = vpop.f32.mrb[53].mxu0  ;;  %v7146_v61 = vadd.f32 %v7145_v54, %v7144_v0  ;;  %v7147_v33 = vpop.f32.mrb[54].mxu1  ;;  %v685_v17 = vld [vmem:[#allocation3] sm:$0x1]  ;;  %802 = vst [vmem:[#allocation3 + $0x8] sm:$0x80] %v801_v37 }
 0x1ed   : > { %v9617_v62 = vadd.f32 %v7033_v45, %v7032_v6  ;;  %v7035_v22 = vpop.f32.mrb[54].mxu0  ;;  %v7148_v16 = vpop.f32.mrb[55].mxu1  ;;  %v711_v6 = vld [vmem:[#allocation3 + $0x40] sm:$0x1]  ;;  %v714_v54 = vld [vmem:[#allocation3 + $0x48] sm:$0x1] }
 0x1ee   : > { %v7036_v7 = vpop.f32.mrb[55].mxu0  ;;  %v9623_v4 = vadd.f32 %v7146_v61, %v1681_v5  ;;  %v7149_v38 = vadd.f32 %v7148_v16, %v7147_v33  ;;  %v686_v45 = vsel %vm8728_vm3, 0, %v685_v17  ;;  %v795_v44 = vld [vmem:[#allocation3] sm:$0x80]  ;;  %v712_v12 = vsel %vm8728_vm3, 0, %v711_v6 }
 0x1ef   : > { %v9625_v0 = vadd.f32 %v7036_v7, %v7035_v22  ;;  %v715_v5 = vsel %vm9592_vm14, 0, %v714_v54  ;;  %v821_v61 = vld [vmem:[#allocation3 + $0x40] sm:$0x80]  ;;  %v824_v16 = vld [vmem:[#allocation3 + $0x48] sm:$0x80] }
 0x1f0   : > { %10961 = vst [vmem:[#allocation22_spill] sm:$0xff] %v9623_v4  ;;  %v9629_v49 = vadd.f32 %v7149_v38, %v1684_v1  ;;  %687 = vst [vmem:[#allocation3] sm:$0x1] %v686_v45  ;;  %v822_v33 = vsel %vm8737_vm6, 0, %v821_v61  ;;  %v825_v17 = vsel %vm9599_vm15, 0, %v824_v16  ;;  %v1692_v38 = vadd.f32 %v9560_v60, %v9574_v41 }
 0x1f1   : > { %713 = vst [vmem:[#allocation3 + $0x40] sm:$0x1] %v712_v12  ;;  %716 = vst [vmem:[#allocation3 + $0x48] sm:$0x1] %v715_v5  ;;  %v705_v1 = vld [vmem:[#allocation3 + $0x30] sm:$0x1] }
 0x1f2   : > { %10962 = vst [vmem:[#allocation23_spill] sm:$0xff] %v9629_v49  ;;  %v708_v22 = vld [vmem:[#allocation3 + $0x38] sm:$0x1]  ;;  %v7150_v7 = vpop.f32.mrb[56].mxu1  ;;  %823 = vst [vmem:[#allocation3 + $0x40] sm:$0x80] %v822_v33 }
 0x1f3   : > { %v7038_v8 = vpop.f32.mrb[56].mxu0  ;;  %826 = vst [vmem:[#allocation3 + $0x48] sm:$0x80] %v825_v17  ;;  %v706_v37 = vsel %vm8728_vm3, 0, %v705_v1  ;;  %v7151_v6 = vpop.f32.mrb[57].mxu1  ;;  %v709_v45 = vsel %vm9592_vm14, 0, %v708_v22 }
 0x1f4   : > { %v7039_v54 = vpop.f32.mrb[57].mxu0  ;;  %707 = vst [vmem:[#allocation3 + $0x30] sm:$0x1] %v706_v37  ;;  %v815_v12 = vld [vmem:[#allocation3 + $0x30] sm:$0x80]  ;;  %v7152_v5 = vadd.f32 %v7151_v6, %v7150_v7  ;;  %v7153_v61 = vpop.f32.mrb[58].mxu1 }
 0x1f5   : > { %v9648_v36 = vadd.f32 %v7039_v54, %v7038_v8  ;;  %v7041_v16 = vpop.f32.mrb[58].mxu0  ;;  %710 = vst [vmem:[#allocation3 + $0x38] sm:$0x1] %v709_v45  ;;  %v816_v33 = vsel %vm8737_vm6, 0, %v815_v12  ;;  %v818_v17 = vld [vmem:[#allocation3 + $0x38] sm:$0x80] }
 0x1f6   : > { %v796_v60 = vsel %vm8737_vm6, 0, %v795_v44  ;;  %v7154_v1 = vpop.f32.mrb[59].mxu1  ;;  %v7042_v49 = vpop.f32.mrb[59].mxu0  ;;  %817 = vst [vmem:[#allocation3 + $0x30] sm:$0x80] %v816_v33  ;;  %v819_v22 = vsel %vm9599_vm15, 0, %v818_v17  ;;  %v9656_v7 = vadd.f32 %v7152_v5, %v1689_v20 }
 0x1f7   : > { %v3621_v37 = vld [vmem:[#allocation3 + $0x8] sm:$0xff]  ;;  %797 = vst [vmem:[#allocation3] sm:$0x80] %v796_v60  ;;  %v7155_v8 = vadd.f32 %v7154_v1, %v7153_v61  ;;  %v9658_v6 = vadd.f32 %v7042_v49, %v7041_v16  ;;  %820 = vst [vmem:[#allocation3 + $0x38] sm:$0x80] %v819_v22  ;;  %v1697_v49 = vadd.f32 %v9565_v43, %v9574_v41 }
 0x1f8   : > { %10963 = vst [vmem:[#allocation24_spill] sm:$0xff] %v9656_v7  ;;  %6774 = vmatprep.mubr.msk.bf16.mxu0 %vm680_vm0, %v3621_v37  ;;  %v723_v45 = vld [vmem:[#allocation3 + $0x60] sm:$0x1]  ;;  %v726_v44 = vld [vmem:[#allocation3 + $0x68] sm:$0x1] }
 0x1f9   : > { %v9661_v54 = vadd.f32 %v7155_v8, %v1692_v38  ;;  %v833_v12 = vld [vmem:[#allocation3 + $0x60] sm:$0x80]  ;;  %v724_v33 = vsel %vm8728_vm3, 0, %v723_v45  ;;  %v727_v17 = vsel %vm9592_vm14, 0, %v726_v44  ;;  %v836_v38 = vld [vmem:[#allocation3 + $0x68] sm:$0x80]  ;;  %v1700_v45 = vadd.f32 %v9569_v23, %v9574_v41 }
 0x1fa   : > { %v834_v20 = vsel %vm8737_vm6, 0, %v833_v12  ;;  %v7156_v5 = vpop.f32.mrb[60].mxu1  ;;  %725 = vst [vmem:[#allocation3 + $0x60] sm:$0x1] %v724_v33  ;;  %728 = vst [vmem:[#allocation3 + $0x68] sm:$0x1] %v727_v17 }
 0x1fb   : > { %10964 = vst [vmem:[#allocation25_spill] sm:$0xff] %v9661_v54  ;;  %v7044_v61 = vpop.f32.mrb[60].mxu0  ;;  %835 = vst [vmem:[#allocation3 + $0x60] sm:$0x80] %v834_v20  ;;  %v717_v16 = vld [vmem:[#allocation3 + $0x50] sm:$0x1] }
 0x1fc   : > { %v7157_v60 = vpop.f32.mrb[61].mxu1  ;;  %v7045_v1 = vpop.f32.mrb[61].mxu0  ;;  %v837_v22 = vsel %vm9599_vm15, 0, %v836_v38  ;;  %v718_v37 = vsel %vm8728_vm3, 0, %v717_v16  ;;  %v720_v8 = vld [vmem:[#allocation3 + $0x58] sm:$0x1] }
 0x1fd   : > { %v7158_v43 = vadd.f32 %v7157_v60, %v7156_v5  ;;  %v7159_v44 = vpop.f32.mrb[62].mxu1  ;;  %v7046_v12 = vadd.f32 %v7045_v1, %v7044_v61  ;;  %v7047_v33 = vpop.f32.mrb[62].mxu0  ;;  %838 = vst [vmem:[#allocation3 + $0x68] sm:$0x80] %v837_v22  ;;  %719 = vst [vmem:[#allocation3 + $0x50] sm:$0x1] %v718_v37 }
 0x1fe   : > { %v3620_v17 = vld [vmem:[#allocation3] sm:$0xff]  ;;  %v721_v20 = vsel %vm9592_vm14, 0, %v720_v8  ;;  %v7160_v54 = vpop.f32.mrb[63].mxu1  ;;  %v7048_v7 = vpop.f32.mrb[63].mxu0  ;;  %v827_v38 = vld [vmem:[#allocation3 + $0x50] sm:$0x80] }
 0x1ff   : > { %3836 = vmatmul.mubr.bf16.vlgmr.msra.gmra.mrb[144].mxu0 %v3620_v17  ;;  %722 = vst [vmem:[#allocation3 + $0x58] sm:$0x1] %v721_v20  ;;  %v9679_v16 = vadd.f32 %v7158_v43, %v1697_v49  ;;  %v7161_v4 = vadd.f32 %v7160_v54, %v7159_v44  ;;  %v9682_v23 = vadd.f32 %v7046_v12, %v9574_v41  ;;  %v830_v61 = vld [vmem:[#allocation3 + $0x58] sm:$0x80]  ;;  %v828_v60 = vsel %vm8737_vm6, 0, %v827_v38 }
 0x200   : > { %v7049_v5 = vadd.f32 %v7048_v7, %v7047_v33  ;;  %v831_v1 = vsel %vm9599_vm15, 0, %v830_v61  ;;  %829 = vst [vmem:[#allocation3 + $0x50] sm:$0x80] %v828_v60  ;;  %v1617_v54 = vadd.f32 %v9472_v51, %v9574_v41  ;;  %v735_v49 = vld [vmem:[#allocation3 + $0x80] sm:$0x1]  ;;  %v1705_v7 = vadd.f32 %v9579_v57, %v9574_v41 }
 0x201   : > { %v9688_v22 = vadd.f32 %v7161_v4, %v1700_v45  ;;  %832 = vst [vmem:[#allocation3 + $0x58] sm:$0x80] %v831_v1  ;;  %v738_v8 = vld [vmem:[#allocation3 + $0x88] sm:$0x1]  ;;  %v1609_v12 = vadd.f32 %v9457_v26, %v9574_v41  ;;  %v736_v4 = vsel %vm8728_vm3, 0, %v735_v49  ;;  %v1620_v38 = vadd.f32 %v9474_v40, %v9574_v41 }
 0x202   : > { %v9691_v37 = vadd.f32 %v7049_v5, %v9574_v41  ;;  %v7162_v44 = vpop.f32.mrb[64].mxu1  ;;  %v739_v45 = vsel %vm9592_vm14, 0, %v738_v8  ;;  %v845_v33 = vld [vmem:[#allocation3 + $0x80] sm:$0x80]  ;;  %v1612_v57 = vadd.f32 %v9461_v46, %v9574_v41  ;;  %737 = vst [vmem:[#allocation3 + $0x80] sm:$0x1] %v736_v4  ;;  %v1708_v61 = vadd.f32 %v9583_v11, %v9574_v41 }
 0x203   : > { %v7364_v43 = vpop.f32.mrb[64].mxu0  ;;  %v7163_v51 = vpop.f32.mrb[65].mxu1  ;;  %740 = vst [vmem:[#allocation3 + $0x88] sm:$0x1] %v739_v45  ;;  %v846_v26 = vsel %vm8737_vm6, 0, %v845_v33 }
 0x204   : > { %v1778_v17 = vadd.f32 %v7364_v43, %v1617_v54  ;;  %v1769_v20 = vpop.f32.mrb[65].mxu0  ;;  %v848_v5 = vld [vmem:[#allocation3 + $0x88] sm:$0x80]  ;;  %v7164_v1 = vadd.f32 %v7163_v51, %v7162_v44  ;;  %v7165_v49 = vpop.f32.mrb[66].mxu1  ;;  %847 = vst [vmem:[#allocation3 + $0x80] sm:$0x80] %v846_v26 }
 0x205   : > { %v1770_v60 = vadd.f32 %v1769_v20, %v1609_v12  ;;  %v7365_v54 = vpop.f32.mrb[66].mxu0  ;;  %v849_v40 = vsel %vm9599_vm15, 0, %v848_v5  ;;  %v729_v8 = vld [vmem:[#allocation3 + $0x70] sm:$0x1]  ;;  %v7166_v45 = vpop.f32.mrb[67].mxu1  ;;  %v8168_v26 = vld [vmem:[#allocation10 + $0x60] sm:$0xff]  }
 0x206   : > { %v9714_v46 = vadd.f32 %v9506_v2, %v1778_v17  ;;  %v1781_v43 = vadd.f32 %v7365_v54, %v1620_v38  ;;  %v1772_v4 = vpop.f32.mrb[67].mxu0  ;;  %850 = vst [vmem:[#allocation3 + $0x88] sm:$0x80] %v849_v40  ;;  %v730_v33 = vsel %vm8728_vm3, 0, %v729_v8  ;;  %v732_v11 = vld [vmem:[#allocation3 + $0x78] sm:$0x1]  ;;  %v9721_v12 = vadd.f32 %v7164_v1, %v1705_v7  ;;  %4174 = vmatpush1.bf16.msra.mxu0 %v8168_v26 }
 0x207   : > { %v9719_v44 = vadd.f32 %v9496_v47, %v1770_v60  ;;  %v1773_v20 = vadd.f32 %v1772_v4, %v1612_v57  ;;  %v7167_v51 = vadd.f32 %v7166_v45, %v7165_v49  ;;  %731 = vst [vmem:[#allocation3 + $0x70] sm:$0x1] %v730_v33  ;;  %v839_v5 = vld [vmem:[#allocation3 + $0x70] sm:$0x80]  ;;  %v842_v2 = vld [vmem:[#allocation3 + $0x78] sm:$0x80]  ;;  %v1625_v60 = vadd.f32 %v9479_v14, %v9574_v41 }
 0x208   : > { %v9724_v17 = vadd.f32 %v9510_v56, %v1781_v43  ;;  %v733_v38 = vsel %vm9592_vm14, 0, %v732_v11  ;;  %v840_v54 = vsel %vm8737_vm6, 0, %v839_v5  ;;  %v843_v47 = vsel %vm9599_vm15, 0, %v842_v2  ;;  %4175 = vmatprep.subr.bf16.mxu0 %v9432_v58  ;;  %v747_v1 = vld [vmem:[#allocation3 + $0xa0] sm:$0x1] }
 0x209   : > { %v9733_v7 = vadd.f32 %v9500_v53, %v1773_v20  ;;  %v9735_v57 = vadd.f32 %v7167_v51, %v1708_v61  ;;  %734 = vst [vmem:[#allocation3 + $0x78] sm:$0x1] %v733_v38  ;;  %841 = vst [vmem:[#allocation3 + $0x70] sm:$0x80] %v840_v54  ;;  %v1633_v56 = vadd.f32 %v9488_v21, %v9574_v41  ;;  %v750_v49 = vld [vmem:[#allocation3 + $0xa8] sm:$0x1] }
 0x20a   : > { %844 = vst [vmem:[#allocation3 + $0x78] sm:$0x80] %v843_v47  ;;  %v857_v40 = vld [vmem:[#allocation3 + $0xa0] sm:$0x80]  ;;  %v1713_v53 = vadd.f32 %v9617_v62, %v9574_v41  ;;  %v7168_v8 = vpop.f32.mrb[68].mxu1  ;;  %v748_v43 = vsel %vm8728_vm3, 0, %v747_v1  ;;  %v1636_v33 = vadd.f32 %v9491_v55, %v9574_v41  ;;  %v1628_v62 = vadd.f32 %v9483_v28, %v9574_v41 }
 0x20b   : > { %v7368_v61 = vpop.f32.mrb[68].mxu0  ;;  %v751_v4 = vsel %vm9592_vm14, 0, %v750_v49  ;;  %v858_v21 = vsel %vm8737_vm6, 0, %v857_v40  ;;  %v7169_v58 = vpop.f32.mrb[69].mxu1  ;;  %749 = vst [vmem:[#allocation3 + $0xa0] sm:$0x1] %v748_v43  ;;  %v1716_v20 = vadd.f32 %v9625_v0, %v9574_v41 }
 0x20c   : > { %v1794_v14 = vadd.f32 %v7368_v61, %v1633_v56  ;;  %v1785_v45 = vpop.f32.mrb[69].mxu0  ;;  %752 = vst [vmem:[#allocation3 + $0xa8] sm:$0x1] %v751_v4  ;;  %859 = vst [vmem:[#allocation3 + $0xa0] sm:$0x80] %v858_v21  ;;  %v7170_v26 = vadd.f32 %v7169_v58, %v7168_v8  ;;  %v7171_v2 = vpop.f32.mrb[70].mxu1  ;;  %v1649_v58 = vadd.f32 %v9508_v18, %v9574_v41 }
 0x20d   : > { %v860_v11 = vld [vmem:[#allocation3 + $0xa8] sm:$0x80]  ;;  %v1786_v51 = vadd.f32 %v1785_v45, %v1625_v60  ;;  %v7369_v5 = vpop.f32.mrb[70].mxu0  ;;  %v741_v54 = vld [vmem:[#allocation3 + $0x90] sm:$0x1]  ;;  %v7172_v56 = vpop.f32.mrb[71].mxu1 }
 0x20e   : > { %v861_v38 = vsel %vm9599_vm15, 0, %v860_v11  ;;  %v9759_v55 = vadd.f32 %v9529_v42, %v1794_v14  ;;  %v1797_v47 = vadd.f32 %v7369_v5, %v1636_v33  ;;  %v1788_v28 = vpop.f32.mrb[71].mxu0  ;;  %v8169_v1 = vld [vmem:[#allocation10 + $0x68] sm:$0xff]   ;;  %v742_v49 = vsel %vm8728_vm3, 0, %v741_v54  ;;  %v744_v0 = vld [vmem:[#allocation3 + $0x98] sm:$0x1] }
 0x20f   : > { %862 = vst [vmem:[#allocation3 + $0xa8] sm:$0x80] %v861_v38  ;;  %v9764_v60 = vadd.f32 %v9517_v59, %v1786_v51  ;;  %v9766_v40 = vadd.f32 %v7170_v26, %v1713_v53  ;;  %v1789_v61 = vadd.f32 %v1788_v28, %v1628_v62  ;;  %v7173_v8 = vadd.f32 %v7172_v56, %v7171_v2  ;;  %v851_v43 = vld [vmem:[#allocation3 + $0x90] sm:$0x80]  ;;  %v854_v42 = vld [vmem:[#allocation3 + $0x98] sm:$0x80] }
 0x210   : > { %743 = vst [vmem:[#allocation3 + $0x90] sm:$0x1] %v742_v49  ;;  %v9769_v4 = vadd.f32 %v9533_v13, %v1797_v47  ;;  %4176 = vmatpush1.bf16.msra.mxu0 %v8169_v1  ;;  %v745_v21 = vsel %vm9592_vm14, 0, %v744_v0  ;;  %v852_v14 = vsel %vm8737_vm6, 0, %v851_v43  ;;  %v855_v59 = vsel %vm9599_vm15, 0, %v854_v42  ;;  %v9782_v13 = vld [vmem:[#allocation3 + $0x110] sm:$0xff] }
 0x211   : > { %v9778_v53 = vadd.f32 %v9521_v27, %v1789_v61  ;;  %v9780_v45 = vadd.f32 %v7173_v8, %v1716_v20  ;;  %746 = vst [vmem:[#allocation3 + $0x98] sm:$0x1] %v745_v21  ;;  %853 = vst [vmem:[#allocation3 + $0x90] sm:$0x80] %v852_v14  ;;  %4177 = vmatprep.subr.bf16.mxu0 %v9782_v13  ;;  %v1721_v33 = vadd.f32 %v9648_v36, %v9574_v41  ;;  %v759_v20 = vld [vmem:[#allocation3 + $0xc0] sm:$0x1] }
 0x212   : > { %856 = vst [vmem:[#allocation3 + $0x98] sm:$0x80] %v855_v59  ;;  %v7174_v11 = vpop.f32.mrb[72].mxu1  ;;  %v1641_v27 = vadd.f32 %v9498_v32, %v9574_v41  ;;  %v1652_v2 = vadd.f32 %v9512_v63, %v9574_v41  ;;  %v1644_v38 = vadd.f32 %v9502_v52, %v9574_v41  ;;  %v760_v18 = vsel %vm8728_vm3, 0, %v759_v20  ;;  %v762_v54 = vld [vmem:[#allocation3 + $0xc8] sm:$0x1] }
 0x213   : > { %v7372_v62 = vpop.f32.mrb[72].mxu0  ;;  %v7175_v5 = vpop.f32.mrb[73].mxu1  ;;  %v1724_v36 = vadd.f32 %v9658_v6, %v9574_v41  ;;  %761 = vst [vmem:[#allocation3 + $0xc0] sm:$0x1] %v760_v18  ;;  %v763_v1 = vsel %vm9592_vm14, 0, %v762_v54  ;;  %v8170_v59 = vld [vmem:[#allocation10 + $0x70] sm:$0xff]   ;;  %v1657_v18 = vadd.f32 %v9519_v10, %v9574_v41 }
 0x214   : > { %v1810_v51 = vadd.f32 %v7372_v62, %v1649_v58  ;;  %v1801_v26 = vpop.f32.mrb[73].mxu0  ;;  %v7176_v28 = vadd.f32 %v7175_v5, %v7174_v11  ;;  %v7177_v56 = vpop.f32.mrb[74].mxu1  ;;  %v869_v49 = vld [vmem:[#allocation3 + $0xc0] sm:$0x80]  ;;  %764 = vst [vmem:[#allocation3 + $0xc8] sm:$0x1] %v763_v1  ;;  %4178 = vmatpush1.bf16.msra.mxu0 %v8170_v59 }
 0x215   : > { %v1802_v47 = vadd.f32 %v1801_v26, %v1641_v27  ;;  %v7373_v32 = vpop.f32.mrb[74].mxu0  ;;  %v7178_v61 = vpop.f32.mrb[75].mxu1  ;;  %v870_v8 = vsel %vm8737_vm6, 0, %v869_v49  ;;  %v872_v6 = vld [vmem:[#allocation3 + $0xc8] sm:$0x80]  ;;  %v1665_v26 = vadd.f32 %v9531_v50, %v9574_v41  ;;  %4179 = vmatprep.subr.bf16.mxu0 %v9782_v13 }
 0x216   : > { %v9802_v63 = vadd.f32 %v9545_v29, %v1810_v51  ;;  %v1813_v52 = vadd.f32 %v7373_v32, %v1652_v2  ;;  %v1804_v0 = vpop.f32.mrb[75].mxu0  ;;  %v9809_v42 = vadd.f32 %v7176_v28, %v1721_v33  ;;  %v7179_v14 = vadd.f32 %v7178_v61, %v7177_v56  ;;  %871 = vst [vmem:[#allocation3 + $0xc0] sm:$0x80] %v870_v8  ;;  %v753_v58 = vld [vmem:[#allocation3 + $0xb0] sm:$0x1] }
 0x217   : > { %v9807_v43 = vadd.f32 %v9541_v25, %v1802_v47  ;;  %v1805_v21 = vadd.f32 %v1804_v0, %v1644_v38  ;;  %v756_v29 = vld [vmem:[#allocation3 + $0xb8] sm:$0x1]  ;;  %v873_v11 = vsel %vm9599_vm15, 0, %v872_v6  ;;  %v754_v27 = vsel %vm8728_vm3, 0, %v753_v58  ;;  %v866_v51 = vld [vmem:[#allocation3 + $0xb8] sm:$0x80] }
 0x218   : > { %v9812_v62 = vadd.f32 %v9549_v48, %v1813_v52  ;;  %v757_v25 = vsel %vm9592_vm14, 0, %v756_v29  ;;  %v9823_v20 = vadd.f32 %v7179_v14, %v1724_v36  ;;  %874 = vst [vmem:[#allocation3 + $0xc8] sm:$0x80] %v873_v11  ;;  %755 = vst [vmem:[#allocation3 + $0xb0] sm:$0x1] %v754_v27  ;;  %v867_v2 = vsel %vm9599_vm15, 0, %v866_v51 }
 0x219   : > { %v9821_v33 = vadd.f32 %v9543_v3, %v1805_v21  ;;  %758 = vst [vmem:[#allocation3 + $0xb8] sm:$0x1] %v757_v25  ;;  %v863_v48 = vld [vmem:[#allocation3 + $0xb0] sm:$0x80]  ;;  %868 = vst [vmem:[#allocation3 + $0xb8] sm:$0x80] %v867_v2  ;;  %v1668_v32 = vadd.f32 %v9535_v31, %v9574_v41  ;;  %v1660_v8 = vadd.f32 %v9523_v39, %v9574_v41 }
 0x21a   : > { %v864_v5 = vsel %vm8737_vm6, 0, %v863_v48  ;;  %v7180_v38 = vpop.f32.mrb[76].mxu1  ;;  %v771_v54 = vld [vmem:[#allocation3 + $0xe0] sm:$0x1]  ;;  %v774_v36 = vld [vmem:[#allocation3 + $0xe8] sm:$0x1] }
 0x21b   : > { %v7376_v3 = vpop.f32.mrb[76].mxu0  ;;  %865 = vst [vmem:[#allocation3 + $0xb0] sm:$0x80] %v864_v5  ;;  %v7181_v50 = vpop.f32.mrb[77].mxu1  ;;  %v772_v56 = vsel %vm8728_vm3, 0, %v771_v54  ;;  %v775_v1 = vsel %vm9592_vm14, 0, %v774_v36 }
 0x21c   : > { %v1826_v47 = vadd.f32 %v7376_v3, %v1665_v26  ;;  %v1817_v28 = vpop.f32.mrb[77].mxu0  ;;  %v881_v49 = vld [vmem:[#allocation3 + $0xe0] sm:$0x80]  ;;  %v7182_v0 = vadd.f32 %v7181_v50, %v7180_v38  ;;  %v7183_v61 = vpop.f32.mrb[78].mxu1  ;;  %773 = vst [vmem:[#allocation3 + $0xe0] sm:$0x1] %v772_v56 }
 0x21d   : > { %v1818_v52 = vadd.f32 %v1817_v28, %v1657_v18  ;;  %v7377_v10 = vpop.f32.mrb[78].mxu0  ;;  %776 = vst [vmem:[#allocation3 + $0xe8] sm:$0x1] %v775_v1  ;;  %v882_v6 = vsel %vm8737_vm6, 0, %v881_v49  ;;  %v884_v31 = vld [vmem:[#allocation3 + $0xe8] sm:$0x80] }
 0x21e   : > { %v9845_v21 = vadd.f32 %v9563_v24, %v1826_v47  ;;  %v1829_v14 = vadd.f32 %v7377_v10, %v1668_v32  ;;  %v1820_v59 = vpop.f32.mrb[79].mxu0  ;;  %v7184_v58 = vpop.f32.mrb[79].mxu1  ;;  %883 = vst [vmem:[#allocation3 + $0xe0] sm:$0x80] %v882_v6  ;;  %v885_v29 = vsel %vm9599_vm15, 0, %v884_v31  ;;  %v9853_v39 = vadd.f32 %v7182_v0, %v9682_v23  ;;  %v10965_v23 = vld [vmem:[#allocation19_spill] sm:$0xff] }
 0x21f   : > { %v765_v11 = vld [vmem:[#allocation3 + $0xd0] sm:$0x1]  ;;  %v9850_v27 = vadd.f32 %v9554_v30, %v1818_v52  ;;  %v1821_v41 = vadd.f32 %v1820_v59, %v1660_v8  ;;  %v7185_v25 = vadd.f32 %v7184_v58, %v7183_v61  ;;  %886 = vst [vmem:[#allocation3 + $0xe8] sm:$0x80] %v885_v29  ;;  %v768_v48 = vld [vmem:[#allocation3 + $0xd8] sm:$0x1] }
 0x220   : > { %v875_v24 = vld [vmem:[#allocation3 + $0xd0] sm:$0x80]  ;;  %v878_v51 = vld [vmem:[#allocation3 + $0xd8] sm:$0x80]  ;;  %v9856_v26 = vadd.f32 %v9567_v9, %v1829_v14  ;;  %v766_v5 = vsel %vm8728_vm3, 0, %v765_v11  ;;  %v769_v2 = vsel %vm9592_vm14, 0, %v768_v48 }
 0x221   : > { %v876_v30 = vsel %vm8737_vm6, 0, %v875_v24  ;;  %v9865_v3 = vadd.f32 %v10965_v23, %v1821_v41  ;;  %v9868_v38 = vadd.f32 %v7185_v25, %v9691_v37  ;;  %767 = vst [vmem:[#allocation3 + $0xd0] sm:$0x1] %v766_v5  ;;  %770 = vst [vmem:[#allocation3 + $0xd8] sm:$0x1] %v769_v2  ;;  %v879_v9 = vsel %vm9599_vm15, 0, %v878_v51 }
 0x222   : > { %877 = vst [vmem:[#allocation3 + $0xd0] sm:$0x80] %v876_v30  ;;  %880 = vst [vmem:[#allocation3 + $0xd8] sm:$0x80] %v879_v9  ;;  %v777_v36 = vld [vmem:[#allocation3 + $0xf0] sm:$0x1] }
 0x223   : > { %v7226_v18 = vpop.f32.mrb[80].mxu0  ;;  %v780_v47 = vld [vmem:[#allocation3 + $0xf8] sm:$0x1]  ;;  %v778_v32 = vsel %vm8728_vm3, 0, %v777_v36  ;;  %v887_v56 = vld [vmem:[#allocation3 + $0xf0] sm:$0x80] }
 0x224   : > { %v7227_v54 = vpop.f32.mrb[81].mxu0  ;;  %v781_v37 = vsel %vm9592_vm14, 0, %v780_v47  ;;  %779 = vst [vmem:[#allocation3 + $0xf0] sm:$0x1] %v778_v32  ;;  %v888_v49 = vsel %vm8737_vm6, 0, %v887_v56  ;;  %v8171_v61 = vld [vmem:[#allocation10 + $0x78] sm:$0xff]  }
 0x225   : > { %v7228_v28 = vadd.f32 %v7227_v54, %v7226_v18  ;;  %v7229_v50 = vpop.f32.mrb[82].mxu0  ;;  %782 = vst [vmem:[#allocation3 + $0xf8] sm:$0x1] %v781_v37  ;;  %v890_v52 = vld [vmem:[#allocation3 + $0xf8] sm:$0x80]  ;;  %4180 = vmatpush1.bf16.msra.mxu0 %v8171_v61  ;;  %v8172_v23 = vld [vmem:[#allocation10 + $0x80] sm:$0xff]  }
 0x226   : > { %v7230_v1 = vpop.f32.mrb[83].mxu0  ;;  %v783_v8 = vld [vmem:[#allocation3 + $0x100] sm:$0x1]  ;;  %v786_v6 = vld [vmem:[#allocation3 + $0x108] sm:$0x1]  ;;  %v891_v31 = vsel %vm9599_vm15, 0, %v890_v52  ;;  %4181 = vmatprep.subr.bf16.mxu0 %v9782_v13 }
 0x227   : > { %v7231_v0 = vadd.f32 %v7230_v1, %v7229_v50  ;;  %v9879_v10 = vadd.f32 %v9719_v44, %v7228_v28  ;;  %889 = vst [vmem:[#allocation3 + $0xf0] sm:$0x80] %v888_v49  ;;  %v784_v14 = vsel %vm8728_vm3, 0, %v783_v8  ;;  %v787_v59 = vsel %vm9592_vm14, 0, %v786_v6  ;;  %v893_v58 = vld [vmem:[#allocation3 + $0x100] sm:$0x80] }
 0x228   : > { %892 = vst [vmem:[#allocation3 + $0xf8] sm:$0x80] %v891_v31  ;;  %785 = vst [vmem:[#allocation3 + $0x100] sm:$0x1] %v784_v14  ;;  %v894_v44 = vsel %vm8737_vm6, 0, %v893_v58  ;;  %v8173_v54 = vld [vmem:[#allocation10 + $0x88] sm:$0xff]  }
 0x229   : > { %v9888_v29 = vadd.f32 %v9733_v7, %v7231_v0  ;;  %788 = vst [vmem:[#allocation3 + $0x108] sm:$0x1] %v787_v59  ;;  %v896_v11 = vld [vmem:[#allocation3 + $0x108] sm:$0x80]  ;;  %895 = vst [vmem:[#allocation3 + $0x100] sm:$0x80] %v894_v44  ;;  %4182 = vmatpush1.bf16.msra.mxu0 %v8172_v23 }
 0x22a   : > { %v897_v41 = vsel %vm9599_vm15, 0, %v896_v11  ;;  %4183 = vmatprep.subr.bf16.mxu0 %v9782_v13  ;;  %v8175_v0 = vld [vmem:[#allocation10 + $0x98] sm:$0xff]   ;;  %v8176_v58 = vld [vmem:[#allocation10 + $0xa0] sm:$0xff]  }
 0x22b   : > { %v7232_v25 = vpop.f32.mrb[84].mxu0  ;;  %898 = vst [vmem:[#allocation3 + $0x108] sm:$0x80] %v897_v41 }
 0x22c   : > { %v7233_v48 = vpop.f32.mrb[85].mxu0 }
 0x22d   : > { %v7234_v24 = vadd.f32 %v7233_v48, %v7232_v25  ;;  %v7235_v51 = vpop.f32.mrb[86].mxu0  ;;  %4184 = vmatpush1.bf16.msra.mxu0 %v8173_v54  ;;  %v8177_v54 = vld [vmem:[#allocation10 + $0xa8] sm:$0xff]  }
 0x22e   : > { %v7236_v7 = vpop.f32.mrb[87].mxu0  ;;  %4185 = vmatprep.subr.bf16.mxu0 %v9782_v13 }
 0x22f   : > { %v7237_v5 = vadd.f32 %v7236_v7, %v7235_v51  ;;  %v9896_v2 = vadd.f32 %v9714_v46, %v7234_v24  ;;  %v8174_v46 = vld [vmem:[#allocation10 + $0x90] sm:$0xff]  }
 0x231   : > { %v9899_v30 = vadd.f32 %v9724_v17, %v7237_v5  ;;  %4186 = vmatpush1.bf16.msra.mxu0 %v8174_v46 }
 0x232   : > { %4187 = vmatprep.subr.bf16.mxu0 %v9782_v13 }
 0x233   : > { %v7238_v9 = vpop.f32.mrb[88].mxu0 }
 0x234   : > { %v7239_v18 = vpop.f32.mrb[89].mxu0 }
 0x235   : > { %v7240_v36 = vadd.f32 %v7239_v18, %v7238_v9  ;;  %v7241_v47 = vpop.f32.mrb[90].mxu0  ;;  %4188 = vmatpush1.bf16.msra.mxu0 %v8175_v0 }
 0x236   : > { %v7242_v28 = vpop.f32.mrb[91].mxu0  ;;  %4189 = vmatprep.subr.bf16.mxu0 %v9782_v13 }
 0x237   : > { %v7243_v50 = vadd.f32 %v7242_v28, %v7241_v47  ;;  %v9903_v32 = vadd.f32 %v9764_v60, %v7240_v36 }
 0x239   : > { %v9906_v37 = vadd.f32 %v9778_v53, %v7243_v50  ;;  %4190 = vmatpush1.bf16.msra.mxu0 %v8176_v58 }
 0x23a   : > { %4191 = vmatprep.subr.bf16.mxu0 %v9782_v13 }
 0x23b   : > { %v7244_v17 = vpop.f32.mrb[92].mxu0 }
 0x23c   : > { %v7245_v56 = vpop.f32.mrb[93].mxu0 }
 0x23d   : > { %v7246_v1 = vadd.f32 %v7245_v56, %v7244_v17  ;;  %v7247_v49 = vpop.f32.mrb[94].mxu0  ;;  %4192 = vmatpush1.bf16.msra.mxu0 %v8177_v54  ;;  %v8178_v56 = vld [vmem:[#allocation10 + $0xb0] sm:$0xff]  }
 0x23e   : > { %v7248_v52 = vpop.f32.mrb[95].mxu0  ;;  %4193 = vmatprep.subr.bf16.mxu0 %v9782_v13 }
 0x23f   : > { %v7249_v61 = vadd.f32 %v7248_v52, %v7247_v49  ;;  %v9911_v60 = vadd.f32 %v9759_v55, %v7246_v1 }
 0x241   : > { %v9914_v8 = vadd.f32 %v9769_v4, %v7249_v61  ;;  %4194 = vmatpush1.bf16.msra.mxu0 %v8178_v56 }
 0x242   : > { %4195 = vmatprep.subr.bf16.mxu0 %v9782_v13 }
 0x243   : > { %v7250_v53 = vpop.f32.mrb[96].mxu0 }
 0x244   : > { %v7251_v6 = vpop.f32.mrb[97].mxu0 }
 0x245   : > { %v7252_v31 = vadd.f32 %v7251_v6, %v7250_v53  ;;  %v7253_v14 = vpop.f32.mrb[98].mxu0 }
 0x246   : > { %v7254_v59 = vpop.f32.mrb[99].mxu0 }
 0x247   : > { %v7255_v44 = vadd.f32 %v7254_v59, %v7253_v14  ;;  %v9918_v11 = vadd.f32 %v9807_v43, %v7252_v31 }
 0x249   : > { %v9921_v55 = vadd.f32 %v9821_v33, %v7255_v44 }
 0x24b   : > { %v7256_v4 = vpop.f32.mrb[100].mxu0 }
 0x24c   : > { %v7257_v41 = vpop.f32.mrb[101].mxu0 }
 0x24d   : > { %v7258_v25 = vadd.f32 %v7257_v41, %v7256_v4  ;;  %v7259_v48 = vpop.f32.mrb[102].mxu0  ;;  %v8179_v4 = vld [vmem:[#allocation10 + $0xb8] sm:$0xff]  }
 0x24e   : > { %v7260_v24 = vpop.f32.mrb[103].mxu0  ;;  %4196 = vmatpush1.bf16.msra.mxu0 %v8179_v4 }
 0x24f   : > { %v7261_v51 = vadd.f32 %v7260_v24, %v7259_v48  ;;  %v9925_v7 = vadd.f32 %v9802_v63, %v7258_v25  ;;  %v10966_v25 = vld [vmem:[#allocation20_spill] sm:$0xff]  ;;  %4608 = vmatprep.subr.bf16.mxu0 %v9782_v13 }
 0x250   : > { %v8217_v13 = vld [vmem:[#allocation11 + $0xc8] sm:$0xff]  }
 0x251   : > { %v9928_v5 = vadd.f32 %v9812_v62, %v7261_v51 }
 0x253   : > { %v7262_v43 = vpop.f32.mrb[104].mxu0 }
 0x254   : > { %v7263_v23 = vpop.f32.mrb[105].mxu0 }
 0x255   : > { %v7264_v9 = vadd.f32 %v7263_v23, %v7262_v43  ;;  %v7265_v18 = vpop.f32.mrb[106].mxu0  ;;  %v10967_v23 = vld [vmem:[#allocation21_spill] sm:$0xff] }
 0x256   : > { %v7266_v33 = vpop.f32.mrb[107].mxu0 }
 0x257   : > { %v7267_v36 = vadd.f32 %v7266_v33, %v7265_v18  ;;  %v9931_v47 = vadd.f32 %v9850_v27, %v7264_v9 }
 0x259   : > { %v9934_v28 = vadd.f32 %v9865_v3, %v7267_v36 }
 0x25b   : > { %v7268_v63 = vpop.f32.mrb[108].mxu0 }
 0x25c   : > { %v7269_v50 = vpop.f32.mrb[109].mxu0 }
 0x25d   : > { %v7270_v62 = vadd.f32 %v7269_v50, %v7268_v63  ;;  %v7271_v46 = vpop.f32.mrb[110].mxu0 }
 0x25e   : > { %v7272_v17 = vpop.f32.mrb[111].mxu0 }
 0x25f   : > { %v7273_v1 = vadd.f32 %v7272_v17, %v7271_v46  ;;  %v9938_v49 = vadd.f32 %v9845_v21, %v7270_v62 }
 0x261   : > { %v9941_v27 = vadd.f32 %v9856_v26, %v7273_v1 }
 0x262   : > { %v7460_v52 = vpop.f32.mrb[80].mxu1 }
 0x263   : > { %v7274_v3 = vpop.f32.mrb[112].mxu0  ;;  %v7509_v0 = vadd.f32 %v9896_v2, %v7460_v52  ;;  %v3024_v53 = vpop.f32.mrb[81].mxu1 }
 0x264   : > { %v7275_v61 = vpop.f32.mrb[113].mxu0  ;;  %v7513_v31 = vadd.f32 %v9879_v10, %v3024_v53  ;;  %v7461_v59 = vpop.f32.mrb[82].mxu1 }
 0x265   : > { %v7276_v6 = vadd.f32 %v7275_v61, %v7274_v3  ;;  %v7277_v14 = vpop.f32.mrb[114].mxu0  ;;  %v7517_v21 = vadd.f32 %v9899_v30, %v7461_v59  ;;  %v3027_v44 = vpop.f32.mrb[83].mxu1  ;;  %v3281_v24 = vmax.f32 %v7509_v0, 0.0 }
 0x266   : > { %v7278_v58 = vpop.f32.mrb[115].mxu0  ;;  %v7521_v41 = vadd.f32 %v9888_v29, %v3027_v44  ;;  %v3279_v51 = vmax.f32 %v7513_v31, 0.0  ;;  %v8218_v31 = vld [vmem:[#allocation11 + $0xd0] sm:$0xff]  }
 0x267   : > { %v7279_v26 = vadd.f32 %v7278_v58, %v7277_v14  ;;  %v9949_v48 = vadd.f32 %v10966_v25, %v7276_v6  ;;  %v3282_v2 = vmax.f32 %v7517_v21, 0.0  ;;  %v3575_v14 = vld [vmem:[#allocation3 + $0x28] sm:$0xff]  ;;  %v3572_v25 = vld [vmem:[#allocation3 + $0x18] sm:$0xff] }
 0x268   : > { %v3280_v43 = vmax.f32 %v7521_v41, 0.0  ;;  %v3458_v41 = vld [vmem:[#allocation3 + $0x10] sm:$0xff] }
 0x269   : > { %v9952_v10 = vadd.f32 %v10967_v23, %v7279_v26  ;;  %v3312_v30 = vpack.c.bf16 %v3282_v2, %v3281_v24 }
 0x26a   : > { %v3311_v9 = vpack.c.bf16 %v3280_v43, %v3279_v51  ;;  %v7464_v33 = vpop.f32.mrb[84].mxu1  ;;  %v10972_v43 = vld [vmem:[#allocation22_spill] sm:$0xff] }
 0x26b   : > { %v7280_v18 = vpop.f32.mrb[116].mxu0  ;;  %v3335_v54 = vshrl.u32 %v3312_v30, 16  ;;  %v3338_v36 = vshll.u32 %v3312_v30, 16  ;;  %v7525_v29 = vadd.f32 %v9911_v60, %v7464_v33  ;;  %v3040_v50 = vpop.f32.mrb[85].mxu1 }
 0x26c   : > { %v7281_v63 = vpop.f32.mrb[117].mxu0  ;;  %v3328_v62 = vshrl.u32 %v3311_v9, 16  ;;  %v3331_v46 = vshll.u32 %v3311_v9, 16  ;;  %v7529_v56 = vadd.f32 %v9903_v32, %v3040_v50  ;;  %v7465_v3 = vpop.f32.mrb[86].mxu1  ;;  %v3461_v32 = vld [vmem:[#allocation3 + $0x20] sm:$0xff] }
 0x26d   : > { %v7282_v17 = vadd.f32 %v7281_v63, %v7280_v18  ;;  %v7283_v1 = vpop.f32.mrb[118].mxu0  ;;  %v3337_v52 = vrot.slane %v3335_v54, 7  ;;  %v3525_v0 = vrot.slane %v3338_v36, 1  ;;  %v3285_v61 = vmax.f32 %v7525_v29, 0.0  ;;  %v3043_v6 = vpop.f32.mrb[87].mxu1  ;;  %v10973_v18 = vld [vmem:[#allocation23_spill] sm:$0xff] }
 0x26e   : > { %v7533_v60 = vadd.f32 %v9914_v8, %v7465_v3  ;;  %v7284_v53 = vpop.f32.mrb[119].mxu0  ;;  %v3330_v59 = vrot.slane %v3328_v62, 7  ;;  %v3523_v21 = vrot.slane %v3331_v46, 1  ;;  %v3283_v58 = vmax.f32 %v7529_v56, 0.0 }
 0x26f   : > { %v7285_v44 = vadd.f32 %v7284_v53, %v7283_v1  ;;  %v3340_v4 = vor.u32 %v3338_v36, %v3337_v52  ;;  %v3526_v26 = vor.u32 %v3525_v0, %v3335_v54  ;;  %v7537_v8 = vadd.f32 %v9906_v37, %v3043_v6 }
 0x270   : > { %v3286_v24 = vmax.f32 %v7533_v60, 0.0  ;;  %v3333_v2 = vor.u32 %v3331_v46, %v3330_v59  ;;  %v3524_v51 = vor.u32 %v3523_v21, %v3328_v62  ;;  %v9972_v23 = vadd.f32 %v10972_v43, %v7282_v17 }
 0x271   : > { %v9975_v33 = vadd.f32 %v10973_v18, %v7285_v44  ;;  %v3462_v29 = vsel %vm9966_vm4, %v3340_v4, %v3461_v32  ;;  %v9981_v36 = vsel %vm9959_vm2, %v3526_v26, %v3575_v14  ;;  %v3284_v63 = vmax.f32 %v7537_v8, 0.0  ;;  %v3581_v4 = vld [vmem:[#allocation3 + $0x48] sm:$0xff] }
 0x272   : > { %v3314_v54 = vpack.c.bf16 %v3286_v24, %v3285_v61  ;;  %3463 = vst [vmem:[#allocation3 + $0x20] sm:$0xff] %v3462_v29  ;;  %3577 = vst [vmem:[#allocation3 + $0x28] sm:$0xff] %v9981_v36  ;;  %v3459_v37 = vsel %vm9966_vm4, %v3333_v2, %v3458_v41  ;;  %v3573_v50 = vsel %vm9959_vm2, %v3524_v51, %v3572_v25  ;;  %v7468_v46 = vpop.f32.mrb[88].mxu1  ;;  %v3464_v2 = vld [vmem:[#allocation3 + $0x30] sm:$0xff]  ;;  %v10974_v18 = vld [vmem:[#allocation24_spill] sm:$0xff] }
 0x273   : > { %v7286_v62 = vpop.f32.mrb[120].mxu0  ;;  %3508 = vst.msk [vmem:[#allocation3 + $0x20] sm:$0xff] %vm3506_vm1, %v3312_v30  ;;  %3460 = vst [vmem:[#allocation3 + $0x10] sm:$0xff] %v3459_v37  ;;  %v3313_v1 = vpack.c.bf16 %v3284_v63, %v3283_v58  ;;  %v7541_v3 = vadd.f32 %v9925_v7, %v7468_v46  ;;  %v3056_v0 = vpop.f32.mrb[89].mxu1  ;;  %6775 = vmatprep.mubr.msk.bf16.mxu0 %vm680_vm0, %v3573_v50  ;;  %v3467_v58 = vld [vmem:[#allocation3 + $0x40] sm:$0xff]  ;;  %v10975_v63 = vld [vmem:[#allocation25_spill] sm:$0xff] }
 0x274   : > { %3574 = vst [vmem:[#allocation3 + $0x18] sm:$0xff] %v3573_v50  ;;  %v3349_v17 = vshrl.u32 %v3314_v54, 16  ;;  %v3352_v56 = vshll.u32 %v3314_v54, 16  ;;  %v7287_v52 = vpop.f32.mrb[121].mxu0  ;;  %3507 = vst.msk [vmem:[#allocation3 + $0x10] sm:$0xff] %vm3506_vm1, %v3311_v9  ;;  %v7545_v60 = vadd.f32 %v9918_v11, %v3056_v0  ;;  %v7469_v6 = vpop.f32.mrb[90].mxu1 }
 0x275   : > { %v7288_v61 = vadd.f32 %v7287_v52, %v7286_v62  ;;  %v7289_v53 = vpop.f32.mrb[122].mxu0  ;;  %v3342_v14 = vshrl.u32 %v3313_v1, 16  ;;  %v3345_v59 = vshll.u32 %v3313_v1, 16  ;;  %v3059_v44 = vpop.f32.mrb[91].mxu1  ;;  %v3289_v7 = vmax.f32 %v7541_v3, 0.0  ;;  %v3578_v11 = vld [vmem:[#allocation3 + $0x38] sm:$0xff] }
 0x276   : > { %v3351_v32 = vrot.slane %v3349_v17, 7  ;;  %v3529_v30 = vrot.slane %v3352_v56, 1  ;;  %v7290_v21 = vpop.f32.mrb[123].mxu0  ;;  %v7549_v26 = vadd.f32 %v9928_v5, %v7469_v6  ;;  %v7553_v43 = vadd.f32 %v9921_v55, %v3059_v44 }
 0x277   : > { %v7291_v41 = vadd.f32 %v7290_v21, %v7289_v53  ;;  %v3344_v9 = vrot.slane %v3342_v14, 7  ;;  %v3527_v8 = vrot.slane %v3345_v59, 1  ;;  %v9996_v29 = vadd.f32 %v10974_v18, %v7288_v61 }
 0x278   : > { %v3354_v25 = vor.u32 %v3352_v56, %v3351_v32  ;;  %v3530_v24 = vor.u32 %v3529_v30, %v3349_v17  ;;  %v3290_v51 = vmax.f32 %v7549_v26, 0.0  ;;  %v3287_v17 = vmax.f32 %v7545_v60, 0.0 }
 0x279   : > { %v9999_v37 = vadd.f32 %v10975_v63, %v7291_v41  ;;  %v3347_v62 = vor.u32 %v3345_v59, %v3344_v9  ;;  %v3528_v46 = vor.u32 %v3527_v8, %v3342_v14  ;;  %v3288_v56 = vmax.f32 %v7553_v43, 0.0  ;;  %v3473_v8 = vld [vmem:[#allocation3 + $0x60] sm:$0xff] }
 0x27a   : > { %v3468_v50 = vsel %vm9966_vm4, %v3354_v25, %v3467_v58  ;;  %v10005_v5 = vsel %vm9959_vm2, %v3530_v24, %v3581_v4  ;;  %v3316_v55 = vpack.c.bf16 %v3290_v51, %v3289_v7  ;;  %v7472_v52 = vpop.f32.mrb[92].mxu1 }
 0x27b   : > { %3469 = vst [vmem:[#allocation3 + $0x40] sm:$0xff] %v3468_v50  ;;  %3583 = vst [vmem:[#allocation3 + $0x48] sm:$0xff] %v10005_v5  ;;  %v7292_v3 = vpop.f32.mrb[124].mxu0  ;;  %v3465_v0 = vsel %vm9966_vm4, %v3347_v62, %v3464_v2  ;;  %v10013_v61 = vsel %vm9959_vm2, %v3528_v46, %v3578_v11  ;;  %v7557_v53 = vadd.f32 %v9938_v49, %v7472_v52  ;;  %v3072_v32 = vpop.f32.mrb[93].mxu1  ;;  %v10016_v30 = vld [vmem:[#allocation3 + $0x10] sm:$0xff]  ;;  %v3587_v2 = vld [vmem:[#allocation3 + $0x68] sm:$0xff] }
 0x27c   : > { %3510 = vst.msk [vmem:[#allocation3 + $0x40] sm:$0xff] %vm3506_vm1, %v3314_v54  ;;  %v7293_v6 = vpop.f32.mrb[125].mxu0  ;;  %3466 = vst [vmem:[#allocation3 + $0x30] sm:$0xff] %v3465_v0  ;;  %v3363_v60 = vshrl.u32 %v3316_v55, 16  ;;  %v3366_v14 = vshll.u32 %v3316_v55, 16  ;;  %v10019_v59 = vpack.c.bf16 %v3288_v56, %v3287_v17  ;;  %v7473_v44 = vpop.f32.mrb[94].mxu1  ;;  %3844 = vmatmul.mubr.bf16.gmra.mrb[148].mxu0 %v10016_v30  ;;  %v7561_v49 = vadd.f32 %v9931_v47, %v3072_v32 }
 0x27d   : > { %3580 = vst [vmem:[#allocation3 + $0x38] sm:$0xff] %v10013_v61  ;;  %v7294_v54 = vadd.f32 %v7293_v6, %v7292_v3  ;;  %v7295_v21 = vpop.f32.mrb[126].mxu0  ;;  %3509 = vst.msk [vmem:[#allocation3 + $0x30] sm:$0xff] %vm3506_vm1, %v3313_v1  ;;  %v3293_v58 = vmax.f32 %v7557_v53, 0.0  ;;  %v7565_v4 = vadd.f32 %v9941_v27, %v7473_v44  ;;  %v3075_v26 = vpop.f32.mrb[95].mxu1  ;;  %6776 = vmatprep.mubr.msk.bf16.mxu0 %vm680_vm0, %v9981_v36  ;;  %v3470_v50 = vld [vmem:[#allocation3 + $0x50] sm:$0xff] }
 0x27e   : > { %v7296_v7 = vpop.f32.mrb[127].mxu0  ;;  %v3365_v41 = vrot.slane %v3363_v60, 7  ;;  %v3533_v25 = vrot.slane %v3366_v14, 1  ;;  %v3356_v24 = vshrl.u32 %v10019_v59, 16  ;;  %v3359_v9 = vshll.u32 %v10019_v59, 16  ;;  %v3584_v62 = vld [vmem:[#allocation3 + $0x58] sm:$0xff] }
 0x27f   : > { %v3291_v11 = vmax.f32 %v7561_v49, 0.0  ;;  %v3294_v1 = vmax.f32 %v7565_v4, 0.0  ;;  %v7297_v51 = vadd.f32 %v7296_v7, %v7295_v21  ;;  %v7569_v47 = vadd.f32 %v9934_v28, %v3075_v26  ;;  %v10050_v21 = vld [vmem:[#allocation3 + $0x20] sm:$0xff] }
 0x280   : > { %v3368_v43 = vor.u32 %v3366_v14, %v3365_v41  ;;  %v3534_v27 = vor.u32 %v3533_v25, %v3363_v60  ;;  %v3358_v18 = vrot.slane %v3356_v24, 7  ;;  %v3531_v63 = vrot.slane %v3359_v9, 1 }
 0x281   : > { %v10030_v36 = vpack.c.bf16 %v3294_v1, %v3293_v58  ;;  %v3292_v46 = vmax.f32 %v7569_v47, 0.0  ;;  %v10033_v17 = vadd.f32 %v9679_v16, %v7294_v54  ;;  %v10036_v56 = vadd.f32 %v9688_v22, %v7297_v51 }
 0x282   : > { %v3474_v3 = vsel %vm9966_vm4, %v3368_v43, %v3473_v8  ;;  %v10042_v28 = vsel %vm9959_vm2, %v3534_v27, %v3587_v2  ;;  %v3361_v52 = vor.u32 %v3359_v9, %v3358_v18  ;;  %v3532_v0 = vor.u32 %v3531_v63, %v3356_v24  ;;  %v7476_v6 = vpop.f32.mrb[0].mxu1  ;;  %v3593_v8 = vld [vmem:[#allocation3 + $0x88] sm:$0xff]  ;;  %v3476_v18 = vld [vmem:[#allocation3 + $0x70] sm:$0xff]  ;;  %v3590_v63 = vld [vmem:[#allocation3 + $0x78] sm:$0xff] }
 0x283   : > { %v7298_v53 = vpop.f32.mrb[128].mxu0  ;;  %3475 = vst [vmem:[#allocation3 + $0x60] sm:$0xff] %v3474_v3  ;;  %3589 = vst [vmem:[#allocation3 + $0x68] sm:$0xff] %v10042_v28  ;;  %v3377_v16 = vshrl.u32 %v10030_v36, 16  ;;  %v3380_v32 = vshll.u32 %v10030_v36, 16  ;;  %v10047_v22 = vpack.c.bf16 %v3292_v46, %v3291_v11  ;;  %v7572_v60 = vadd.f32 %v9972_v23, %v7476_v6  ;;  %v3088_v54 = vpop.f32.mrb[1].mxu1 }
 0x284   : > { %v7299_v14 = vpop.f32.mrb[129].mxu0  ;;  %3512 = vst.msk [vmem:[#allocation3 + $0x60] sm:$0xff] %vm3506_vm1, %v3316_v55  ;;  %v3471_v44 = vsel %vm9966_vm4, %v3361_v52, %v3470_v50  ;;  %v10057_v58 = vsel %vm9959_vm2, %v3532_v0, %v3584_v62  ;;  %v7575_v4 = vadd.f32 %v9949_v48, %v3088_v54  ;;  %v7477_v26 = vpop.f32.mrb[2].mxu1  ;;  %3852 = vmatmul.mubr.bf16.gmra.mrb[152].mxu0 %v10050_v21  ;;  %v3479_v48 = vld [vmem:[#allocation3 + $0x80] sm:$0xff]  ;;  %v10092_v54 = vld [vmem:[#allocation3 + $0x30] sm:$0xff] }
 0x285   : > { %v7300_v49 = vadd.f32 %v7299_v14, %v7298_v53  ;;  %v7301_v7 = vpop.f32.mrb[130].mxu0  ;;  %3472 = vst [vmem:[#allocation3 + $0x50] sm:$0xff] %v3471_v44  ;;  %3586 = vst [vmem:[#allocation3 + $0x58] sm:$0xff] %v10057_v58  ;;  %v3379_v23 = vrot.slane %v3377_v16, 7  ;;  %v3537_v41 = vrot.slane %v3380_v32, 1  ;;  %v3370_v55 = vshrl.u32 %v10047_v22, 16  ;;  %6777 = vmatprep.mubr.msk.bf16.mxu0 %vm680_vm0, %v10013_v61 }
 0x286   : > { %v3373_v25 = vshll.u32 %v10047_v22, 16  ;;  %v7302_v24 = vpop.f32.mrb[131].mxu0  ;;  %v3091_v9 = vpop.f32.mrb[3].mxu1  ;;  %3511 = vst.msk [vmem:[#allocation3 + $0x50] sm:$0xff] %vm3506_vm1, %v10019_v59  ;;  %v3297_v2 = vmax.f32 %v7572_v60, 0.0  ;;  %v7578_v11 = vadd.f32 %v9975_v33, %v7477_v26  ;;  %v3295_v0 = vmax.f32 %v7575_v4, 0.0 }
 0x287   : > { %v7303_v1 = vadd.f32 %v7302_v24, %v7301_v7  ;;  %v3382_v51 = vor.u32 %v3380_v32, %v3379_v23  ;;  %v3538_v47 = vor.u32 %v3537_v41, %v3377_v16  ;;  %v3372_v43 = vrot.slane %v3370_v55, 7 }
 0x288   : > { %v3535_v27 = vrot.slane %v3373_v25, 1  ;;  %v3298_v50 = vmax.f32 %v7578_v11, 0.0  ;;  %v7581_v62 = vadd.f32 %v9952_v10, %v3091_v9  ;;  %v10071_v61 = vadd.f32 %v9721_v12, %v7300_v49  ;;  %v3599_v11 = vld [vmem:[#allocation3 + $0xa8] sm:$0xff] }
 0x289   : > { %v10074_v59 = vadd.f32 %v9735_v57, %v7303_v1  ;;  %v3480_v46 = vsel %vm9966_vm4, %v3382_v51, %v3479_v48  ;;  %v10080_v33 = vsel %vm9959_vm2, %v3538_v47, %v3593_v8  ;;  %v3375_v3 = vor.u32 %v3373_v25, %v3372_v43 }
 0x28a   : > { %v3536_v52 = vor.u32 %v3535_v27, %v3370_v55  ;;  %3481 = vst [vmem:[#allocation3 + $0x80] sm:$0xff] %v3480_v46  ;;  %3595 = vst [vmem:[#allocation3 + $0x88] sm:$0xff] %v10080_v33  ;;  %v3320_v10 = vpack.c.bf16 %v3298_v50, %v3297_v2  ;;  %v3296_v53 = vmax.f32 %v7581_v62, 0.0  ;;  %v7480_v6 = vpop.f32.mrb[4].mxu1  ;;  %v3485_v2 = vld [vmem:[#allocation3 + $0xa0] sm:$0xff] }
 0x28b   : > { %v7304_v12 = vpop.f32.mrb[132].mxu0  ;;  %3514 = vst.msk [vmem:[#allocation3 + $0x80] sm:$0xff] %vm3506_vm1, %v10030_v36  ;;  %v3477_v57 = vsel %vm9966_vm4, %v3375_v3, %v3476_v18  ;;  %v7584_v32 = vadd.f32 %v10033_v17, %v7480_v6  ;;  %v3104_v14 = vpop.f32.mrb[5].mxu1  ;;  %v3482_v18 = vld [vmem:[#allocation3 + $0x90] sm:$0xff] }
 0x28c   : > { %v10089_v16 = vsel %vm9959_vm2, %v3536_v52, %v3590_v63  ;;  %v7305_v60 = vpop.f32.mrb[133].mxu0  ;;  %3478 = vst [vmem:[#allocation3 + $0x70] sm:$0xff] %v3477_v57  ;;  %v3391_v44 = vshrl.u32 %v3320_v10, 16  ;;  %v3394_v49 = vshll.u32 %v3320_v10, 16  ;;  %v10095_v4 = vpack.c.bf16 %v3296_v53, %v3295_v0  ;;  %v7481_v26 = vpop.f32.mrb[6].mxu1  ;;  %3860 = vmatmul.mubr.bf16.gmra.mrb[156].mxu0 %v10092_v54  ;;  %v3596_v63 = vld [vmem:[#allocation3 + $0x98] sm:$0xff] }
 0x28d   : > { %3592 = vst [vmem:[#allocation3 + $0x78] sm:$0xff] %v10089_v16  ;;  %v7306_v36 = vadd.f32 %v7305_v60, %v7304_v12  ;;  %v7307_v7 = vpop.f32.mrb[134].mxu0  ;;  %3513 = vst.msk [vmem:[#allocation3 + $0x70] sm:$0xff] %vm3506_vm1, %v10047_v22  ;;  %v3301_v17 = vmax.f32 %v7584_v32, 0.0  ;;  %v7587_v23 = vadd.f32 %v9996_v29, %v3104_v14  ;;  %v7590_v41 = vadd.f32 %v10036_v56, %v7481_v26  ;;  %v3107_v25 = vpop.f32.mrb[7].mxu1  ;;  %v10122_v14 = vld [vmem:[#allocation3 + $0x40] sm:$0xff] }
 0x28e   : > { %v7308_v55 = vpop.f32.mrb[135].mxu0  ;;  %6778 = vmatprep.mubr.msk.bf16.mxu0 %vm680_vm0, %v10005_v5  ;;  %v3393_v24 = vrot.slane %v3391_v44, 7  ;;  %v3541_v9 = vrot.slane %v3394_v49, 1  ;;  %v3384_v48 = vshrl.u32 %v10095_v4, 16  ;;  %v3387_v8 = vshll.u32 %v10095_v4, 16 }
 0x28f   : > { %v3299_v1 = vmax.f32 %v7587_v23, 0.0  ;;  %v3302_v22 = vmax.f32 %v7590_v41, 0.0  ;;  %v7309_v51 = vadd.f32 %v7308_v55, %v7307_v7  ;;  %v7593_v29 = vadd.f32 %v9999_v37, %v3107_v25 }
 0x290   : > { %v3396_v47 = vor.u32 %v3394_v49, %v3393_v24  ;;  %v3542_v56 = vor.u32 %v3541_v9, %v3391_v44  ;;  %v3386_v43 = vrot.slane %v3384_v48, 7  ;;  %v3539_v27 = vrot.slane %v3387_v8, 1  ;;  %v3605_v9 = vld [vmem:[#allocation3 + $0xc8] sm:$0xff] }
 0x291   : > { %v10107_v5 = vpack.c.bf16 %v3302_v22, %v3301_v17  ;;  %v3300_v50 = vmax.f32 %v7593_v29, 0.0  ;;  %v7595_v62 = vadd.f32 %v9766_v40, %v7306_v36  ;;  %v7601_v46 = vadd.f32 %v9780_v45, %v7309_v51  ;;  %v3488_v29 = vld [vmem:[#allocation3 + $0xb0] sm:$0xff] }
 0x292   : > { %v3486_v3 = vsel %vm9966_vm4, %v3396_v47, %v3485_v2  ;;  %v10115_v52 = vsel %vm9959_vm2, %v3542_v56, %v3599_v11  ;;  %v3389_v37 = vor.u32 %v3387_v8, %v3386_v43  ;;  %v3540_v0 = vor.u32 %v3539_v27, %v3384_v48  ;;  %v7484_v12 = vpop.f32.mrb[8].mxu1  ;;  %v3602_v47 = vld [vmem:[#allocation3 + $0xb8] sm:$0xff] }
 0x293   : > { %v7310_v53 = vpop.f32.mrb[136].mxu0  ;;  %3487 = vst [vmem:[#allocation3 + $0xa0] sm:$0xff] %v3486_v3  ;;  %3601 = vst [vmem:[#allocation3 + $0xa8] sm:$0xff] %v10115_v52  ;;  %v3405_v6 = vshrl.u32 %v10107_v5, 16  ;;  %v3408_v40 = vshll.u32 %v10107_v5, 16  ;;  %v10120_v57 = vpack.c.bf16 %v3300_v50, %v3299_v1  ;;  %v7596_v45 = vadd.f32 %v7595_v62, %v7484_v12  ;;  %v3120_v60 = vpop.f32.mrb[9].mxu1 }
 0x294   : > { %v7311_v32 = vpop.f32.mrb[137].mxu0  ;;  %3516 = vst.msk [vmem:[#allocation3 + $0xa0] sm:$0xff] %vm3506_vm1, %v3320_v10  ;;  %v3483_v44 = vsel %vm9966_vm4, %v3389_v37, %v3482_v18  ;;  %v10129_v49 = vsel %vm9959_vm2, %v3540_v0, %v3596_v63  ;;  %v7599_v7 = vadd.f32 %v10071_v61, %v3120_v60  ;;  %v7485_v17 = vpop.f32.mrb[10].mxu1  ;;  %3868 = vmatmul.mubr.bf16.gmra.mrb[160].mxu0 %v10122_v14  ;;  %v3491_v61 = vld [vmem:[#allocation3 + $0xc0] sm:$0xff]  ;;  %v10158_v12 = vld [vmem:[#allocation3 + $0x50] sm:$0xff] }
 0x295   : > { %v7312_v36 = vadd.f32 %v7311_v32, %v7310_v53  ;;  %v7313_v26 = vpop.f32.mrb[138].mxu0  ;;  %3484 = vst [vmem:[#allocation3 + $0x90] sm:$0xff] %v3483_v44  ;;  %3598 = vst [vmem:[#allocation3 + $0x98] sm:$0xff] %v10129_v49  ;;  %v3407_v23 = vrot.slane %v3405_v6, 7  ;;  %v3545_v41 = vrot.slane %v3408_v40, 1  ;;  %v3398_v10 = vshrl.u32 %v10120_v57, 16  ;;  %6779 = vmatprep.mubr.msk.bf16.mxu0 %vm680_vm0, %v10057_v58 }
 0x296   : > { %v3401_v55 = vshll.u32 %v10120_v57, 16  ;;  %v7314_v25 = vpop.f32.mrb[139].mxu0  ;;  %v3123_v24 = vpop.f32.mrb[11].mxu1  ;;  %3515 = vst.msk [vmem:[#allocation3 + $0x90] sm:$0xff] %vm3506_vm1, %v10095_v4  ;;  %v3305_v48 = vmax.f32 %v7596_v45, 0.0  ;;  %v7602_v8 = vadd.f32 %v7601_v46, %v7485_v17  ;;  %v3303_v62 = vmax.f32 %v7599_v7, 0.0 }
 0x297   : > { %v7315_v2 = vadd.f32 %v7314_v25, %v7313_v26  ;;  %v3410_v11 = vor.u32 %v3408_v40, %v3407_v23  ;;  %v3546_v1 = vor.u32 %v3545_v41, %v3405_v6  ;;  %v3400_v22 = vrot.slane %v3398_v10, 7 }
 0x298   : > { %v3543_v51 = vrot.slane %v3401_v55, 1  ;;  %v3306_v56 = vmax.f32 %v7602_v8, 0.0  ;;  %v7605_v43 = vadd.f32 %v10074_v59, %v3123_v24  ;;  %v7610_v27 = vadd.f32 %v9809_v42, %v7312_v36 }
 0x299   : > { %v7616_v58 = vadd.f32 %v9823_v20, %v7315_v2  ;;  %v3492_v4 = vsel %vm9966_vm4, %v3410_v11, %v3491_v61  ;;  %v10147_v18 = vsel %vm9959_vm2, %v3546_v1, %v3605_v9  ;;  %v3403_v63 = vor.u32 %v3401_v55, %v3400_v22  ;;  %v3611_v55 = vld [vmem:[#allocation3 + $0xe8] sm:$0xff]  ;;  %v3494_v2 = vld [vmem:[#allocation3 + $0xd0] sm:$0xff]  ;;  %v3608_v11 = vld [vmem:[#allocation3 + $0xd8] sm:$0xff] }
 0x29a   : > { %v3544_v50 = vor.u32 %v3543_v51, %v3398_v10  ;;  %3493 = vst [vmem:[#allocation3 + $0xc0] sm:$0xff] %v3492_v4  ;;  %3607 = vst [vmem:[#allocation3 + $0xc8] sm:$0xff] %v10147_v18  ;;  %v3324_v46 = vpack.c.bf16 %v3306_v56, %v3305_v48  ;;  %v3304_v3 = vmax.f32 %v7605_v43, 0.0  ;;  %v7488_v37 = vpop.f32.mrb[12].mxu1  ;;  %v3497_v10 = vld [vmem:[#allocation3 + $0xe0] sm:$0xff] }
 0x29b   : > { %v7316_v59 = vpop.f32.mrb[140].mxu0  ;;  %3518 = vst.msk [vmem:[#allocation3 + $0xc0] sm:$0xff] %vm3506_vm1, %v10107_v5  ;;  %v3489_v42 = vsel %vm9966_vm4, %v3403_v63, %v3488_v29  ;;  %v3136_v53 = vpop.f32.mrb[13].mxu1 }
 0x29c   : > { %v10156_v20 = vsel %vm9959_vm2, %v3544_v50, %v3602_v47  ;;  %v7317_v0 = vpop.f32.mrb[141].mxu0  ;;  %3490 = vst [vmem:[#allocation3 + $0xb0] sm:$0xff] %v3489_v42  ;;  %v3419_v6 = vshrl.u32 %v3324_v46, 16  ;;  %v3422_v40 = vshll.u32 %v3324_v46, 16  ;;  %v3323_v45 = vpack.c.bf16 %v3304_v3, %v3303_v62  ;;  %v7489_v5 = vpop.f32.mrb[14].mxu1  ;;  %3876 = vmatmul.mubr.bf16.gmra.mrb[164].mxu0 %v10158_v12  ;;  %v3500_v42 = vld [vmem:[#allocation3 + $0xf0] sm:$0xff] }
 0x29d   : > { %3604 = vst [vmem:[#allocation3 + $0xb8] sm:$0xff] %v10156_v20  ;;  %v7318_v32 = vadd.f32 %v7317_v0, %v7316_v59  ;;  %v7319_v60 = vpop.f32.mrb[142].mxu0  ;;  %3517 = vst.msk [vmem:[#allocation3 + $0xb0] sm:$0xff] %vm3506_vm1, %v10120_v57  ;;  %v7611_v44 = vadd.f32 %v7610_v27, %v3136_v53  ;;  %v3139_v7 = vpop.f32.mrb[15].mxu1  ;;  %6780 = vmatprep.mubr.msk.bf16.mxu0 %vm680_vm0, %v10042_v28  ;;  %v3614_v0 = vld [vmem:[#allocation3 + $0xf8] sm:$0xff] }
 0x29e   : > { %v7320_v36 = vpop.f32.mrb[143].mxu0  ;;  %v3421_v26 = vrot.slane %v3419_v6, 7  ;;  %v3549_v17 = vrot.slane %v3422_v40, 1  ;;  %v3412_v23 = vshrl.u32 %v3323_v45, 16  ;;  %v3415_v41 = vshll.u32 %v3323_v45, 16 }
 0x29f   : > { %v7607_v25 = vadd.f32 %v9853_v39, %v7318_v32  ;;  %v7321_v24 = vadd.f32 %v7320_v36, %v7319_v60  ;;  %v7617_v61 = vadd.f32 %v7616_v58, %v3139_v7  ;;  %v3307_v22 = vmax.f32 %v7611_v44, 0.0  ;;  %v10175_v58 = vld [vmem:[#allocation3 + $0x60] sm:$0xff]  ;;  %v10195_v7 = vld [vmem:[#allocation3 + $0x70] sm:$0xff] }
 0x2a0   : > { %v3424_v9 = vor.u32 %v3422_v40, %v3421_v26  ;;  %v3550_v48 = vor.u32 %v3549_v17, %v3419_v6  ;;  %v3414_v8 = vrot.slane %v3412_v23, 7  ;;  %v3547_v57 = vrot.slane %v3415_v41, 1  ;;  %v3617_v26 = vld [vmem:[#allocation3 + $0x108] sm:$0xff] }
 0x2a1   : > { %v7608_v1 = vadd.f32 %v7607_v25, %v7488_v37  ;;  %v7613_v28 = vadd.f32 %v9868_v38, %v7321_v24  ;;  %v3308_v51 = vmax.f32 %v7617_v61, 0.0  ;;  %v10215_v25 = vld [vmem:[#allocation3 + $0x90] sm:$0xff]  ;;  %v10220_v24 = vld [vmem:[#allocation3 + $0xa0] sm:$0xff] }
 0x2a2   : > { %v3498_v29 = vsel %vm9966_vm4, %v3424_v9, %v3497_v10  ;;  %v10172_v47 = vsel %vm9959_vm2, %v3550_v48, %v3611_v55  ;;  %v3417_v39 = vor.u32 %v3415_v41, %v3414_v8  ;;  %v3548_v56 = vor.u32 %v3547_v57, %v3412_v23  ;;  %v10210_v55 = vld [vmem:[#allocation3 + $0x80] sm:$0xff] }
 0x2a3   : > { %3499 = vst [vmem:[#allocation3 + $0xe0] sm:$0xff] %v3498_v29  ;;  %3613 = vst [vmem:[#allocation3 + $0xe8] sm:$0xff] %v10172_v47  ;;  %v7614_v43 = vadd.f32 %v7613_v28, %v7489_v5  ;;  %v3325_v27 = vpack.c.bf16 %v3308_v51, %v3307_v22  ;;  %v3309_v63 = vmax.f32 %v7608_v1, 0.0  ;;  %v10230_v9 = vld [vmem:[#allocation3 + $0xc0] sm:$0xff]  ;;  %v10253_v1 = vld [vmem:[#allocation3 + $0x28] sm:$0xff] }
 0x2a4   : > { %3520 = vst.msk [vmem:[#allocation3 + $0xe0] sm:$0xff] %vm3506_vm1, %v3324_v46  ;;  %v3495_v38 = vsel %vm9966_vm4, %v3417_v39, %v3494_v2  ;;  %v10182_v4 = vsel %vm9959_vm2, %v3548_v56, %v3608_v11  ;;  %3884 = vmatmul.mubr.bf16.gmra.mrb[168].mxu0 %v10175_v58  ;;  %v10225_v61 = vld [vmem:[#allocation3 + $0xb0] sm:$0xff]  ;;  %v10248_v2 = vld [vmem:[#allocation3 + $0x18] sm:$0xff]  ;;  %v8180_v11 = vld [vmem:[#allocation10 + $0xc0] sm:$0xff]  }
 0x2a5   : > { %3496 = vst [vmem:[#allocation3 + $0xd0] sm:$0xff] %v3495_v38  ;;  %3610 = vst [vmem:[#allocation3 + $0xd8] sm:$0xff] %v10182_v4  ;;  %v3310_v50 = vmax.f32 %v7614_v43, 0.0  ;;  %v3426_v62 = vshrl.u32 %v3325_v27, 16  ;;  %v3429_v3 = vshll.u32 %v3325_v27, 16  ;;  %6781 = vmatprep.mubr.msk.bf16.mxu0 %vm680_vm0, %v10089_v16  ;;  %v8181_v22 = vld [vmem:[#allocation10 + $0xc8] sm:$0xff]  }
 0x2a6   : > { %3519 = vst.msk [vmem:[#allocation3 + $0xd0] sm:$0xff] %vm3506_vm1, %v3323_v45  ;;  %v3503_v45 = vld [vmem:[#allocation3 + $0x100] sm:$0xff]  ;;  %v10257_v28 = vld [vmem:[#allocation3 + $0x110] sm:$0xff]  ;;  %v10262_v29 = vld [vmem:[#allocation3 + $0x38] sm:$0xff] }
 0x2a7   : > { %v3326_v46 = vpack.c.bf16 %v3310_v50, %v3309_v63  ;;  %v3428_v59 = vrot.slane %v3426_v62, 7  ;;  %v3551_v37 = vrot.slane %v3429_v3, 1  ;;  %v8182_v51 = vld [vmem:[#allocation10 + $0xd0] sm:$0xff]   ;;  %v8184_v39 = vld [vmem:[#allocation10 + $0xe0] sm:$0xff]   ;;  %v10269_v56 = vld [vmem:[#allocation3 + $0x48] sm:$0xff]  ;;  %5418 = vmatprep.subr.bf16.mxu1 %v10257_v28 }
 0x2a8   : > { %v8185_v43 = vld [vmem:[#allocation10 + $0xe8] sm:$0xff]   ;;  %v10276_v38 = vld [vmem:[#allocation3 + $0x58] sm:$0xff]  ;;  %v8188_v50 = vld [vmem:[#allocation10 + $0x100] sm:$0xff]   ;;  %5419 = vmatpush1.bf16.msra.mxu1 %v8193_v34 }
 0x2a9   : > { %v3433_v53 = vshrl.u32 %v3326_v46, 16  ;;  %v3436_v6 = vshll.u32 %v3326_v46, 16  ;;  %v3431_v40 = vor.u32 %v3429_v3, %v3428_v59  ;;  %v3552_v32 = vor.u32 %v3551_v37, %v3426_v62  ;;  %v8187_v63 = vld [vmem:[#allocation10 + $0xf8] sm:$0xff]   ;;  %v10283_v62 = vld [vmem:[#allocation3 + $0x68] sm:$0xff]  ;;  %5420 = vmatprep.subr.bf16.mxu1 %v10257_v28 }
 0x2aa   : > { %v8189_v3 = vld [vmem:[#allocation10 + $0x108] sm:$0xff]   ;;  %v8191_v59 = vld [vmem:[#allocation10 + $0x118] sm:$0xff]  }
 0x2ab   : > { %v3435_v60 = vrot.slane %v3433_v53, 7  ;;  %v3553_v5 = vrot.slane %v3436_v6, 1  ;;  %v3501_v44 = vsel %vm9966_vm4, %v3431_v40, %v3500_v42  ;;  %v10193_v36 = vsel %vm9959_vm2, %v3552_v32, %v3614_v0  ;;  %v10240_v8 = vld [vmem:[#allocation3 + $0xe0] sm:$0xff]  ;;  %v789_v42 = vld [vmem:[#allocation3 + $0x110] sm:$0x1] }
 0x2ac   : > { %3502 = vst [vmem:[#allocation3 + $0xf0] sm:$0xff] %v3501_v44  ;;  %3616 = vst [vmem:[#allocation3 + $0xf8] sm:$0xff] %v10193_v36  ;;  %3892 = vmatmul.mubr.bf16.gmra.mrb[172].mxu0 %v10195_v7  ;;  %v899_v0 = vld [vmem:[#allocation3 + $0x110] sm:$0x80]  ;;  %5421 = vmatpush1.bf16.msra.mxu1 %v8194_v15  ;;  %v8196_v32 = vld [vmem:[#allocation11 + $0x20] sm:$0xff]  }
 0x2ad   : > { %v3438_v17 = vor.u32 %v3436_v6, %v3435_v60  ;;  %v3554_v23 = vor.u32 %v3553_v5, %v3433_v53  ;;  %3521 = vst.msk [vmem:[#allocation3 + $0xf0] sm:$0xff] %vm3506_vm1, %v3325_v27  ;;  %6782 = vmatprep.mubr.msk.bf16.mxu0 %vm680_vm0, %v10080_v33  ;;  %v10235_v48 = vld [vmem:[#allocation3 + $0xd0] sm:$0xff]  ;;  %v790_v53 = vsel %vm8728_vm3, 0, %v789_v42  ;;  %v900_v6 = vsel %vm8737_vm6, 0, %v899_v0  ;;  %5422 = vmatprep.subr.bf16.mxu1 %v10257_v28  ;;  %v8197_v60 = vld [vmem:[#allocation11 + $0x28] sm:$0xff]   ;;  %v8199_v5 = vld [vmem:[#allocation11 + $0x38] sm:$0xff]  }
 0x2ae   : > { %v8186_v27 = vld [vmem:[#allocation10 + $0xf0] sm:$0xff]   ;;  %791 = vst [vmem:[#allocation3 + $0x110] sm:$0x1] %v790_v53  ;;  %901 = vst [vmem:[#allocation3 + $0x110] sm:$0x80] %v900_v6  ;;  %v10360_v44 = vld [vmem:[#allocation3 + $0x88] sm:$0xff] }
 0x2af   : > { %v3504_v41 = vsel %vm9966_vm4, %v3438_v17, %v3503_v45  ;;  %v10206_v10 = vsel %vm9959_vm2, %v3554_v23, %v3617_v26  ;;  %v8204_v26 = vld [vmem:[#allocation11 + $0x60] sm:$0xff]   ;;  %v8205_v17 = vld [vmem:[#allocation11 + $0x68] sm:$0xff]   ;;  %v8206_v23 = vld [vmem:[#allocation11 + $0x70] sm:$0xff]  }
 0x2b0   : > { %3505 = vst [vmem:[#allocation3 + $0x100] sm:$0xff] %v3504_v41  ;;  %3619 = vst [vmem:[#allocation3 + $0x108] sm:$0xff] %v10206_v10  ;;  %5423 = vmatpush1.bf16.msra.mxu1 %v8195_v19  ;;  %v8207_v41 = vld [vmem:[#allocation11 + $0x78] sm:$0xff]   ;;  %v5073_v15 = vld [vmem:[#allocation3 + $0x10] sm:$0xff] }
 0x2b1   : > { %3522 = vst.msk [vmem:[#allocation3 + $0x100] sm:$0xff] %vm3506_vm1, %v3326_v46  ;;  %v8190_v46 = vld [vmem:[#allocation10 + $0x110] sm:$0xff]   ;;  %5424 = vmatprep.subr.bf16.mxu1 %v10257_v28  ;;  %v8215_v53 = vld [vmem:[#allocation11 + $0xb8] sm:$0xff]  }
 0x2b4   : > { %3900 = vmatmul.mubr.bf16.gmra.mrb[176].mxu0 %v10210_v55  ;;  %v10245_v57 = vld [vmem:[#allocation3 + $0xf0] sm:$0xff]  ;;  %5425 = vmatpush1.bf16.msra.mxu1 %v8196_v32 }
 0x2b5   : > { %6783 = vmatprep.mubr.msk.bf16.mxu0 %vm680_vm0, %v10129_v49  ;;  %5426 = vmatprep.subr.bf16.mxu1 %v10257_v28 }
 0x2b8   : > { %v10328_v40 = vld [vmem:[#allocation3 + $0x100] sm:$0xff]  ;;  %5427 = vmatpush1.bf16.msra.mxu1 %v8197_v60 }
 0x2b9   : > { %5428 = vmatprep.subr.bf16.mxu1 %v10257_v28 }
 0x2bc   : > { %3908 = vmatmul.mubr.bf16.gmra.mrb[180].mxu0 %v10215_v25 }
 0x2bd   : > { %6784 = vmatprep.mubr.msk.bf16.mxu0 %vm680_vm0, %v10115_v52 }
 0x2c4   : > { %3916 = vmatmul.mubr.bf16.gmra.mrb[184].mxu0 %v10220_v24 }
 0x2c5   : > { %6785 = vmatprep.mubr.msk.bf16.mxu0 %vm680_vm0, %v10156_v20 }
 0x2cc   : > { %3924 = vmatmul.mubr.bf16.gmra.mrb[188].mxu0 %v10225_v61 }
 0x2cd   : > { %6786 = vmatprep.mubr.msk.bf16.mxu0 %vm680_vm0, %v10147_v18 }
 0x2d4   : > { %3932 = vmatmul.mubr.bf16.gmra.mrb[192].mxu0 %v10230_v9 }
 0x2d5   : > { %6787 = vmatprep.mubr.msk.bf16.mxu0 %vm680_vm0, %v10182_v4 }
 0x2dc   : > { %3940 = vmatmul.mubr.bf16.gmra.mrb[196].mxu0 %v10235_v48 }
 0x2dd   : > { %6788 = vmatprep.mubr.msk.bf16.mxu0 %vm680_vm0, %v10172_v47 }
 0x2e4   : > { %3948 = vmatmul.mubr.bf16.gmra.mrb[200].mxu0 %v10240_v8 }
 0x2e5   : > { %6789 = vmatprep.mubr.msk.bf16.mxu0 %vm680_vm0, %v10193_v36 }
 0x2ec   : > { %3956 = vmatmul.mubr.bf16.gmra.mrb[204].mxu0 %v10245_v57 }
 0x2ed   : > { %6802 = vmatprep.mubr.msk.bf16.mxu0 %vm680_vm0, %v10248_v2 }
 0x2f4   : > { %4206 = vmatmul.mubr.bf16.vlgmr.msra.gmra.mrb[144].mxu0 %v10016_v30  ;;  %v8183_v30 = vld [vmem:[#allocation10 + $0xd8] sm:$0xff]  }
 0x2f5   : > { %6803 = vmatprep.mubr.msk.bf16.mxu0 %vm680_vm0, %v10253_v1  ;;  %4609 = vmatpush1.bf16.msra.mxu0 %v8180_v11  ;;  %v8213_v11 = vld [vmem:[#allocation11 + $0xa8] sm:$0xff]  }
 0x2f6   : > { %4610 = vmatprep.subr.bf16.mxu0 %v10257_v28 }
 0x2f9   : > { %4611 = vmatpush1.bf16.msra.mxu0 %v8181_v22 }
 0x2fa   : > { %4612 = vmatprep.subr.bf16.mxu0 %v10257_v28 }
 0x2fc   : > { %4214 = vmatmul.mubr.bf16.gmra.mrb[148].mxu0 %v10050_v21 }
 0x2fd   : > { %6804 = vmatprep.mubr.msk.bf16.mxu0 %vm680_vm0, %v10262_v29  ;;  %4613 = vmatpush1.bf16.msra.mxu0 %v8182_v51 }
 0x2fe   : > { %4614 = vmatprep.subr.bf16.mxu0 %v10257_v28 }
 0x301   : > { %4615 = vmatpush1.bf16.msra.mxu0 %v8183_v30 }
 0x302   : > { %4616 = vmatprep.subr.bf16.mxu0 %v10257_v28 }
 0x304   : > { %4222 = vmatmul.mubr.bf16.gmra.mrb[152].mxu0 %v10092_v54 }
 0x305   : > { %6805 = vmatprep.mubr.msk.bf16.mxu0 %vm680_vm0, %v10269_v56  ;;  %4617 = vmatpush1.bf16.msra.mxu0 %v8184_v39 }
 0x306   : > { %4618 = vmatprep.subr.bf16.mxu0 %v10257_v28 }
 0x309   : > { %4619 = vmatpush1.bf16.msra.mxu0 %v8185_v43 }
 0x30a   : > { %4620 = vmatprep.subr.bf16.mxu0 %v10257_v28 }
 0x30c   : > { %4230 = vmatmul.mubr.bf16.gmra.mrb[156].mxu0 %v10122_v14 }
 0x30d   : > { %6806 = vmatprep.mubr.msk.bf16.mxu0 %vm680_vm0, %v10276_v38  ;;  %4621 = vmatpush1.bf16.msra.mxu0 %v8186_v27 }
 0x30e   : > { %4622 = vmatprep.subr.bf16.mxu0 %v10257_v28 }
 0x311   : > { %4623 = vmatpush1.bf16.msra.mxu0 %v8187_v63 }
 0x312   : > { %4624 = vmatprep.subr.bf16.mxu0 %v10257_v28 }
 0x314   : > { %4238 = vmatmul.mubr.bf16.gmra.mrb[160].mxu0 %v10158_v12 }
 0x315   : > { %6807 = vmatprep.mubr.msk.bf16.mxu0 %vm680_vm0, %v10283_v62  ;;  %4625 = vmatpush1.bf16.msra.mxu0 %v8188_v50 }
 0x316   : > { %4626 = vmatprep.subr.bf16.mxu0 %v10257_v28 }
 0x319   : > { %4627 = vmatpush1.bf16.msra.mxu0 %v8189_v3 }
 0x31a   : > { %4628 = vmatprep.subr.bf16.mxu0 %v10257_v28 }
 0x31c   : > { %4246 = vmatmul.mubr.bf16.gmra.mrb[164].mxu0 %v10175_v58 }
 0x31d   : > { %6808 = vmatprep.mubr.msk.bf16.mxu0 %vm680_vm0, %v10089_v16  ;;  %4629 = vmatpush1.bf16.msra.mxu0 %v8190_v46  ;;  %v902_v16 = vld [vmem:[#allocation3 + $0x118] sm:$0x80] }
 0x31e   : > { %4630 = vmatprep.subr.bf16.mxu0 %v10257_v28  ;;  %v903_v37 = vsel %vm9599_vm15, 0, %v902_v16 }
 0x31f   : > { %904 = vst [vmem:[#allocation3 + $0x118] sm:$0x80] %v903_v37 }
 0x321   : > { %4631 = vmatpush1.bf16.msra.mxu0 %v8191_v59 }
 0x324   : > { %4254 = vmatmul.mubr.bf16.gmra.mrb[168].mxu0 %v10195_v7 }
 0x325   : > { %6809 = vmatprep.mubr.msk.bf16.mxu0 %vm680_vm0, %v10080_v33  ;;  %v792_v33 = vld [vmem:[#allocation3 + $0x118] sm:$0x1] }
 0x32c   : > { %4262 = vmatmul.mubr.bf16.gmra.mrb[172].mxu0 %v10210_v55 }
 0x32d   : > { %6810 = vmatprep.mubr.msk.bf16.mxu0 %vm680_vm0, %v10129_v49 }
 0x334   : > { %4270 = vmatmul.mubr.bf16.gmra.mrb[176].mxu0 %v10215_v25 }
 0x335   : > { %6811 = vmatprep.mubr.msk.bf16.mxu0 %vm680_vm0, %v10115_v52  ;;  %v793_v52 = vsel %vm9592_vm14, 0, %v792_v33  ;;  %v8214_v33 = vld [vmem:[#allocation11 + $0xb0] sm:$0xff]  }
 0x336   : > { %794 = vst [vmem:[#allocation3 + $0x118] sm:$0x1] %v793_v52 }
 0x33c   : > { %4278 = vmatmul.mubr.bf16.gmra.mrb[180].mxu0 %v10220_v24 }
 0x33d   : > { %6812 = vmatprep.mubr.msk.bf16.mxu0 %vm680_vm0, %v10156_v20  ;;  %v4462_v45 = vld [vmem:[#allocation3 + $0x118] sm:$0xff] }
 0x344   : > { %4286 = vmatmul.mubr.bf16.gmra.mrb[184].mxu0 %v10225_v61 }
 0x345   : > { %6813 = vmatprep.mubr.msk.bf16.mxu0 %vm680_vm0, %v10147_v18 }
 0x34c   : > { %4294 = vmatmul.mubr.bf16.gmra.mrb[188].mxu0 %v10230_v9 }
 0x34d   : > { %6814 = vmatprep.mubr.msk.bf16.mxu0 %vm680_vm0, %v10182_v4 }
 0x354   : > { %4302 = vmatmul.mubr.bf16.gmra.mrb[192].mxu0 %v10235_v48 }
 0x355   : > { %6815 = vmatprep.mubr.msk.bf16.mxu0 %vm680_vm0, %v10172_v47 }
 0x35c   : > { %4310 = vmatmul.mubr.bf16.gmra.mrb[196].mxu0 %v10240_v8 }
 0x35d   : > { %6816 = vmatprep.mubr.msk.bf16.mxu0 %vm680_vm0, %v10193_v36 }
 0x364   : > { %4318 = vmatmul.mubr.bf16.gmra.mrb[200].mxu0 %v10245_v57 }
 0x365   : > { %6817 = vmatprep.mubr.msk.bf16.mxu0 %vm680_vm0, %v10206_v10 }
 0x36c   : > { %4326 = vmatmul.mubr.bf16.gmra.mrb[204].mxu0 %v10328_v40 }
 0x36d   : > { %6830 = vmatprep.mubr.msk.bf16.mxu0 %vm680_vm0, %v10253_v1 }
 0x374   : > { %4641 = vmatmul.mubr.bf16.vlgmr.msra.gmra.mrb[144].mxu0 %v10050_v21  ;;  %v8198_v21 = vld [vmem:[#allocation11 + $0x30] sm:$0xff]  }
 0x375   : > { %6831 = vmatprep.mubr.msk.bf16.mxu0 %vm680_vm0, %v10262_v29  ;;  %5429 = vmatpush1.bf16.msra.mxu1 %v8198_v21 }
 0x376   : > { %5430 = vmatprep.subr.bf16.mxu1 %v10257_v28 }
 0x379   : > { %5431 = vmatpush1.bf16.msra.mxu1 %v8199_v5 }
 0x37a   : > { %5432 = vmatprep.subr.bf16.mxu1 %v10257_v28 }
 0x37c   : > { %4649 = vmatmul.mubr.bf16.gmra.mrb[148].mxu0 %v10092_v54  ;;  %v8200_v54 = vld [vmem:[#allocation11 + $0x40] sm:$0xff]  }
 0x37d   : > { %6832 = vmatprep.mubr.msk.bf16.mxu0 %vm680_vm0, %v10269_v56  ;;  %5433 = vmatpush1.bf16.msra.mxu1 %v8200_v54 }
 0x37e   : > { %5434 = vmatprep.subr.bf16.mxu1 %v10257_v28 }
 0x384   : > { %4657 = vmatmul.mubr.bf16.gmra.mrb[152].mxu0 %v10122_v14  ;;  %v10355_v14 = vld [vmem:[#allocation3 + $0x78] sm:$0xff] }
 0x385   : > { %6833 = vmatprep.mubr.msk.bf16.mxu0 %vm680_vm0, %v10276_v38 }
 0x38c   : > { %4665 = vmatmul.mubr.bf16.gmra.mrb[156].mxu0 %v10158_v12  ;;  %v10368_v12 = vld [vmem:[#allocation3 + $0xa8] sm:$0xff] }
 0x38d   : > { %6834 = vmatprep.mubr.msk.bf16.mxu0 %vm680_vm0, %v10283_v62 }
 0x394   : > { %4673 = vmatmul.mubr.bf16.gmra.mrb[160].mxu0 %v10175_v58 }
 0x395   : > { %6835 = vmatprep.mubr.msk.bf16.mxu0 %vm680_vm0, %v10355_v14 }
 0x39c   : > { %4681 = vmatmul.mubr.bf16.gmra.mrb[164].mxu0 %v10195_v7 }
 0x39d   : > { %6836 = vmatprep.mubr.msk.bf16.mxu0 %vm680_vm0, %v10360_v44 }
 0x3a4   : > { %4689 = vmatmul.mubr.bf16.gmra.mrb[168].mxu0 %v10210_v55  ;;  %v8209_v55 = vld [vmem:[#allocation11 + $0x88] sm:$0xff]  }
 0x3a5   : > { %6837 = vmatprep.mubr.msk.bf16.mxu0 %vm680_vm0, %v10129_v49  ;;  %v8201_v49 = vld [vmem:[#allocation11 + $0x48] sm:$0xff]  }
 0x3a6   : > { %5435 = vmatpush1.bf16.msra.mxu1 %v8201_v49 }
 0x3a7   : > { %5436 = vmatprep.subr.bf16.mxu1 %v10257_v28 }
 0x3ac   : > { %4697 = vmatmul.mubr.bf16.gmra.mrb[172].mxu0 %v10215_v25  ;;  %v8210_v25 = vld [vmem:[#allocation11 + $0x90] sm:$0xff]  }
 0x3ad   : > { %6838 = vmatprep.mubr.msk.bf16.mxu0 %vm680_vm0, %v10368_v12 }
 0x3b4   : > { %4705 = vmatmul.mubr.bf16.gmra.mrb[176].mxu0 %v10220_v24  ;;  %v8211_v24 = vld [vmem:[#allocation11 + $0x98] sm:$0xff]  }
 0x3b5   : > { %6839 = vmatprep.mubr.msk.bf16.mxu0 %vm680_vm0, %v10156_v20  ;;  %v8202_v20 = vld [vmem:[#allocation11 + $0x50] sm:$0xff]  }
 0x3b6   : > { %5437 = vmatpush1.bf16.msra.mxu1 %v8202_v20 }
 0x3b7   : > { %5438 = vmatprep.subr.bf16.mxu1 %v10257_v28 }
 0x3bc   : > { %4713 = vmatmul.mubr.bf16.gmra.mrb[180].mxu0 %v10225_v61  ;;  %v8212_v61 = vld [vmem:[#allocation11 + $0xa0] sm:$0xff]  }
 0x3bd   : > { %6840 = vmatprep.mubr.msk.bf16.mxu0 %vm680_vm0, %v10147_v18  ;;  %v8203_v18 = vld [vmem:[#allocation11 + $0x58] sm:$0xff]  }
 0x3be   : > { %5439 = vmatpush1.bf16.msra.mxu1 %v8203_v18 }
 0x3bf   : > { %5786 = vmatprep.subr.bf16.mxu1 %v10257_v28 }
 0x3c4   : > { %4721 = vmatmul.mubr.bf16.gmra.mrb[184].mxu0 %v10230_v9  ;;  %v10408_v9 = vld [vmem:[%s10920_s5] ss:$0 sm:$0xff] }
 0x3c5   : > { %6841 = vmatprep.mubr.msk.bf16.mxu0 %vm680_vm0, %v10182_v4  ;;  %v5234_v4 = vld [vmem:[#allocation3 + $0x8] sm:$0xff] }
 0x3c6   : > { %6859 = vmatprep.mubr.msk.bf16.mxu1 %vm680_vm0, %v5234_v4 }
 0x3cc   : > { %4729 = vmatmul.mubr.bf16.gmra.mrb[188].mxu0 %v10235_v48 }
 0x3cd   : > { %6842 = vmatprep.mubr.msk.bf16.mxu0 %vm680_vm0, %v10172_v47  ;;  %v5233_v47 = vld [vmem:[#allocation3] sm:$0xff] }
 0x3ce   : > { %5449 = vmatmul.mubr.bf16.vlgmr.msra.gmra.mrb[96].mxu1 %v5233_v47 }
 0x3cf   : > { %5787 = vmatpush1.bf16.msra.mxu1 %v8204_v26 }
 0x3d0   : > { %5788 = vmatprep.subr.bf16.mxu1 %v10257_v28 }
 0x3d3   : > { %5789 = vmatpush1.bf16.msra.mxu1 %v8205_v17 }
 0x3d4   : > { %4737 = vmatmul.mubr.bf16.gmra.mrb[192].mxu0 %v10240_v8  ;;  %5790 = vmatprep.subr.bf16.mxu1 %v10257_v28 }
 0x3d5   : > { %6843 = vmatprep.mubr.msk.bf16.mxu0 %vm680_vm0, %v10193_v36  ;;  %v4461_v36 = vld [vmem:[#allocation3 + $0x110] sm:$0xff] }
 0x3d7   : > { %5791 = vmatpush1.bf16.msra.mxu1 %v8206_v23 }
 0x3d8   : > { %5792 = vmatprep.subr.bf16.mxu1 %v10257_v28 }
 0x3db   : > { %5793 = vmatpush1.bf16.msra.mxu1 %v8207_v41  ;;  %v5076_v41 = vld [vmem:[#allocation3 + $0x20] sm:$0xff] }
 0x3dc   : > { %4745 = vmatmul.mubr.bf16.gmra.mrb[196].mxu0 %v10245_v57  ;;  %5794 = vmatprep.subr.bf16.mxu1 %v10257_v28 }
 0x3dd   : > { %6844 = vmatprep.mubr.msk.bf16.mxu0 %vm680_vm0, %v10206_v10  ;;  %v8208_v10 = vld [vmem:[#allocation11 + $0x80] sm:$0xff]  }
 0x3df   : > { %5795 = vmatpush1.bf16.msra.mxu1 %v8208_v10 }
 0x3e0   : > { %5796 = vmatprep.subr.bf16.mxu1 %v10257_v28 }
 0x3e3   : > { %5797 = vmatpush1.bf16.msra.mxu1 %v8209_v55 }
 0x3e4   : > { %4753 = vmatmul.mubr.bf16.gmra.mrb[200].mxu0 %v10328_v40  ;;  %5798 = vmatprep.subr.bf16.mxu1 %v10257_v28 }
 0x3e5   : > { %6845 = vmatprep.mubr.msk.bf16.mxu0 %vm680_vm0, %v4462_v45 }
 0x3e7   : > { %5799 = vmatpush1.bf16.msra.mxu1 %v8210_v25 }
 0x3e8   : > { %5800 = vmatprep.subr.bf16.mxu1 %v10257_v28 }
 0x3eb   : > { %5801 = vmatpush1.bf16.msra.mxu1 %v8211_v24 }
 0x3ec   : > { %4761 = vmatmul.mubr.bf16.gmra.mrb[204].mxu0 %v4461_v36  ;;  %5802 = vmatprep.subr.bf16.mxu1 %v10257_v28 }
 0x3ef   : > { %5803 = vmatpush1.bf16.msra.mxu1 %v8212_v61 }
 0x3f0   : > { %5804 = vmatprep.subr.bf16.mxu1 %v10257_v28 }
 0x3f3   : > { %5805 = vmatpush1.bf16.msra.mxu1 %v8213_v11 }
 0x3f4   : > { %5806 = vmatprep.subr.bf16.mxu1 %v10257_v28 }
 0x3f7   : > { %5807 = vmatpush1.bf16.msra.mxu1 %v8214_v33 }
 0x3f8   : > { %5808 = vmatprep.subr.bf16.mxu1 %v10257_v28 }
 0x3fb   : > { %5809 = vmatpush1.bf16.msra.mxu1 %v8215_v53 }
 0x3fc   : > { %6220 = vmatprep.subr.bf16.mxu1 %v10257_v28 }
 0x447   : > { %v4642_v48 = vpop.f32.mrb[144].mxu0 }
 0x448   : > { %v7618_v8 = vadd.f32 %v10408_v9, %v4642_v48  ;;  %v4644_v57 = vpop.f32.mrb[145].mxu0 }
 0x449   : > { %v4645_v22 = vpop.f32.mrb[146].mxu0 }
 0x44a   : > { %v7619_v51 = vadd.f32 %v10408_v9, %v4645_v22  ;;  %v4647_v30 = vpop.f32.mrb[147].mxu0  ;;  %v4897_v39 = vmax.f32 %v7618_v8, 0.0 }
 0x44c   : > { %v4898_v43 = vmax.f32 %v7619_v51, 0.0 }
 0x44e   : > { %v4929_v27 = vpack.c.bf16 %v4898_v43, %v4897_v39 }
 0x44f   : > { %v4650_v63 = vpop.f32.mrb[148].mxu0 }
 0x450   : > { %v4946_v50 = vshrl.u32 %v4929_v27, 16  ;;  %v4949_v3 = vshll.u32 %v4929_v27, 16  ;;  %v7620_v46 = vadd.f32 %v10408_v9, %v4650_v63  ;;  %v4652_v59 = vpop.f32.mrb[149].mxu0 }
 0x451   : > { %v4653_v16 = vpop.f32.mrb[150].mxu0 }
 0x452   : > { %v4948_v52 = vrot.slane %v4946_v50, 7  ;;  %v5137_v37 = vrot.slane %v4949_v3, 1  ;;  %v7621_v42 = vadd.f32 %v10408_v9, %v4653_v16  ;;  %v4655_v0 = vpop.f32.mrb[151].mxu0  ;;  %v4899_v35 = vmax.f32 %v7620_v46, 0.0 }
 0x454   : > { %v4951_v6 = vor.u32 %v4949_v3, %v4948_v52  ;;  %v5138_v40 = vor.u32 %v5137_v37, %v4946_v50  ;;  %v4900_v34 = vmax.f32 %v7621_v42, 0.0  ;;  %v5079_v3 = vld [vmem:[#allocation3 + $0x30] sm:$0xff] }
 0x456   : > { %v5074_v19 = vsel %vm9966_vm4, %v4951_v6, %v5073_v15  ;;  %v10421_v32 = vsel %vm9959_vm2, %v5138_v40, %v10248_v2  ;;  %v4930_v60 = vpack.c.bf16 %v4900_v34, %v4899_v35 }
 0x457   : > { %5075 = vst [vmem:[#allocation3 + $0x10] sm:$0xff] %v5074_v19  ;;  %5187 = vst [vmem:[#allocation3 + $0x18] sm:$0xff] %v10421_v32  ;;  %v4658_v21 = vpop.f32.mrb[152].mxu0  ;;  %6860 = vmatprep.mubr.msk.bf16.mxu1 %vm680_vm0, %v10421_v32 }
 0x458   : > { %5121 = vst.msk [vmem:[#allocation3 + $0x10] sm:$0xff] %vm3506_vm1, %v4929_v27  ;;  %v4953_v5 = vshrl.u32 %v4930_v60, 16  ;;  %v4956_v54 = vshll.u32 %v4930_v60, 16  ;;  %v7622_v49 = vadd.f32 %v10408_v9, %v4658_v21  ;;  %v4660_v20 = vpop.f32.mrb[153].mxu0 }
 0x459   : > { %v4661_v2 = vpop.f32.mrb[154].mxu0 }
 0x45a   : > { %v4955_v18 = vrot.slane %v4953_v5, 7  ;;  %v5139_v4 = vrot.slane %v4956_v54, 1  ;;  %v7623_v47 = vadd.f32 %v10408_v9, %v4661_v2  ;;  %v4663_v45 = vpop.f32.mrb[155].mxu0  ;;  %v4901_v17 = vmax.f32 %v7622_v49, 0.0 }
 0x45c   : > { %v4958_v26 = vor.u32 %v4956_v54, %v4955_v18  ;;  %v5140_v36 = vor.u32 %v5139_v4, %v4953_v5  ;;  %v4902_v23 = vmax.f32 %v7623_v47, 0.0  ;;  %v5082_v5 = vld [vmem:[#allocation3 + $0x40] sm:$0xff] }
 0x45e   : > { %v5077_v10 = vsel %vm9966_vm4, %v4958_v26, %v5076_v41  ;;  %v10435_v55 = vsel %vm9959_vm2, %v5140_v36, %v10253_v1  ;;  %v4931_v25 = vpack.c.bf16 %v4902_v23, %v4901_v17 }
 0x45f   : > { %5078 = vst [vmem:[#allocation3 + $0x20] sm:$0xff] %v5077_v10  ;;  %5190 = vst [vmem:[#allocation3 + $0x28] sm:$0xff] %v10435_v55  ;;  %v4666_v24 = vpop.f32.mrb[156].mxu0  ;;  %v10438_v61 = vld [vmem:[#allocation3 + $0x10] sm:$0xff] }
 0x460   : > { %5122 = vst.msk [vmem:[#allocation3 + $0x20] sm:$0xff] %vm3506_vm1, %v4930_v60  ;;  %v4960_v48 = vshrl.u32 %v4931_v25, 16  ;;  %v4963_v8 = vshll.u32 %v4931_v25, 16  ;;  %v7624_v57 = vadd.f32 %v10408_v9, %v4666_v24  ;;  %v4668_v11 = vpop.f32.mrb[157].mxu0  ;;  %5457 = vmatmul.mubr.bf16.gmra.mrb[100].mxu1 %v10438_v61 }
 0x461   : > { %v4669_v22 = vpop.f32.mrb[158].mxu0  ;;  %6861 = vmatprep.mubr.msk.bf16.mxu1 %vm680_vm0, %v10435_v55 }
 0x462   : > { %v4962_v1 = vrot.slane %v4960_v48, 7  ;;  %v5141_v51 = vrot.slane %v4963_v8, 1  ;;  %v7625_v30 = vadd.f32 %v10408_v9, %v4669_v22  ;;  %v4671_v39 = vpop.f32.mrb[159].mxu0  ;;  %v4903_v63 = vmax.f32 %v7624_v57, 0.0 }
 0x464   : > { %v4965_v43 = vor.u32 %v4963_v8, %v4962_v1  ;;  %v5142_v27 = vor.u32 %v5141_v51, %v4960_v48  ;;  %v4904_v50 = vmax.f32 %v7625_v30, 0.0  ;;  %v5085_v8 = vld [vmem:[#allocation3 + $0x50] sm:$0xff] }
 0x466   : > { %v5080_v46 = vsel %vm9966_vm4, %v4965_v43, %v5079_v3  ;;  %v10451_v59 = vsel %vm9959_vm2, %v5142_v27, %v10262_v29  ;;  %v4932_v33 = vpack.c.bf16 %v4904_v50, %v4903_v63 }
 0x467   : > { %5081 = vst [vmem:[#allocation3 + $0x30] sm:$0xff] %v5080_v46  ;;  %5193 = vst [vmem:[#allocation3 + $0x38] sm:$0xff] %v10451_v59  ;;  %v4674_v16 = vpop.f32.mrb[160].mxu0  ;;  %v10454_v52 = vld [vmem:[#allocation3 + $0x20] sm:$0xff] }
 0x468   : > { %5123 = vst.msk [vmem:[#allocation3 + $0x30] sm:$0xff] %vm3506_vm1, %v4931_v25  ;;  %v4967_v37 = vshrl.u32 %v4932_v33, 16  ;;  %v4970_v42 = vshll.u32 %v4932_v33, 16  ;;  %v7626_v0 = vadd.f32 %v10408_v9, %v4674_v16  ;;  %v4676_v53 = vpop.f32.mrb[161].mxu0  ;;  %5465 = vmatmul.mubr.bf16.gmra.mrb[104].mxu1 %v10454_v52 }
 0x469   : > { %v4677_v6 = vpop.f32.mrb[162].mxu0  ;;  %6862 = vmatprep.mubr.msk.bf16.mxu1 %vm680_vm0, %v10451_v59 }
 0x46a   : > { %v4969_v29 = vrot.slane %v4967_v37, 7  ;;  %v5143_v40 = vrot.slane %v4970_v42, 1  ;;  %v7627_v35 = vadd.f32 %v10408_v9, %v4677_v6  ;;  %v4679_v34 = vpop.f32.mrb[163].mxu0  ;;  %v4905_v60 = vmax.f32 %v7626_v0, 0.0 }
 0x46c   : > { %v4972_v15 = vor.u32 %v4970_v42, %v4969_v29  ;;  %v5144_v19 = vor.u32 %v5143_v40, %v4967_v37  ;;  %v4906_v21 = vmax.f32 %v7627_v35, 0.0 }
 0x46e   : > { %v5083_v54 = vsel %vm9966_vm4, %v4972_v15, %v5082_v5  ;;  %v10467_v49 = vsel %vm9959_vm2, %v5144_v19, %v10269_v56  ;;  %v4933_v20 = vpack.c.bf16 %v4906_v21, %v4905_v60 }
 0x46f   : > { %5084 = vst [vmem:[#allocation3 + $0x40] sm:$0xff] %v5083_v54  ;;  %5196 = vst [vmem:[#allocation3 + $0x48] sm:$0xff] %v10467_v49  ;;  %v4682_v2 = vpop.f32.mrb[164].mxu0  ;;  %v10470_v18 = vld [vmem:[#allocation3 + $0x30] sm:$0xff] }
 0x470   : > { %5124 = vst.msk [vmem:[#allocation3 + $0x40] sm:$0xff] %vm3506_vm1, %v4932_v33  ;;  %v4974_v4 = vshrl.u32 %v4933_v20, 16  ;;  %v4977_v47 = vshll.u32 %v4933_v20, 16  ;;  %v7628_v45 = vadd.f32 %v10408_v9, %v4682_v2  ;;  %v4684_v26 = vpop.f32.mrb[165].mxu0  ;;  %5473 = vmatmul.mubr.bf16.gmra.mrb[108].mxu1 %v10470_v18 }
 0x471   : > { %v4685_v36 = vpop.f32.mrb[166].mxu0  ;;  %6863 = vmatprep.mubr.msk.bf16.mxu1 %vm680_vm0, %v10467_v49 }
 0x472   : > { %v4976_v56 = vrot.slane %v4974_v4, 7  ;;  %v5145_v17 = vrot.slane %v4977_v47, 1  ;;  %v7629_v23 = vadd.f32 %v10408_v9, %v4685_v36  ;;  %v4687_v41 = vpop.f32.mrb[167].mxu0  ;;  %v4907_v24 = vmax.f32 %v7628_v45, 0.0 }
 0x474   : > { %v4979_v10 = vor.u32 %v4977_v47, %v4976_v56  ;;  %v5146_v25 = vor.u32 %v5145_v17, %v4974_v4  ;;  %v4908_v48 = vmax.f32 %v7629_v23, 0.0 }
 0x476   : > { %v5086_v57 = vsel %vm9966_vm4, %v4979_v10, %v5085_v8  ;;  %v10483_v11 = vsel %vm9959_vm2, %v5146_v25, %v10276_v38  ;;  %v4934_v22 = vpack.c.bf16 %v4908_v48, %v4907_v24 }
 0x477   : > { %5087 = vst [vmem:[#allocation3 + $0x50] sm:$0xff] %v5086_v57  ;;  %5199 = vst [vmem:[#allocation3 + $0x58] sm:$0xff] %v10483_v11  ;;  %v4690_v1 = vpop.f32.mrb[168].mxu0  ;;  %v10486_v51 = vld [vmem:[#allocation3 + $0x40] sm:$0xff] }
 0x478   : > { %5125 = vst.msk [vmem:[#allocation3 + $0x50] sm:$0xff] %vm3506_vm1, %v4933_v20  ;;  %v4981_v30 = vshrl.u32 %v4934_v22, 16  ;;  %v4984_v39 = vshll.u32 %v4934_v22, 16  ;;  %v7630_v43 = vadd.f32 %v10408_v9, %v4690_v1  ;;  %v4692_v27 = vpop.f32.mrb[169].mxu0  ;;  %5481 = vmatmul.mubr.bf16.gmra.mrb[112].mxu1 %v10486_v51 }
 0x479   : > { %v4693_v63 = vpop.f32.mrb[170].mxu0  ;;  %6864 = vmatprep.mubr.msk.bf16.mxu1 %vm680_vm0, %v10483_v11 }
 0x47a   : > { %v4983_v38 = vrot.slane %v4981_v30, 7  ;;  %v5147_v50 = vrot.slane %v4984_v39, 1  ;;  %v7631_v3 = vadd.f32 %v10408_v9, %v4693_v63  ;;  %v4695_v46 = vpop.f32.mrb[171].mxu0  ;;  %v4909_v37 = vmax.f32 %v7630_v43, 0.0 }
 0x47c   : > { %v4986_v33 = vor.u32 %v4984_v39, %v4983_v38  ;;  %v5148_v16 = vor.u32 %v5147_v50, %v4981_v30  ;;  %v4910_v42 = vmax.f32 %v7631_v3, 0.0  ;;  %v5094_v30 = vld [vmem:[#allocation3 + $0x80] sm:$0xff] }
 0x47e   : > { %v5089_v0 = vsel %vm9966_vm4, %v4986_v33, %v10175_v58  ;;  %v10500_v53 = vsel %vm9959_vm2, %v5148_v16, %v10283_v62  ;;  %v4935_v6 = vpack.c.bf16 %v4910_v42, %v4909_v37 }
 0x47f   : > { %5090 = vst [vmem:[#allocation3 + $0x60] sm:$0xff] %v5089_v0  ;;  %5202 = vst [vmem:[#allocation3 + $0x68] sm:$0xff] %v10500_v53  ;;  %v4698_v29 = vpop.f32.mrb[172].mxu0  ;;  %v10503_v40 = vld [vmem:[#allocation3 + $0x50] sm:$0xff] }
 0x480   : > { %5126 = vst.msk [vmem:[#allocation3 + $0x60] sm:$0xff] %vm3506_vm1, %v4934_v22  ;;  %v4988_v35 = vshrl.u32 %v4935_v6, 16  ;;  %v4991_v34 = vshll.u32 %v4935_v6, 16  ;;  %v7632_v15 = vadd.f32 %v10408_v9, %v4698_v29  ;;  %v4700_v19 = vpop.f32.mrb[173].mxu0  ;;  %5489 = vmatmul.mubr.bf16.gmra.mrb[116].mxu1 %v10503_v40 }
 0x481   : > { %v4701_v58 = vpop.f32.mrb[174].mxu0  ;;  %6865 = vmatprep.mubr.msk.bf16.mxu1 %vm680_vm0, %v10500_v53  ;;  %v5209_v19 = vld [vmem:[#allocation3 + $0x98] sm:$0xff] }
 0x482   : > { %v4990_v62 = vrot.slane %v4988_v35, 7  ;;  %v5149_v60 = vrot.slane %v4991_v34, 1  ;;  %v7633_v21 = vadd.f32 %v10408_v9, %v4701_v58  ;;  %v4703_v5 = vpop.f32.mrb[175].mxu0  ;;  %v4911_v2 = vmax.f32 %v7632_v15, 0.0  ;;  %v5097_v15 = vld [vmem:[#allocation3 + $0x90] sm:$0xff] }
 0x484   : > { %v4993_v54 = vor.u32 %v4991_v34, %v4990_v62  ;;  %v5150_v20 = vor.u32 %v5149_v60, %v4988_v35  ;;  %v4912_v4 = vmax.f32 %v7633_v21, 0.0 }
 0x486   : > { %v5092_v47 = vsel %vm9966_vm4, %v4993_v54, %v10195_v7  ;;  %v10517_v45 = vsel %vm9959_vm2, %v5150_v20, %v10355_v14  ;;  %v4936_v26 = vpack.c.bf16 %v4912_v4, %v4911_v2 }
 0x487   : > { %5093 = vst [vmem:[#allocation3 + $0x70] sm:$0xff] %v5092_v47  ;;  %5205 = vst [vmem:[#allocation3 + $0x78] sm:$0xff] %v10517_v45  ;;  %v4706_v36 = vpop.f32.mrb[176].mxu0  ;;  %v10520_v56 = vld [vmem:[#allocation3 + $0x60] sm:$0xff] }
 0x488   : > { %5127 = vst.msk [vmem:[#allocation3 + $0x70] sm:$0xff] %vm3506_vm1, %v4935_v6  ;;  %v4995_v17 = vshrl.u32 %v4936_v26, 16  ;;  %v4998_v23 = vshll.u32 %v4936_v26, 16  ;;  %v7634_v41 = vadd.f32 %v10408_v9, %v4706_v36  ;;  %v4708_v10 = vpop.f32.mrb[177].mxu0  ;;  %5497 = vmatmul.mubr.bf16.gmra.mrb[120].mxu1 %v10520_v56 }
 0x489   : > { %v4709_v7 = vpop.f32.mrb[178].mxu0  ;;  %6866 = vmatprep.mubr.msk.bf16.mxu1 %vm680_vm0, %v10517_v45 }
 0x48a   : > { %v4997_v14 = vrot.slane %v4995_v17, 7  ;;  %v5151_v25 = vrot.slane %v4998_v23, 1  ;;  %v7635_v24 = vadd.f32 %v10408_v9, %v4709_v7  ;;  %v4711_v48 = vpop.f32.mrb[179].mxu0  ;;  %v4913_v22 = vmax.f32 %v7634_v41, 0.0 }
 0x48c   : > { %v5000_v8 = vor.u32 %v4998_v23, %v4997_v14  ;;  %v5152_v57 = vor.u32 %v5151_v25, %v4995_v17  ;;  %v4914_v1 = vmax.f32 %v7635_v24, 0.0  ;;  %v5100_v25 = vld [vmem:[#allocation3 + $0xa0] sm:$0xff] }
 0x48e   : > { %v5095_v39 = vsel %vm9966_vm4, %v5000_v8, %v5094_v30  ;;  %v10533_v43 = vsel %vm9959_vm2, %v5152_v57, %v10360_v44  ;;  %v4937_v27 = vpack.c.bf16 %v4914_v1, %v4913_v22 }
 0x48f   : > { %5096 = vst [vmem:[#allocation3 + $0x80] sm:$0xff] %v5095_v39  ;;  %5208 = vst [vmem:[#allocation3 + $0x88] sm:$0xff] %v10533_v43  ;;  %v4714_v63 = vpop.f32.mrb[180].mxu0  ;;  %v10536_v38 = vld [vmem:[#allocation3 + $0x70] sm:$0xff] }
 0x490   : > { %5128 = vst.msk [vmem:[#allocation3 + $0x80] sm:$0xff] %vm3506_vm1, %v4936_v26  ;;  %v5002_v50 = vshrl.u32 %v4937_v27, 16  ;;  %v5005_v3 = vshll.u32 %v4937_v27, 16  ;;  %v7636_v46 = vadd.f32 %v10408_v9, %v4714_v63  ;;  %v4716_v33 = vpop.f32.mrb[181].mxu0  ;;  %5505 = vmatmul.mubr.bf16.gmra.mrb[124].mxu1 %v10536_v38 }
 0x491   : > { %v4717_v16 = vpop.f32.mrb[182].mxu0  ;;  %6867 = vmatprep.mubr.msk.bf16.mxu1 %vm680_vm0, %v10533_v43 }
 0x492   : > { %v5004_v44 = vrot.slane %v5002_v50, 7  ;;  %v5153_v37 = vrot.slane %v5005_v3, 1  ;;  %v7637_v42 = vadd.f32 %v10408_v9, %v4717_v16  ;;  %v4719_v0 = vpop.f32.mrb[183].mxu0  ;;  %v4915_v35 = vmax.f32 %v7636_v46, 0.0 }
 0x493   : > { %v5215_v0 = vld [vmem:[#allocation3 + $0xb8] sm:$0xff] }
 0x494   : > { %v5007_v6 = vor.u32 %v5005_v3, %v5004_v44  ;;  %v5154_v29 = vor.u32 %v5153_v37, %v5002_v50  ;;  %v4916_v34 = vmax.f32 %v7637_v42, 0.0  ;;  %v5103_v42 = vld [vmem:[#allocation3 + $0xb0] sm:$0xff] }
 0x496   : > { %v5098_v58 = vsel %vm9966_vm4, %v5007_v6, %v5097_v15  ;;  %v10548_v62 = vsel %vm9959_vm2, %v5154_v29, %v5209_v19  ;;  %v4938_v60 = vpack.c.bf16 %v4916_v34, %v4915_v35 }
 0x497   : > { %5099 = vst [vmem:[#allocation3 + $0x90] sm:$0xff] %v5098_v58  ;;  %5211 = vst [vmem:[#allocation3 + $0x98] sm:$0xff] %v10548_v62  ;;  %v4722_v21 = vpop.f32.mrb[184].mxu0  ;;  %v10551_v5 = vld [vmem:[#allocation3 + $0x80] sm:$0xff] }
 0x498   : > { %5129 = vst.msk [vmem:[#allocation3 + $0x90] sm:$0xff] %vm3506_vm1, %v4937_v27  ;;  %v5009_v54 = vshrl.u32 %v4938_v60, 16  ;;  %v5012_v20 = vshll.u32 %v4938_v60, 16  ;;  %v7638_v2 = vadd.f32 %v10408_v9, %v4722_v21  ;;  %v4724_v4 = vpop.f32.mrb[185].mxu0  ;;  %5513 = vmatmul.mubr.bf16.gmra.mrb[128].mxu1 %v10551_v5 }
 0x499   : > { %v4725_v47 = vpop.f32.mrb[186].mxu0  ;;  %6868 = vmatprep.mubr.msk.bf16.mxu1 %vm680_vm0, %v10548_v62 }
 0x49a   : > { %v5011_v26 = vrot.slane %v5009_v54, 7  ;;  %v5155_v36 = vrot.slane %v5012_v20, 1  ;;  %v7639_v17 = vadd.f32 %v10408_v9, %v4725_v47  ;;  %v4727_v23 = vpop.f32.mrb[187].mxu0  ;;  %v4917_v7 = vmax.f32 %v7638_v2, 0.0 }
 0x49c   : > { %v5014_v41 = vor.u32 %v5012_v20, %v5011_v26  ;;  %v5156_v10 = vor.u32 %v5155_v36, %v5009_v54  ;;  %v4918_v14 = vmax.f32 %v7639_v17, 0.0 }
 0x49e   : > { %v5101_v24 = vsel %vm9966_vm4, %v5014_v41, %v5100_v25  ;;  %v10564_v48 = vsel %vm9959_vm2, %v5156_v10, %v10368_v12  ;;  %v4939_v8 = vpack.c.bf16 %v4918_v14, %v4917_v7  ;;  %v5106_v41 = vld [vmem:[#allocation3 + $0xc0] sm:$0xff]  ;;  %v5218_v10 = vld [vmem:[#allocation3 + $0xc8] sm:$0xff] }
 0x49f   : > { %5102 = vst [vmem:[#allocation3 + $0xa0] sm:$0xff] %v5101_v24  ;;  %5214 = vst [vmem:[#allocation3 + $0xa8] sm:$0xff] %v10564_v48  ;;  %v4730_v57 = vpop.f32.mrb[188].mxu0  ;;  %v10567_v22 = vld [vmem:[#allocation3 + $0x90] sm:$0xff] }
 0x4a0   : > { %5130 = vst.msk [vmem:[#allocation3 + $0xa0] sm:$0xff] %vm3506_vm1, %v4938_v60  ;;  %v5016_v1 = vshrl.u32 %v4939_v8, 16  ;;  %v5019_v30 = vshll.u32 %v4939_v8, 16  ;;  %v7640_v39 = vadd.f32 %v10408_v9, %v4730_v57  ;;  %v4732_v27 = vpop.f32.mrb[189].mxu0  ;;  %5521 = vmatmul.mubr.bf16.gmra.mrb[132].mxu1 %v10567_v22 }
 0x4a1   : > { %v4733_v63 = vpop.f32.mrb[190].mxu0  ;;  %6869 = vmatprep.mubr.msk.bf16.mxu1 %vm680_vm0, %v10564_v48 }
 0x4a2   : > { %v5018_v12 = vrot.slane %v5016_v1, 7  ;;  %v5157_v50 = vrot.slane %v5019_v30, 1  ;;  %v7641_v3 = vadd.f32 %v10408_v9, %v4733_v63  ;;  %v4735_v46 = vpop.f32.mrb[191].mxu0  ;;  %v4919_v44 = vmax.f32 %v7640_v39, 0.0 }
 0x4a4   : > { %v5021_v33 = vor.u32 %v5019_v30, %v5018_v12  ;;  %v5158_v16 = vor.u32 %v5157_v50, %v5016_v1  ;;  %v4920_v37 = vmax.f32 %v7641_v3, 0.0 }
 0x4a6   : > { %v5104_v6 = vsel %vm9966_vm4, %v5021_v33, %v5103_v42  ;;  %v10579_v29 = vsel %vm9959_vm2, %v5158_v16, %v5215_v0  ;;  %v4940_v35 = vpack.c.bf16 %v4920_v37, %v4919_v44  ;;  %v5109_v37 = vld [vmem:[#allocation3 + $0xd0] sm:$0xff]  ;;  %v5221_v42 = vld [vmem:[#allocation3 + $0xd8] sm:$0xff] }
 0x4a7   : > { %5105 = vst [vmem:[#allocation3 + $0xb0] sm:$0xff] %v5104_v6  ;;  %5217 = vst [vmem:[#allocation3 + $0xb8] sm:$0xff] %v10579_v29  ;;  %v4738_v34 = vpop.f32.mrb[192].mxu0  ;;  %v10582_v15 = vld [vmem:[#allocation3 + $0xa0] sm:$0xff] }
 0x4a8   : > { %5131 = vst.msk [vmem:[#allocation3 + $0xb0] sm:$0xff] %vm3506_vm1, %v4939_v8  ;;  %v5023_v19 = vshrl.u32 %v4940_v35, 16  ;;  %v5026_v58 = vshll.u32 %v4940_v35, 16  ;;  %v7642_v60 = vadd.f32 %v10408_v9, %v4738_v34  ;;  %v4740_v21 = vpop.f32.mrb[193].mxu0  ;;  %5529 = vmatmul.mubr.bf16.gmra.mrb[136].mxu1 %v10582_v15 }
 0x4a9   : > { %v4741_v54 = vpop.f32.mrb[194].mxu0  ;;  %6870 = vmatprep.mubr.msk.bf16.mxu1 %vm680_vm0, %v10579_v29 }
 0x4aa   : > { %v5025_v20 = vrot.slane %v5023_v19, 7  ;;  %v5159_v2 = vrot.slane %v5026_v58, 1  ;;  %v7643_v4 = vadd.f32 %v10408_v9, %v4741_v54  ;;  %v4743_v47 = vpop.f32.mrb[195].mxu0  ;;  %v4921_v17 = vmax.f32 %v7642_v60, 0.0 }
 0x4ac   : > { %v5028_v26 = vor.u32 %v5026_v58, %v5025_v20  ;;  %v5160_v36 = vor.u32 %v5159_v2, %v5023_v19  ;;  %v4922_v23 = vmax.f32 %v7643_v4, 0.0 }
 0x4ae   : > { %v5107_v7 = vsel %vm9966_vm4, %v5028_v26, %v5106_v41  ;;  %v10594_v14 = vsel %vm9959_vm2, %v5160_v36, %v5218_v10  ;;  %v4941_v25 = vpack.c.bf16 %v4922_v23, %v4921_v17  ;;  %v5112_v10 = vld [vmem:[#allocation3 + $0xe0] sm:$0xff] }
 0x4af   : > { %5108 = vst [vmem:[#allocation3 + $0xc0] sm:$0xff] %v5107_v7  ;;  %5220 = vst [vmem:[#allocation3 + $0xc8] sm:$0xff] %v10594_v14  ;;  %v4746_v24 = vpop.f32.mrb[196].mxu0  ;;  %v10597_v8 = vld [vmem:[#allocation3 + $0xb0] sm:$0xff]  ;;  %v5224_v7 = vld [vmem:[#allocation3 + $0xe8] sm:$0xff] }
 0x4b0   : > { %5132 = vst.msk [vmem:[#allocation3 + $0xc0] sm:$0xff] %vm3506_vm1, %v4940_v35  ;;  %v5030_v57 = vshrl.u32 %v4941_v25, 16  ;;  %v5033_v1 = vshll.u32 %v4941_v25, 16  ;;  %v7644_v30 = vadd.f32 %v10408_v9, %v4746_v24  ;;  %v4748_v39 = vpop.f32.mrb[197].mxu0  ;;  %5537 = vmatmul.mubr.bf16.gmra.mrb[140].mxu1 %v10597_v8 }
 0x4b1   : > { %v4749_v27 = vpop.f32.mrb[198].mxu0  ;;  %6871 = vmatprep.mubr.msk.bf16.mxu1 %vm680_vm0, %v10594_v14 }
 0x4b2   : > { %v5032_v63 = vrot.slane %v5030_v57, 7  ;;  %v5161_v12 = vrot.slane %v5033_v1, 1  ;;  %v7645_v50 = vadd.f32 %v10408_v9, %v4749_v27  ;;  %v4751_v3 = vpop.f32.mrb[199].mxu0  ;;  %v4923_v16 = vmax.f32 %v7644_v30, 0.0 }
 0x4b4   : > { %v5035_v46 = vor.u32 %v5033_v1, %v5032_v63  ;;  %v5162_v33 = vor.u32 %v5161_v12, %v5030_v57  ;;  %v4924_v44 = vmax.f32 %v7645_v50, 0.0 }
 0x4b6   : > { %v5110_v0 = vsel %vm9966_vm4, %v5035_v46, %v5109_v37  ;;  %v10609_v6 = vsel %vm9959_vm2, %v5162_v33, %v5221_v42  ;;  %v4942_v35 = vpack.c.bf16 %v4924_v44, %v4923_v16 }
 0x4b7   : > { %5111 = vst [vmem:[#allocation3 + $0xd0] sm:$0xff] %v5110_v0  ;;  %5223 = vst [vmem:[#allocation3 + $0xd8] sm:$0xff] %v10609_v6  ;;  %v4754_v34 = vpop.f32.mrb[200].mxu0  ;;  %v10612_v19 = vld [vmem:[#allocation3 + $0xc0] sm:$0xff] }
 0x4b8   : > { %5133 = vst.msk [vmem:[#allocation3 + $0xd0] sm:$0xff] %vm3506_vm1, %v4941_v25  ;;  %v5037_v58 = vshrl.u32 %v4942_v35, 16  ;;  %v5040_v60 = vshll.u32 %v4942_v35, 16  ;;  %v7646_v21 = vadd.f32 %v10408_v9, %v4754_v34  ;;  %v4756_v54 = vpop.f32.mrb[201].mxu0  ;;  %5545 = vmatmul.mubr.bf16.gmra.mrb[144].mxu1 %v10612_v19  ;;  %v5227_v34 = vld [vmem:[#allocation3 + $0xf8] sm:$0xff] }
 0x4b9   : > { %v4757_v20 = vpop.f32.mrb[202].mxu0  ;;  %6872 = vmatprep.mubr.msk.bf16.mxu1 %vm680_vm0, %v10609_v6 }
 0x4ba   : > { %v5039_v2 = vrot.slane %v5037_v58, 7  ;;  %v5163_v4 = vrot.slane %v5040_v60, 1  ;;  %v7647_v47 = vadd.f32 %v10408_v9, %v4757_v20  ;;  %v4759_v26 = vpop.f32.mrb[203].mxu0  ;;  %v4925_v23 = vmax.f32 %v7646_v21, 0.0 }
 0x4bc   : > { %v5042_v36 = vor.u32 %v5040_v60, %v5039_v2  ;;  %v5164_v17 = vor.u32 %v5163_v4, %v5037_v58  ;;  %v4926_v41 = vmax.f32 %v7647_v47, 0.0 }
 0x4be   : > { %v5113_v25 = vsel %vm9966_vm4, %v5042_v36, %v5112_v10  ;;  %v10624_v24 = vsel %vm9959_vm2, %v5164_v17, %v5224_v7  ;;  %v4943_v57 = vpack.c.bf16 %v4926_v41, %v4925_v23  ;;  %v5118_v36 = vld [vmem:[#allocation3 + $0x100] sm:$0xff]  ;;  %v5230_v17 = vld [vmem:[#allocation3 + $0x108] sm:$0xff] }
 0x4bf   : > { %5114 = vst [vmem:[#allocation3 + $0xe0] sm:$0xff] %v5113_v25  ;;  %5226 = vst [vmem:[#allocation3 + $0xe8] sm:$0xff] %v10624_v24  ;;  %v4762_v1 = vpop.f32.mrb[204].mxu0  ;;  %v10627_v30 = vld [vmem:[#allocation3 + $0xd0] sm:$0xff]  ;;  %v8216_v7 = vld [vmem:[#allocation11 + $0xc0] sm:$0xff]  }
 0x4c0   : > { %5134 = vst.msk [vmem:[#allocation3 + $0xe0] sm:$0xff] %vm3506_vm1, %v4942_v35  ;;  %v5044_v39 = vshrl.u32 %v4943_v57, 16  ;;  %v5047_v27 = vshll.u32 %v4943_v57, 16  ;;  %v7648_v63 = vadd.f32 %v10408_v9, %v4762_v1  ;;  %v4764_v12 = vpop.f32.mrb[205].mxu0  ;;  %5553 = vmatmul.mubr.bf16.gmra.mrb[148].mxu1 %v10627_v30  ;;  %v5115_v35 = vld [vmem:[#allocation3 + $0xf0] sm:$0xff]  ;;  %v8225_v1 = vld [vmem:[#allocation11 + $0x108] sm:$0xff]  }
 0x4c1   : > { %v4765_v50 = vpop.f32.mrb[206].mxu0  ;;  %6873 = vmatprep.mubr.msk.bf16.mxu1 %vm680_vm0, %v10624_v24  ;;  %v8222_v25 = vld [vmem:[#allocation11 + $0xf0] sm:$0xff]   ;;  %v6046_v12 = vld [vmem:[#allocation3 + $0x38] sm:$0xff] }
 0x4c2   : > { %v5046_v3 = vrot.slane %v5044_v39, 7  ;;  %v5165_v46 = vrot.slane %v5047_v27, 1  ;;  %v7649_v33 = vadd.f32 %v10408_v9, %v4765_v50  ;;  %v4767_v16 = vpop.f32.mrb[207].mxu0  ;;  %v4927_v42 = vmax.f32 %v7648_v63, 0.0  ;;  %v6044_v63 = vld [vmem:[#allocation3 + $0x28] sm:$0xff] }
 0x4c4   : > { %v5049_v44 = vor.u32 %v5047_v27, %v5046_v3  ;;  %v5166_v37 = vor.u32 %v5165_v46, %v5044_v39  ;;  %v4928_v0 = vmax.f32 %v7649_v33, 0.0  ;;  %v8226_v39 = vld [vmem:[#allocation11 + $0x110] sm:$0xff]   ;;  %v8227_v27 = vld [vmem:[#allocation11 + $0x118] sm:$0xff]  }
 0x4c6   : > { %v5116_v58 = vsel %vm9966_vm4, %v5049_v44, %v5115_v35  ;;  %v10639_v60 = vsel %vm9959_vm2, %v5166_v37, %v5227_v34  ;;  %v4944_v21 = vpack.c.bf16 %v4928_v0, %v4927_v42 }
 0x4c7   : > { %5117 = vst [vmem:[#allocation3 + $0xf0] sm:$0xff] %v5116_v58  ;;  %5229 = vst [vmem:[#allocation3 + $0xf8] sm:$0xff] %v10639_v60  ;;  %v10642_v54 = vld [vmem:[#allocation3 + $0xe0] sm:$0xff] }
 0x4c8   : > { %5135 = vst.msk [vmem:[#allocation3 + $0xf0] sm:$0xff] %vm3506_vm1, %v4943_v57  ;;  %v5051_v9 = vshrl.u32 %v4944_v21, 16  ;;  %v5054_v20 = vshll.u32 %v4944_v21, 16  ;;  %5561 = vmatmul.mubr.bf16.gmra.mrb[152].mxu1 %v10642_v54  ;;  %v8224_v57 = vld [vmem:[#allocation11 + $0x100] sm:$0xff]  }
 0x4c9   : > { %6874 = vmatprep.mubr.msk.bf16.mxu1 %vm680_vm0, %v10639_v60 }
 0x4ca   : > { %v5053_v2 = vrot.slane %v5051_v9, 7  ;;  %v5167_v4 = vrot.slane %v5054_v20, 1 }
 0x4cc   : > { %v5056_v47 = vor.u32 %v5054_v20, %v5053_v2  ;;  %v5168_v26 = vor.u32 %v5167_v4, %v5051_v9 }
 0x4ce   : > { %v5119_v23 = vsel %vm9966_vm4, %v5056_v47, %v5118_v36  ;;  %v10652_v41 = vsel %vm9959_vm2, %v5168_v26, %v5230_v17 }
 0x4cf   : > { %5120 = vst [vmem:[#allocation3 + $0x100] sm:$0xff] %v5119_v23  ;;  %5232 = vst [vmem:[#allocation3 + $0x108] sm:$0xff] %v10652_v41  ;;  %v10655_v10 = vld [vmem:[#allocation3 + $0xf0] sm:$0xff] }
 0x4d0   : > { %5136 = vst.msk [vmem:[#allocation3 + $0x100] sm:$0xff] %vm3506_vm1, %v4944_v21  ;;  %5569 = vmatmul.mubr.bf16.gmra.mrb[156].mxu1 %v10655_v10 }
 0x4d1   : > { %6887 = vmatprep.mubr.msk.bf16.mxu1 %vm680_vm0, %v10421_v32  ;;  %v8219_v32 = vld [vmem:[#allocation11 + $0xd8] sm:$0xff]  }
 0x4d8   : > { %5819 = vmatmul.mubr.bf16.vlgmr.msra.gmra.mrb[96].mxu1 %v10438_v61  ;;  %v8220_v61 = vld [vmem:[#allocation11 + $0xe0] sm:$0xff]  }
 0x4d9   : > { %6888 = vmatprep.mubr.msk.bf16.mxu1 %vm680_vm0, %v10435_v55  ;;  %6221 = vmatpush1.bf16.msra.mxu1 %v8216_v7  ;;  %v8221_v55 = vld [vmem:[#allocation11 + $0xe8] sm:$0xff]  }
 0x4da   : > { %6222 = vmatprep.subr.bf16.mxu1 %v10257_v28 }
 0x4dd   : > { %6223 = vmatpush1.bf16.msra.mxu1 %v8217_v13 }
 0x4de   : > { %6224 = vmatprep.subr.bf16.mxu1 %v10257_v28 }
 0x4e0   : > { %5827 = vmatmul.mubr.bf16.gmra.mrb[100].mxu1 %v10454_v52 }
 0x4e1   : > { %6889 = vmatprep.mubr.msk.bf16.mxu1 %vm680_vm0, %v10451_v59  ;;  %6225 = vmatpush1.bf16.msra.mxu1 %v8218_v31  ;;  %v8223_v59 = vld [vmem:[#allocation11 + $0xf8] sm:$0xff]  }
 0x4e2   : > { %6226 = vmatprep.subr.bf16.mxu1 %v10257_v28 }
 0x4e5   : > { %6227 = vmatpush1.bf16.msra.mxu1 %v8219_v32 }
 0x4e6   : > { %6228 = vmatprep.subr.bf16.mxu1 %v10257_v28 }
 0x4e8   : > { %5835 = vmatmul.mubr.bf16.gmra.mrb[104].mxu1 %v10470_v18 }
 0x4e9   : > { %6890 = vmatprep.mubr.msk.bf16.mxu1 %vm680_vm0, %v10467_v49  ;;  %6229 = vmatpush1.bf16.msra.mxu1 %v8220_v61 }
 0x4ea   : > { %6230 = vmatprep.subr.bf16.mxu1 %v10257_v28 }
 0x4ed   : > { %6231 = vmatpush1.bf16.msra.mxu1 %v8221_v55 }
 0x4ee   : > { %6232 = vmatprep.subr.bf16.mxu1 %v10257_v28 }
 0x4f0   : > { %5843 = vmatmul.mubr.bf16.gmra.mrb[108].mxu1 %v10486_v51 }
 0x4f1   : > { %6891 = vmatprep.mubr.msk.bf16.mxu1 %vm680_vm0, %v10483_v11  ;;  %6233 = vmatpush1.bf16.msra.mxu1 %v8222_v25 }
 0x4f2   : > { %6234 = vmatprep.subr.bf16.mxu1 %v10257_v28 }
 0x4f5   : > { %6235 = vmatpush1.bf16.msra.mxu1 %v8223_v59 }
 0x4f6   : > { %6236 = vmatprep.subr.bf16.mxu1 %v10257_v28 }
 0x4f8   : > { %5851 = vmatmul.mubr.bf16.gmra.mrb[112].mxu1 %v10503_v40 }
 0x4f9   : > { %6892 = vmatprep.mubr.msk.bf16.mxu1 %vm680_vm0, %v10500_v53  ;;  %6237 = vmatpush1.bf16.msra.mxu1 %v8224_v57 }
 0x4fa   : > { %6238 = vmatprep.subr.bf16.mxu1 %v10257_v28 }
 0x4fd   : > { %6239 = vmatpush1.bf16.msra.mxu1 %v8225_v1 }
 0x4fe   : > { %6240 = vmatprep.subr.bf16.mxu1 %v10257_v28 }
 0x500   : > { %5859 = vmatmul.mubr.bf16.gmra.mrb[116].mxu1 %v10520_v56 }
 0x501   : > { %6893 = vmatprep.mubr.msk.bf16.mxu1 %vm680_vm0, %v10517_v45  ;;  %6241 = vmatpush1.bf16.msra.mxu1 %v8226_v39 }
 0x502   : > { %6242 = vmatprep.subr.bf16.mxu1 %v10257_v28  ;;  %v5639_v28 = vld [vmem:[#allocation3 + $0x100] sm:$0xff] }
 0x505   : > { %6243 = vmatpush1.bf16.msra.mxu1 %v8227_v27 }
 0x508   : > { %5867 = vmatmul.mubr.bf16.gmra.mrb[120].mxu1 %v10536_v38 }
 0x509   : > { %6894 = vmatprep.mubr.msk.bf16.mxu1 %vm680_vm0, %v10533_v43 }
 0x510   : > { %5875 = vmatmul.mubr.bf16.gmra.mrb[124].mxu1 %v10551_v5 }
 0x511   : > { %6895 = vmatprep.mubr.msk.bf16.mxu1 %vm680_vm0, %v10548_v62 }
 0x518   : > { %5883 = vmatmul.mubr.bf16.gmra.mrb[128].mxu1 %v10567_v22 }
 0x519   : > { %6896 = vmatprep.mubr.msk.bf16.mxu1 %vm680_vm0, %v10564_v48 }
 0x520   : > { %5891 = vmatmul.mubr.bf16.gmra.mrb[132].mxu1 %v10582_v15 }
 0x521   : > { %6897 = vmatprep.mubr.msk.bf16.mxu1 %vm680_vm0, %v10579_v29 }
 0x528   : > { %5899 = vmatmul.mubr.bf16.gmra.mrb[136].mxu1 %v10597_v8 }
 0x529   : > { %6898 = vmatprep.mubr.msk.bf16.mxu1 %vm680_vm0, %v10594_v14 }
 0x530   : > { %5907 = vmatmul.mubr.bf16.gmra.mrb[140].mxu1 %v10612_v19 }
 0x531   : > { %6899 = vmatprep.mubr.msk.bf16.mxu1 %vm680_vm0, %v10609_v6 }
 0x538   : > { %5915 = vmatmul.mubr.bf16.gmra.mrb[144].mxu1 %v10627_v30 }
 0x539   : > { %6900 = vmatprep.mubr.msk.bf16.mxu1 %vm680_vm0, %v10624_v24 }
 0x540   : > { %5923 = vmatmul.mubr.bf16.gmra.mrb[148].mxu1 %v10642_v54 }
 0x541   : > { %6901 = vmatprep.mubr.msk.bf16.mxu1 %vm680_vm0, %v10639_v60 }
 0x548   : > { %5931 = vmatmul.mubr.bf16.gmra.mrb[152].mxu1 %v10655_v10 }
 0x549   : > { %6902 = vmatprep.mubr.msk.bf16.mxu1 %vm680_vm0, %v10652_v41 }
 0x550   : > { %5939 = vmatmul.mubr.bf16.gmra.mrb[156].mxu1 %v5639_v28 }
 0x551   : > { %6915 = vmatprep.mubr.msk.bf16.mxu1 %vm680_vm0, %v6044_v63 }
 0x558   : > { %6253 = vmatmul.mubr.bf16.vlgmr.msra.gmra.mrb[96].mxu1 %v10454_v52  ;;  %v6074_v52 = vld [vmem:[#allocation3 + $0x118] sm:$0xff] }
 0x559   : > { %6916 = vmatprep.mubr.msk.bf16.mxu1 %vm680_vm0, %v6046_v12 }
 0x560   : > { %6261 = vmatmul.mubr.bf16.gmra.mrb[100].mxu1 %v10470_v18  ;;  %v10764_v18 = vld [vmem:[%s10921_s6] ss:$0 sm:$0xff] }
 0x561   : > { %6917 = vmatprep.mubr.msk.bf16.mxu1 %vm680_vm0, %v10467_v49  ;;  %v6073_v49 = vld [vmem:[#allocation3 + $0x110] sm:$0xff] }
 0x568   : > { %6269 = vmatmul.mubr.bf16.gmra.mrb[104].mxu1 %v10486_v51 }
 0x569   : > { %6918 = vmatprep.mubr.msk.bf16.mxu1 %vm680_vm0, %v10483_v11 }
 0x570   : > { %6277 = vmatmul.mubr.bf16.gmra.mrb[108].mxu1 %v10503_v40 }
 0x571   : > { %6919 = vmatprep.mubr.msk.bf16.mxu1 %vm680_vm0, %v10500_v53 }
 0x578   : > { %6285 = vmatmul.mubr.bf16.gmra.mrb[112].mxu1 %v10520_v56 }
 0x579   : > { %6920 = vmatprep.mubr.msk.bf16.mxu1 %vm680_vm0, %v10517_v45 }
 0x580   : > { %6293 = vmatmul.mubr.bf16.gmra.mrb[116].mxu1 %v10536_v38 }
 0x581   : > { %6921 = vmatprep.mubr.msk.bf16.mxu1 %vm680_vm0, %v10533_v43 }
 0x588   : > { %6301 = vmatmul.mubr.bf16.gmra.mrb[120].mxu1 %v10551_v5 }
 0x589   : > { %6922 = vmatprep.mubr.msk.bf16.mxu1 %vm680_vm0, %v10548_v62 }
 0x590   : > { %6309 = vmatmul.mubr.bf16.gmra.mrb[124].mxu1 %v10567_v22 }
 0x591   : > { %6923 = vmatprep.mubr.msk.bf16.mxu1 %vm680_vm0, %v10564_v48 }
 0x598   : > { %6317 = vmatmul.mubr.bf16.gmra.mrb[128].mxu1 %v10582_v15 }
 0x599   : > { %6924 = vmatprep.mubr.msk.bf16.mxu1 %vm680_vm0, %v10579_v29 }
 0x5a0   : > { %6325 = vmatmul.mubr.bf16.gmra.mrb[132].mxu1 %v10597_v8 }
 0x5a1   : > { %6925 = vmatprep.mubr.msk.bf16.mxu1 %vm680_vm0, %v10594_v14 }
 0x5a8   : > { %6333 = vmatmul.mubr.bf16.gmra.mrb[136].mxu1 %v10612_v19 }
 0x5a9   : > { %6926 = vmatprep.mubr.msk.bf16.mxu1 %vm680_vm0, %v10609_v6 }
 0x5b0   : > { %6341 = vmatmul.mubr.bf16.gmra.mrb[140].mxu1 %v10627_v30 }
 0x5b1   : > { %6927 = vmatprep.mubr.msk.bf16.mxu1 %vm680_vm0, %v10624_v24 }
 0x5b8   : > { %6349 = vmatmul.mubr.bf16.gmra.mrb[144].mxu1 %v10642_v54 }
 0x5b9   : > { %6928 = vmatprep.mubr.msk.bf16.mxu1 %vm680_vm0, %v10639_v60 }
 0x5c0   : > { %6357 = vmatmul.mubr.bf16.gmra.mrb[148].mxu1 %v10655_v10 }
 0x5c1   : > { %6929 = vmatprep.mubr.msk.bf16.mxu1 %vm680_vm0, %v10652_v41 }
 0x5c8   : > { %6365 = vmatmul.mubr.bf16.gmra.mrb[152].mxu1 %v5639_v28 }
 0x5c9   : > { %6930 = vmatprep.mubr.msk.bf16.mxu1 %vm680_vm0, %v6074_v52 }
 0x5d0   : > { %6373 = vmatmul.mubr.bf16.gmra.mrb[156].mxu1 %v6073_v49 }
 0x62b   : > { %v6254_v11 = vpop.f32.mrb[96].mxu1 }
 0x62c   : > { %v7650_v51 = vadd.f32 %v10764_v18, %v6254_v11  ;;  %v6256_v53 = vpop.f32.mrb[97].mxu1 }
 0x62d   : > { %v6257_v40 = vpop.f32.mrb[98].mxu1 }
 0x62e   : > { %6509 = vst.msk [vmem:[%s10767_s12] sm:$0xff] %vm680_vm0, %v7650_v51  ;;  %v7651_v45 = vadd.f32 %v10764_v18, %v6257_v40  ;;  %v6259_v56 = vpop.f32.mrb[99].mxu1 }
 0x630   : > { %6510 = vst.msk [vmem:[%s10767_s12 + $0x8] sm:$0xff] %vm680_vm0, %v7651_v45 }
 0x633   : > { %v6262_v43 = vpop.f32.mrb[100].mxu1 }
 0x634   : > { %v7652_v38 = vadd.f32 %v10764_v18, %v6262_v43  ;;  %v6264_v62 = vpop.f32.mrb[101].mxu1 }
 0x635   : > { %v6265_v5 = vpop.f32.mrb[102].mxu1 }
 0x636   : > { %6511 = vst.msk [vmem:[%s10767_s12 + $0x10] sm:$0xff] %vm680_vm0, %v7652_v38  ;;  %v7653_v48 = vadd.f32 %v10764_v18, %v6265_v5  ;;  %v6267_v22 = vpop.f32.mrb[103].mxu1 }
 0x638   : > { %6512 = vst.msk [vmem:[%s10767_s12 + $0x18] sm:$0xff] %vm680_vm0, %v7653_v48 }
 0x63b   : > { %v6270_v29 = vpop.f32.mrb[104].mxu1 }
 0x63c   : > { %v7654_v15 = vadd.f32 %v10764_v18, %v6270_v29  ;;  %v6272_v14 = vpop.f32.mrb[105].mxu1 }
 0x63d   : > { %v6273_v8 = vpop.f32.mrb[106].mxu1 }
 0x63e   : > { %6513 = vst.msk [vmem:[%s10767_s12 + $0x20] sm:$0xff] %vm680_vm0, %v7654_v15  ;;  %v7655_v6 = vadd.f32 %v10764_v18, %v6273_v8  ;;  %v6275_v19 = vpop.f32.mrb[107].mxu1 }
 0x640   : > { %6514 = vst.msk [vmem:[%s10767_s12 + $0x28] sm:$0xff] %vm680_vm0, %v7655_v6 }
 0x643   : > { %v6278_v24 = vpop.f32.mrb[108].mxu1 }
 0x644   : > { %v7656_v30 = vadd.f32 %v10764_v18, %v6278_v24  ;;  %v6280_v50 = vpop.f32.mrb[109].mxu1 }
 0x645   : > { %v6281_v3 = vpop.f32.mrb[110].mxu1 }
 0x646   : > { %6515 = vst.msk [vmem:[%s10767_s12 + $0x30] sm:$0xff] %vm680_vm0, %v7656_v30  ;;  %v7657_v46 = vadd.f32 %v10764_v18, %v6281_v3  ;;  %v6283_v33 = vpop.f32.mrb[111].mxu1 }
 0x648   : > { %6516 = vst.msk [vmem:[%s10767_s12 + $0x38] sm:$0xff] %vm680_vm0, %v7657_v46 }
 0x64b   : > { %v6286_v16 = vpop.f32.mrb[112].mxu1 }
 0x64c   : > { %v7658_v44 = vadd.f32 %v10764_v18, %v6286_v16  ;;  %v6288_v37 = vpop.f32.mrb[113].mxu1 }
 0x64d   : > { %v6289_v42 = vpop.f32.mrb[114].mxu1 }
 0x64e   : > { %6517 = vst.msk [vmem:[%s10767_s12 + $0x40] sm:$0xff] %vm680_vm0, %v7658_v44  ;;  %v7659_v0 = vadd.f32 %v10764_v18, %v6289_v42  ;;  %v6291_v35 = vpop.f32.mrb[115].mxu1 }
 0x650   : > { %6518 = vst.msk [vmem:[%s10767_s12 + $0x48] sm:$0xff] %vm680_vm0, %v7659_v0 }
 0x653   : > { %v6294_v34 = vpop.f32.mrb[116].mxu1 }
 0x654   : > { %v7660_v58 = vadd.f32 %v10764_v18, %v6294_v34  ;;  %v6296_v60 = vpop.f32.mrb[117].mxu1 }
 0x655   : > { %v6297_v21 = vpop.f32.mrb[118].mxu1 }
 0x656   : > { %6519 = vst.msk [vmem:[%s10767_s12 + $0x50] sm:$0xff] %vm680_vm0, %v7660_v58  ;;  %v7661_v54 = vadd.f32 %v10764_v18, %v6297_v21  ;;  %v6299_v9 = vpop.f32.mrb[119].mxu1 }
 0x658   : > { %6520 = vst.msk [vmem:[%s10767_s12 + $0x58] sm:$0xff] %vm680_vm0, %v7661_v54 }
 0x65b   : > { %v6302_v20 = vpop.f32.mrb[120].mxu1 }
 0x65c   : > { %v7662_v2 = vadd.f32 %v10764_v18, %v6302_v20  ;;  %v6304_v4 = vpop.f32.mrb[121].mxu1 }
 0x65d   : > { %v6305_v47 = vpop.f32.mrb[122].mxu1 }
 0x65e   : > { %6521 = vst.msk [vmem:[%s10767_s12 + $0x60] sm:$0xff] %vm680_vm0, %v7662_v2  ;;  %v7663_v26 = vadd.f32 %v10764_v18, %v6305_v47  ;;  %v6307_v36 = vpop.f32.mrb[123].mxu1 }
 0x660   : > { %6522 = vst.msk [vmem:[%s10767_s12 + $0x68] sm:$0xff] %vm680_vm0, %v7663_v26 }
 0x663   : > { %v6310_v17 = vpop.f32.mrb[124].mxu1 }
 0x664   : > { %v7664_v23 = vadd.f32 %v10764_v18, %v6310_v17  ;;  %v6312_v41 = vpop.f32.mrb[125].mxu1 }
 0x665   : > { %v6313_v10 = vpop.f32.mrb[126].mxu1 }
 0x666   : > { %6523 = vst.msk [vmem:[%s10767_s12 + $0x70] sm:$0xff] %vm680_vm0, %v7664_v23  ;;  %v7665_v7 = vadd.f32 %v10764_v18, %v6313_v10  ;;  %v6315_v13 = vpop.f32.mrb[127].mxu1 }
 0x668   : > { %6524 = vst.msk [vmem:[%s10767_s12 + $0x78] sm:$0xff] %vm680_vm0, %v7665_v7 }
 0x66b   : > { %v6318_v31 = vpop.f32.mrb[128].mxu1 }
 0x66c   : > { %v7666_v32 = vadd.f32 %v10764_v18, %v6318_v31  ;;  %v6320_v61 = vpop.f32.mrb[129].mxu1 }
 0x66d   : > { %v6321_v55 = vpop.f32.mrb[130].mxu1 }
 0x66e   : > { %6525 = vst.msk [vmem:[%s10767_s12 + $0x80] sm:$0xff] %vm680_vm0, %v7666_v32  ;;  %v7667_v25 = vadd.f32 %v10764_v18, %v6321_v55  ;;  %v6323_v59 = vpop.f32.mrb[131].mxu1 }
 0x670   : > { %6526 = vst.msk [vmem:[%s10767_s12 + $0x88] sm:$0xff] %vm680_vm0, %v7667_v25 }
 0x673   : > { %v6326_v57 = vpop.f32.mrb[132].mxu1 }
 0x674   : > { %v7668_v1 = vadd.f32 %v10764_v18, %v6326_v57  ;;  %v6328_v39 = vpop.f32.mrb[133].mxu1 }
 0x675   : > { %v6329_v27 = vpop.f32.mrb[134].mxu1 }
 0x676   : > { %6527 = vst.msk [vmem:[%s10767_s12 + $0x90] sm:$0xff] %vm680_vm0, %v7668_v1  ;;  %v7669_v28 = vadd.f32 %v10764_v18, %v6329_v27  ;;  %v6331_v63 = vpop.f32.mrb[135].mxu1 }
 0x678   : > { %6528 = vst.msk [vmem:[%s10767_s12 + $0x98] sm:$0xff] %vm680_vm0, %v7669_v28 }
 0x67b   : > { %v6334_v12 = vpop.f32.mrb[136].mxu1 }
 0x67c   : > { %v7670_v52 = vadd.f32 %v10764_v18, %v6334_v12  ;;  %v6336_v49 = vpop.f32.mrb[137].mxu1 }
 0x67d   : > { %v6337_v11 = vpop.f32.mrb[138].mxu1 }
 0x67e   : > { %6529 = vst.msk [vmem:[%s10767_s12 + $0xa0] sm:$0xff] %vm680_vm0, %v7670_v52  ;;  %v7671_v51 = vadd.f32 %v10764_v18, %v6337_v11  ;;  %v6339_v53 = vpop.f32.mrb[139].mxu1 }
 0x680   : > { %6530 = vst.msk [vmem:[%s10767_s12 + $0xa8] sm:$0xff] %vm680_vm0, %v7671_v51 }
 0x683   : > { %v6342_v40 = vpop.f32.mrb[140].mxu1 }
 0x684   : > { %v7672_v45 = vadd.f32 %v10764_v18, %v6342_v40  ;;  %v6344_v56 = vpop.f32.mrb[141].mxu1 }
 0x685   : > { %v6345_v43 = vpop.f32.mrb[142].mxu1 }
 0x686   : > { %6531 = vst.msk [vmem:[%s10767_s12 + $0xb0] sm:$0xff] %vm680_vm0, %v7672_v45  ;;  %v7673_v38 = vadd.f32 %v10764_v18, %v6345_v43  ;;  %v6347_v62 = vpop.f32.mrb[143].mxu1 }
 0x688   : > { %6532 = vst.msk [vmem:[%s10767_s12 + $0xb8] sm:$0xff] %vm680_vm0, %v7673_v38 }
 0x68b   : > { %v6350_v5 = vpop.f32.mrb[144].mxu1 }
 0x68c   : > { %v7674_v48 = vadd.f32 %v10764_v18, %v6350_v5  ;;  %v6352_v22 = vpop.f32.mrb[145].mxu1 }
 0x68d   : > { %v6353_v29 = vpop.f32.mrb[146].mxu1 }
 0x68e   : > { %6533 = vst.msk [vmem:[%s10767_s12 + $0xc0] sm:$0xff] %vm680_vm0, %v7674_v48  ;;  %v7675_v15 = vadd.f32 %v10764_v18, %v6353_v29  ;;  %v6355_v14 = vpop.f32.mrb[147].mxu1 }
 0x690   : > { %6534 = vst.msk [vmem:[%s10767_s12 + $0xc8] sm:$0xff] %vm680_vm0, %v7675_v15 }
 0x693   : > { %v6358_v8 = vpop.f32.mrb[148].mxu1 }
 0x694   : > { %v7676_v6 = vadd.f32 %v10764_v18, %v6358_v8  ;;  %v6360_v19 = vpop.f32.mrb[149].mxu1 }
 0x695   : > { %v6361_v24 = vpop.f32.mrb[150].mxu1 }
 0x696   : > { %6535 = vst.msk [vmem:[%s10767_s12 + $0xd0] sm:$0xff] %vm680_vm0, %v7676_v6  ;;  %v7677_v30 = vadd.f32 %v10764_v18, %v6361_v24  ;;  %v6363_v50 = vpop.f32.mrb[151].mxu1 }
 0x698   : > { %6536 = vst.msk [vmem:[%s10767_s12 + $0xd8] sm:$0xff] %vm680_vm0, %v7677_v30 }
 0x69b   : > { %v6366_v3 = vpop.f32.mrb[152].mxu1 }
 0x69c   : > { %v7678_v46 = vadd.f32 %v10764_v18, %v6366_v3  ;;  %v6368_v33 = vpop.f32.mrb[153].mxu1 }
 0x69d   : > { %v6369_v16 = vpop.f32.mrb[154].mxu1 }
 0x69e   : > { %6537 = vst.msk [vmem:[%s10767_s12 + $0xe0] sm:$0xff] %vm680_vm0, %v7678_v46  ;;  %v7679_v44 = vadd.f32 %v10764_v18, %v6369_v16  ;;  %v6371_v37 = vpop.f32.mrb[155].mxu1 }
 0x6a0   : > { %6538 = vst.msk [vmem:[%s10767_s12 + $0xe8] sm:$0xff] %vm680_vm0, %v7679_v44 }
 0x6a3   : > { %v6374_v42 = vpop.f32.mrb[156].mxu1 }
 0x6a4   : > { %v7680_v0 = vadd.f32 %v10764_v18, %v6374_v42  ;;  %v6376_v35 = vpop.f32.mrb[157].mxu1 }
 0x6a5   : > { %v6377_v34 = vpop.f32.mrb[158].mxu1 }
 0x6a6   : > { %6539 = vst.msk [vmem:[%s10767_s12 + $0xf0] sm:$0xff] %vm680_vm0, %v7680_v0  ;;  %v7681_v58 = vadd.f32 %v10764_v18, %v6377_v34  ;;  %v6379_v60 = vpop.f32.mrb[159].mxu1 }
 0x6a8   : > { %6540 = vst.msk [vmem:[%s10767_s12 + $0xf8] sm:$0xff] %vm680_vm0, %v7681_v58 }
 0x6a9   : > { %8372 = shalt.err (!%p8369_p4)
}
 0x6aa   : > { %s8373_s15 = scalar_lea.hbm %s10864_s11, 4096  ;;  %s8377_s8 = scalar_lea.hbm %s10922_s7, 8192 }
 0x6ab   : > { %p8374_p9 = scmp.ne.s32.totalorder %s10864_s11, %s8373_s15  ;;  %p8378_p8 = scmp.lt.u32.totalorder %s10864_s11, %s10922_s7 }
 0x6ac   : > { %p8379_p13 = scmp.lt.u32.totalorder %s8377_s8, %s8373_s15  ;;  %p8381_p10 = scmp.lt.u32.totalorder %s8373_s15, %s10864_s11 }
 0x6ad   : > { %p8375_p0 = pnand %p8374_p9, %p8639_p5 }
 0x6ae   : > { %p8380_p6 = por %p8379_p13, %p8378_p8 }
 0x6af   : > { %p8376_p11 = pneg %p8375_p0 }
 0x6b0   : > { %p8382_p3 = por %p8381_p10, %p8380_p6 }
 0x6b2   : > { %p8383_p7 = pnand %p8382_p3, %p8376_p11 }
 0x6b4   : > { %8386 = shalt.err (!%p8383_p7)
}
 0x6b5   : > { %s8443_s29 = smov 128   ;;  %s8444_s23 = smov 8  }
 0x6b6   : > { %8000 = dma.vmem_to_hbm [thread:$0]  (%p8639_p5), %s10866_s16, 4096, %s10864_s11, %s6542_s28, %s8443_s29, %s8443_s29, %s8444_s23  }
 0x6b7 PF: > { %s10976_s20 = sld [smem:[#allocation18_spill]]  ;;  %s6570_s30 = sand.u32 1, %s8421_s24  }
 0x6b8   : > { %p10978_p1 = scmp.ge.s32.totalorder %s8433_s27, 2  ;;  %s6571_s9 = scalar_lea.sflag [#allocation7], %s6570_s30 }
 0x6bd   : > { %p10977_p12 = scmp.ne.s32.totalorder %s10976_s20, 0 }
 0x6bf   : > { %p8017_p2 = pnand %p10978_p1, %p10977_p12 }
 0x6c1   : > { %8416 = dma.done.wait (!%p8017_p2), %s6571_s9, 4096  }
 0x6c2   : > { %8418 = vsyncadd (!%p8017_p2), %s6571_s9, 4294963200  ;;  %p22_p4 = scmp.ge.s32.totalorder %s8625_s22, 4   ;;  %s10979_s24 = smov %s8425_s25 }
 0x6c3   : > { %s10980_s25 = smov %s8429_s26  ;;  %s10981_s26 = smov %s8635_s18 }
 0x6c4   : > { %s10982_s27 = smov %s8625_s22  ;;  %24 = sbr.rel (!%p22_p4) target bundleno = 7 (0x7), region = 117 }
 0x6cb   :  { %6576 = vsyncpa [#allocation6], 1 }
 0x6cc   :  { %6578 = vsyncpa [#allocation6 + $0x1], 1 }
 0x6cd   :  { %6579 = vsyncpa [#allocation9], 1 }
 0x6ce   :  { %6580 = vsyncpa [#allocation12], 1 }
 0x6cf   :  { %6581 = vsyncpa [#allocation7], 1 }
 0x6d0   :  { %6583 = vsyncpa [#allocation7 + $0x1], 1 }

</bundles_post_ra>
